<compile_context>
chip_gen: v7x
topology: tpu7x:2x2x1
jax: 0.10.0
libtpu: 0.0.40
codegen_flags: <defaults>
</compile_context>

<pallas_src>
import functools

import jax
import jax.numpy as jnp
from jax.experimental import pallas as pl
from jax.experimental.pallas import tpu as pltpu


# ----------------------------- Pallas kernel -------------------------------


def _im2col_3x3(hf, H, W, C):
    """Build the (H*W, 9*C) bf16 im2col operand for a 3x3 / stride-1 / pad-1
    conv from an (H*W, C) float32 activation laid out row-major (r = i*W + j).

    Window shifts stay register-resident: pltpu.roll along the flattened row
    (sublane) axis plus boundary masks, instead of bouncing through a padded
    VMEM scratch.  Tap order is (kh, kw) row-major, channel-minor, so the
    matching weight operand is simply the HWIO filter reshaped to (9*C, P).
    """
    HW = H * W
    # Output-pixel coordinates (used only for boundary masks).
    r_idx = jax.lax.broadcasted_iota(jnp.int32, (HW, C), 0)                    # i*W + j
    j_idx = jax.lax.broadcasted_iota(jnp.int32, (H, W, C), 1).reshape(HW, C)   # j

    pieces = []
    for dy in (-1, 0, 1):
        for dx in (-1, 0, 1):
            s = dy * W + dx                       # need piece[r] = hf[r + s]
            if s == 0:
                piece = hf
            else:
                # jnp.roll semantics: out[r] = in[(r - shift) mod HW]
                piece = pltpu.roll(hf, shift=(-s) % HW, axis=0)
            conds = []
            if dy == -1:
                conds.append(r_idx >= W)            # input row i-1 >= 0
            elif dy == 1:
                conds.append(r_idx < (H - 1) * W)   # input row i+1 <= H-1
            if dx == -1:
                conds.append(j_idx >= 1)            # input col j-1 >= 0
            elif dx == 1:
                conds.append(j_idx <= W - 2)        # input col j+1 <= W-1
            if conds:
                m = conds[0]
                for c in conds[1:]:
                    m = jnp.logical_and(m, c)
                piece = jnp.where(m, piece, 0.0)
            pieces.append(piece.astype(jnp.bfloat16))
    return jnp.concatenate(pieces, axis=1)          # (HW, 9*C) bf16


def _basic_block_kernel(has_downsample, H, W, Cin, P,
                        x_ref, w1_ref, w2_ref, wd_ref,
                        s1_ref, b1_ref, s2_ref, b2_ref, sd_ref, bd_ref,
                        o_ref):
    HW = H * W

    # conv1: 3x3 -> single im2col matmul (bf16 operands, f32 accumulation).
    xf = x_ref[0].reshape(HW, Cin)                                  # f32
    a1 = _im2col_3x3(xf, H, W, Cin)                                 # (HW, 9*Cin) bf16
    h = jnp.dot(a1, w1_ref[...], preferred_element_type=jnp.float32)   # (HW, P)
    # bn1 + relu (f32 elementwise on the VPU).
    h = jnp.maximum(h * s1_ref[...] + b1_ref[...], 0.0)

    # conv2: 3x3 -> single im2col matmul.
    a2 = _im2col_3x3(h, H, W, P)                                    # (HW, 9*P) bf16
    out = jnp.dot(a2, w2_ref[...], preferred_element_type=jnp.float32)  # (HW, P)
    out = out * s2_ref[...] + b2_ref[...]                           # bn2

    # Residual: re-read the VMEM-resident input block here (short live range)
    # instead of keeping xf alive across both convs.
    xr = x_ref[0].reshape(HW, Cin)
    if has_downsample:
        res = jnp.dot(xr.astype(jnp.bfloat16), wd_ref[...],
                      preferred_element_type=jnp.float32)           # 1x1 conv
        res = res * sd_ref[...] + bd_ref[...]                       # downsample BN
    else:
        res = xr                                                    # identity (Cin == P)

    o_ref[0] = jnp.maximum(out + res, 0.0).reshape(H, W, P).astype(o_ref.dtype)


# ------------------------------- wrapper ------------------------------------


def basic_block_pallas(x_nchw, params, has_downsample):
    N, Cin, H, W = x_nchw.shape
    P = params['w2_mat'].shape[-1]
    x = jnp.transpose(x_nchw, (0, 2, 3, 1))   # NCHW -> NHWC

    kernel = functools.partial(_basic_block_kernel, has_downsample, H, W, Cin, P)

    out_nhwc = pl.pallas_call(
        kernel,
        out_shape=jax.ShapeDtypeStruct((N, H, W, P), x.dtype),
        grid_spec=pltpu.PrefetchScalarGridSpec(
            num_scalar_prefetch=0,
            grid=(N,),
            in_specs=[
                pl.BlockSpec((1, H, W, Cin), lambda n: (n, 0, 0, 0)),   # x
                pl.BlockSpec((9 * Cin, P), lambda n: (0, 0)),           # w1 (im2col)
                pl.BlockSpec((9 * P, P), lambda n: (0, 0)),             # w2 (im2col)
                pl.BlockSpec((Cin, P), lambda n: (0, 0)),               # wd (1x1)
                pl.BlockSpec((1, P), lambda n: (0, 0)),                 # s1
                pl.BlockSpec((1, P), lambda n: (0, 0)),                 # b1
                pl.BlockSpec((1, P), lambda n: (0, 0)),                 # s2
                pl.BlockSpec((1, P), lambda n: (0, 0)),                 # b2
                pl.BlockSpec((1, P), lambda n: (0, 0)),                 # sd
                pl.BlockSpec((1, P), lambda n: (0, 0)),                 # bd
            ],
            out_specs=pl.BlockSpec((1, H, W, P), lambda n: (n, 0, 0, 0)),
        ),
        compiler_params=pltpu.CompilerParams(
            dimension_semantics=("parallel",)),     # batch axis independent (v7x 2 TCs)
    )(x, params['w1_mat'], params['w2_mat'], params['wd_mat'],
      params['s1'][None, :], params['b1'][None, :],
      params['s2'][None, :], params['b2'][None, :],
      params['sd'][None, :], params['bd'][None, :])

    return jnp.transpose(out_nhwc, (0, 3, 1, 2))   # NHWC -> NCHW


# --------------------------- parameter init ---------------------------------


def init_params(key, inplanes, planes, stride=1):
    expansion = 1
    assert stride == 1  # TODO(synk): stride > 1 not implemented in the Pallas kernel.
    has_downsample = (stride != 1) or (inplanes != planes * expansion)
    k1, k2, k3, k4, k5, k6 = jax.random.split(key, 6)

    def kaiming_oihw(k, cout, cin, kh, kw):
        fan_in = cin * kh * kw
        bound = (6.0 / fan_in) ** 0.5            # torch kaiming_uniform_ default
        return jax.random.uniform(k, (cout, cin, kh, kw), jnp.float32, -bound, bound)

    def bn_fold(k, c):                           # eval-mode BN folded to scale/shift
        kg, kb, km, kv = jax.random.split(k, 4)
        gamma = jax.random.uniform(kg, (c,), jnp.float32, 0.5, 1.5)
        beta = jax.random.uniform(kb, (c,), jnp.float32, -0.5, 0.5)
        mean = jax.random.uniform(km, (c,), jnp.float32, -0.5, 0.5)
        var = jax.random.uniform(kv, (c,), jnp.float32, 0.5, 1.5)
        scale = gamma / jnp.sqrt(var + 1e-5)
        return scale, beta - mean * scale

    w1 = kaiming_oihw(k1, planes, inplanes, 3, 3)
    w2 = kaiming_oihw(k2, planes, planes, 3, 3)
    wd = kaiming_oihw(k3, planes, inplanes, 1, 1)
    s1, b1 = bn_fold(k4, planes)
    s2, b2 = bn_fold(k5, planes)
    sd, bd = bn_fold(k6, planes)

    # Weights cast to bf16 host-side (MXU operands); HWIO for the reference,
    # im2col-reshaped (9*Cin, P) for the kernel.
    w1_hwio = jnp.transpose(w1, (2, 3, 1, 0)).astype(jnp.bfloat16)   # (3,3,Cin,P)
    w2_hwio = jnp.transpose(w2, (2, 3, 1, 0)).astype(jnp.bfloat16)   # (3,3,P,P)
    wd_hwio = jnp.transpose(wd, (2, 3, 1, 0)).astype(jnp.bfloat16)   # (1,1,Cin,P)

    params = dict(
        w1_hwio=w1_hwio, w2_hwio=w2_hwio, wd_hwio=wd_hwio,
        w1_mat=w1_hwio.reshape(9 * inplanes, planes),
        w2_mat=w2_hwio.reshape(9 * planes, planes),
        wd_mat=wd_hwio.reshape(inplanes, planes),
        s1=s1, b1=b1, s2=s2, b2=b2, sd=sd, bd=bd,
    )
    return params, has_downsample


# ---------------------------- pure-JAX reference ----------------------------


def _reference_nhwc(x, p, has_downsample):
    dn = ('NHWC', 'HWIO', 'NHWC')
    conv = functools.partial(jax.lax.conv_general_dilated,
                             window_strides=(1, 1), dimension_numbers=dn,
                             preferred_element_type=jnp.float32)
    h = conv(x.astype(jnp.bfloat16), p['w1_hwio'], padding=((1, 1), (1, 1)))
    h = jnp.maximum(h * p['s1'] + p['b1'], 0.0)                     # bn1 + relu
    h = conv(h.astype(jnp.bfloat16), p['w2_hwio'], padding=((1, 1), (1, 1)))
    h = h * p['s2'] + p['b2']                                       # bn2
    if has_downsample:
        res = conv(x.astype(jnp.bfloat16), p['wd_hwio'], padding=((0, 0), (0, 0)))
        res = res * p['sd'] + p['bd']
    else:
        res = x
    return jnp.maximum(h + res, 0.0)


def reference_nchw(x_nchw, p, has_downsample):
    x = jnp.transpose(x_nchw, (0, 2, 3, 1))
    return jnp.transpose(_reference_nhwc(x, p, has_downsample), (0, 3, 1, 2))


# --------------------------------- main --------------------------------------


if __name__ == "__main__":
    N, H, W = 2, 16, 16
    key = jax.random.PRNGKey(0)
    k_pa, k_pb, k_xa, k_xb = jax.random.split(key, 4)

    # Branch A: identity residual (inplanes == planes, downsample=None).
    params_a, ds_a = init_params(k_pa, inplanes=64, planes=64)
    x_a = jax.random.normal(k_xa, (N, 64, H, W), jnp.float32)
    out_a = basic_block_pallas(x_a, params_a, ds_a)
    jax.block_until_ready(out_a)
    ref_a = reference_nchw(x_a, params_a, ds_a)
    assert out_a.shape == (N, 64, H, W)
    assert jnp.allclose(out_a, ref_a, atol=1e-2, rtol=1e-2), "identity branch mismatch"

    # Branch B: downsample residual (1x1 conv + BN on the skip path).
    params_b, ds_b = init_params(k_pb, inplanes=32, planes=64)
    x_b = jax.random.normal(k_xb, (N, 32, H, W), jnp.float32)
    out_b = basic_block_pallas(x_b, params_b, ds_b)
    jax.block_until_ready(out_b)
    ref_b = reference_nchw(x_b, params_b, ds_b)
    assert out_b.shape == (N, 64, H, W)
    assert jnp.allclose(out_b, ref_b, atol=1e-2, rtol=1e-2), "downsample branch mismatch"

    print("KERNEL_OK")
</pallas_src>

<mosaic_0001>
module attributes {stable_mosaic.version = 11 : i64} {
  func.func @_basic_block_kernel(%arg0: i32, %arg1: memref<1x16x16x64xf32, #tpu.memory_space<vmem>>, %arg2: memref<576x64xbf16, #tpu.memory_space<vmem>>, %arg3: memref<576x64xbf16, #tpu.memory_space<vmem>>, %arg4: memref<64x64xbf16, #tpu.memory_space<vmem>>, %arg5: memref<1x64xf32, #tpu.memory_space<vmem>>, %arg6: memref<1x64xf32, #tpu.memory_space<vmem>>, %arg7: memref<1x64xf32, #tpu.memory_space<vmem>>, %arg8: memref<1x64xf32, #tpu.memory_space<vmem>>, %arg9: memref<1x64xf32, #tpu.memory_space<vmem>>, %arg10: memref<1x64xf32, #tpu.memory_space<vmem>>, %arg11: memref<1x16x16x64xf32, #tpu.memory_space<vmem>>) attributes {dimension_semantics = [#tpu.dimension_semantics<parallel>], iteration_bounds = array<i64: 2>, scalar_prefetch = 0 : i64, scratch_operands = 0 : i64, tpu.core_type = #tpu.core_type<tc>, window_params = [{transform_indices = @transform_0, window_bounds = array<i64: 1, 16, 16, 64>}, {pipeline_mode = #tpu.pipeline_mode<synchronous>, transform_indices = @transform_1, window_bounds = array<i64: 576, 64>}, {pipeline_mode = #tpu.pipeline_mode<synchronous>, transform_indices = @transform_2, window_bounds = array<i64: 576, 64>}, {pipeline_mode = #tpu.pipeline_mode<synchronous>, transform_indices = @transform_3, window_bounds = array<i64: 64, 64>}, {pipeline_mode = #tpu.pipeline_mode<synchronous>, transform_indices = @transform_4, window_bounds = array<i64: 1, 64>}, {pipeline_mode = #tpu.pipeline_mode<synchronous>, transform_indices = @transform_5, window_bounds = array<i64: 1, 64>}, {pipeline_mode = #tpu.pipeline_mode<synchronous>, transform_indices = @transform_6, window_bounds = array<i64: 1, 64>}, {pipeline_mode = #tpu.pipeline_mode<synchronous>, transform_indices = @transform_7, window_bounds = array<i64: 1, 64>}, {pipeline_mode = #tpu.pipeline_mode<synchronous>, transform_indices = @transform_8, window_bounds = array<i64: 1, 64>}, {pipeline_mode = #tpu.pipeline_mode<synchronous>, transform_indices = @transform_9, window_bounds = array<i64: 1, 64>}, {transform_indices = @transform_10, window_bounds = array<i64: 1, 16, 16, 64>}]} {
    %c0 = arith.constant 0 : index
    %c0_0 = arith.constant 0 : index
    %c0_1 = arith.constant 0 : index
    %c0_2 = arith.constant 0 : index
    %0 = vector.load %arg1[%c0, %c0_0, %c0_1, %c0_2] : memref<1x16x16x64xf32, #tpu.memory_space<vmem>>, vector<1x16x16x64xf32>
    %1 = vector.shape_cast %0 : vector<1x16x16x64xf32> to vector<16x16x64xf32>
    %2 = vector.shape_cast %1 : vector<16x16x64xf32> to vector<256x64xf32>
    %3 = tpu.iota {dimensions = array<i32: 0>} : vector<256x64xi32>
    %4 = tpu.iota {dimensions = array<i32: 1>} : vector<16x16x64xi32>
    %5 = vector.shape_cast %4 : vector<16x16x64xi32> to vector<256x64xi32>
    %c17_i32 = arith.constant 17 : i32
    %6 = tpu.dynamic_rotate %2 by %c17_i32 dim 0 : vector<256x64xf32>, i32 -> vector<256x64xf32>
    %c16_i32 = arith.constant 16 : i32
    %7 = vector.broadcast %c16_i32 : i32 to vector<256x64xi32>
    %8 = arith.cmpi sge, %3, %7 : vector<256x64xi32>
    %c1_i32 = arith.constant 1 : i32
    %9 = vector.broadcast %c1_i32 : i32 to vector<256x64xi32>
    %10 = arith.cmpi sge, %5, %9 : vector<256x64xi32>
    %11 = arith.andi %8, %10 : vector<256x64xi1>
    %cst = arith.constant 0.000000e+00 : f32
    %12 = vector.broadcast %cst : f32 to vector<256x64xf32>
    %13 = arith.select %11, %6, %12 : vector<256x64xi1>, vector<256x64xf32>
    %14 = arith.truncf %13 : vector<256x64xf32> to vector<256x64xbf16>
    %c16_i32_3 = arith.constant 16 : i32
    %15 = tpu.dynamic_rotate %2 by %c16_i32_3 dim 0 : vector<256x64xf32>, i32 -> vector<256x64xf32>
    %c16_i32_4 = arith.constant 16 : i32
    %16 = vector.broadcast %c16_i32_4 : i32 to vector<256x64xi32>
    %17 = arith.cmpi sge, %3, %16 : vector<256x64xi32>
    %cst_5 = arith.constant 0.000000e+00 : f32
    %18 = vector.broadcast %cst_5 : f32 to vector<256x64xf32>
    %19 = arith.select %17, %15, %18 : vector<256x64xi1>, vector<256x64xf32>
    %20 = arith.truncf %19 : vector<256x64xf32> to vector<256x64xbf16>
    %c15_i32 = arith.constant 15 : i32
    %21 = tpu.dynamic_rotate %2 by %c15_i32 dim 0 : vector<256x64xf32>, i32 -> vector<256x64xf32>
    %c16_i32_6 = arith.constant 16 : i32
    %22 = vector.broadcast %c16_i32_6 : i32 to vector<256x64xi32>
    %23 = arith.cmpi sge, %3, %22 : vector<256x64xi32>
    %c14_i32 = arith.constant 14 : i32
    %24 = vector.broadcast %c14_i32 : i32 to vector<256x64xi32>
    %25 = arith.cmpi sle, %5, %24 : vector<256x64xi32>
    %26 = arith.andi %23, %25 : vector<256x64xi1>
    %cst_7 = arith.constant 0.000000e+00 : f32
    %27 = vector.broadcast %cst_7 : f32 to vector<256x64xf32>
    %28 = arith.select %26, %21, %27 : vector<256x64xi1>, vector<256x64xf32>
    %29 = arith.truncf %28 : vector<256x64xf32> to vector<256x64xbf16>
    %c1_i32_8 = arith.constant 1 : i32
    %30 = tpu.dynamic_rotate %2 by %c1_i32_8 dim 0 : vector<256x64xf32>, i32 -> vector<256x64xf32>
    %c1_i32_9 = arith.constant 1 : i32
    %31 = vector.broadcast %c1_i32_9 : i32 to vector<256x64xi32>
    %32 = arith.cmpi sge, %5, %31 : vector<256x64xi32>
    %cst_10 = arith.constant 0.000000e+00 : f32
    %33 = vector.broadcast %cst_10 : f32 to vector<256x64xf32>
    %34 = arith.select %32, %30, %33 : vector<256x64xi1>, vector<256x64xf32>
    %35 = arith.truncf %34 : vector<256x64xf32> to vector<256x64xbf16>
    %36 = arith.truncf %2 : vector<256x64xf32> to vector<256x64xbf16>
    %c255_i32 = arith.constant 255 : i32
    %37 = tpu.dynamic_rotate %2 by %c255_i32 dim 0 : vector<256x64xf32>, i32 -> vector<256x64xf32>
    %c14_i32_11 = arith.constant 14 : i32
    %38 = vector.broadcast %c14_i32_11 : i32 to vector<256x64xi32>
    %39 = arith.cmpi sle, %5, %38 : vector<256x64xi32>
    %cst_12 = arith.constant 0.000000e+00 : f32
    %40 = vector.broadcast %cst_12 : f32 to vector<256x64xf32>
    %41 = arith.select %39, %37, %40 : vector<256x64xi1>, vector<256x64xf32>
    %42 = arith.truncf %41 : vector<256x64xf32> to vector<256x64xbf16>
    %c241_i32 = arith.constant 241 : i32
    %43 = tpu.dynamic_rotate %2 by %c241_i32 dim 0 : vector<256x64xf32>, i32 -> vector<256x64xf32>
    %c240_i32 = arith.constant 240 : i32
    %44 = vector.broadcast %c240_i32 : i32 to vector<256x64xi32>
    %45 = arith.cmpi slt, %3, %44 : vector<256x64xi32>
    %c1_i32_13 = arith.constant 1 : i32
    %46 = vector.broadcast %c1_i32_13 : i32 to vector<256x64xi32>
    %47 = arith.cmpi sge, %5, %46 : vector<256x64xi32>
    %48 = arith.andi %45, %47 : vector<256x64xi1>
    %cst_14 = arith.constant 0.000000e+00 : f32
    %49 = vector.broadcast %cst_14 : f32 to vector<256x64xf32>
    %50 = arith.select %48, %43, %49 : vector<256x64xi1>, vector<256x64xf32>
    %51 = arith.truncf %50 : vector<256x64xf32> to vector<256x64xbf16>
    %c240_i32_15 = arith.constant 240 : i32
    %52 = tpu.dynamic_rotate %2 by %c240_i32_15 dim 0 : vector<256x64xf32>, i32 -> vector<256x64xf32>
    %c240_i32_16 = arith.constant 240 : i32
    %53 = vector.broadcast %c240_i32_16 : i32 to vector<256x64xi32>
    %54 = arith.cmpi slt, %3, %53 : vector<256x64xi32>
    %cst_17 = arith.constant 0.000000e+00 : f32
    %55 = vector.broadcast %cst_17 : f32 to vector<256x64xf32>
    %56 = arith.select %54, %52, %55 : vector<256x64xi1>, vector<256x64xf32>
    %57 = arith.truncf %56 : vector<256x64xf32> to vector<256x64xbf16>
    %c239_i32 = arith.constant 239 : i32
    %58 = tpu.dynamic_rotate %2 by %c239_i32 dim 0 : vector<256x64xf32>, i32 -> vector<256x64xf32>
    %c240_i32_18 = arith.constant 240 : i32
    %59 = vector.broadcast %c240_i32_18 : i32 to vector<256x64xi32>
    %60 = arith.cmpi slt, %3, %59 : vector<256x64xi32>
    %c14_i32_19 = arith.constant 14 : i32
    %61 = vector.broadcast %c14_i32_19 : i32 to vector<256x64xi32>
    %62 = arith.cmpi sle, %5, %61 : vector<256x64xi32>
    %63 = arith.andi %60, %62 : vector<256x64xi1>
    %cst_20 = arith.constant 0.000000e+00 : f32
    %64 = vector.broadcast %cst_20 : f32 to vector<256x64xf32>
    %65 = arith.select %63, %58, %64 : vector<256x64xi1>, vector<256x64xf32>
    %66 = arith.truncf %65 : vector<256x64xf32> to vector<256x64xbf16>
    %67 = tpu.concatenate %14, %20, %29, %35, %36, %42, %51, %57, %66 in 1 : vector<256x64xbf16>, vector<256x64xbf16>, vector<256x64xbf16>, vector<256x64xbf16>, vector<256x64xbf16>, vector<256x64xbf16>, vector<256x64xbf16>, vector<256x64xbf16>, vector<256x64xbf16> -> vector<256x576xbf16>
    %c0_21 = arith.constant 0 : index
    %c0_22 = arith.constant 0 : index
    %68 = vector.load %arg2[%c0_21, %c0_22] : memref<576x64xbf16, #tpu.memory_space<vmem>>, vector<576x64xbf16>
    %cst_23 = arith.constant dense<0.000000e+00> : vector<256x64xf32>
    %69 = tpu.matmul %67, %68, %cst_23 {dimension_numbers = #tpu.dot_dimension_numbers<[1], [0], [0], [1], [0, 0, 1, 1], [], []>} : vector<256x576xbf16>, vector<576x64xbf16>, vector<256x64xf32> -> vector<256x64xf32>
    %c0_24 = arith.constant 0 : index
    %c0_25 = arith.constant 0 : index
    %70 = vector.load %arg5[%c0_24, %c0_25] : memref<1x64xf32, #tpu.memory_space<vmem>>, vector<1x64xf32>
    %71 = vector.broadcast %70 : vector<1x64xf32> to vector<256x64xf32>
    %72 = arith.mulf %69, %71 : vector<256x64xf32>
    %c0_26 = arith.constant 0 : index
    %c0_27 = arith.constant 0 : index
    %73 = vector.load %arg6[%c0_26, %c0_27] : memref<1x64xf32, #tpu.memory_space<vmem>>, vector<1x64xf32>
    %74 = vector.broadcast %73 : vector<1x64xf32> to vector<256x64xf32>
    %75 = arith.addf %72, %74 : vector<256x64xf32>
    %cst_28 = arith.constant 0.000000e+00 : f32
    %76 = vector.broadcast %cst_28 : f32 to vector<256x64xf32>
    %77 = arith.maximumf %75, %76 : vector<256x64xf32>
    %78 = tpu.iota {dimensions = array<i32: 0>} : vector<256x64xi32>
    %79 = tpu.iota {dimensions = array<i32: 1>} : vector<16x16x64xi32>
    %80 = vector.shape_cast %79 : vector<16x16x64xi32> to vector<256x64xi32>
    %c17_i32_29 = arith.constant 17 : i32
    %81 = tpu.dynamic_rotate %77 by %c17_i32_29 dim 0 : vector<256x64xf32>, i32 -> vector<256x64xf32>
    %c16_i32_30 = arith.constant 16 : i32
    %82 = vector.broadcast %c16_i32_30 : i32 to vector<256x64xi32>
    %83 = arith.cmpi sge, %78, %82 : vector<256x64xi32>
    %c1_i32_31 = arith.constant 1 : i32
    %84 = vector.broadcast %c1_i32_31 : i32 to vector<256x64xi32>
    %85 = arith.cmpi sge, %80, %84 : vector<256x64xi32>
    %86 = arith.andi %83, %85 : vector<256x64xi1>
    %cst_32 = arith.constant 0.000000e+00 : f32
    %87 = vector.broadcast %cst_32 : f32 to vector<256x64xf32>
    %88 = arith.select %86, %81, %87 : vector<256x64xi1>, vector<256x64xf32>
    %89 = arith.truncf %88 : vector<256x64xf32> to vector<256x64xbf16>
    %c16_i32_33 = arith.constant 16 : i32
    %90 = tpu.dynamic_rotate %77 by %c16_i32_33 dim 0 : vector<256x64xf32>, i32 -> vector<256x64xf32>
    %c16_i32_34 = arith.constant 16 : i32
    %91 = vector.broadcast %c16_i32_34 : i32 to vector<256x64xi32>
    %92 = arith.cmpi sge, %78, %91 : vector<256x64xi32>
    %cst_35 = arith.constant 0.000000e+00 : f32
    %93 = vector.broadcast %cst_35 : f32 to vector<256x64xf32>
    %94 = arith.select %92, %90, %93 : vector<256x64xi1>, vector<256x64xf32>
    %95 = arith.truncf %94 : vector<256x64xf32> to vector<256x64xbf16>
    %c15_i32_36 = arith.constant 15 : i32
    %96 = tpu.dynamic_rotate %77 by %c15_i32_36 dim 0 : vector<256x64xf32>, i32 -> vector<256x64xf32>
    %c16_i32_37 = arith.constant 16 : i32
    %97 = vector.broadcast %c16_i32_37 : i32 to vector<256x64xi32>
    %98 = arith.cmpi sge, %78, %97 : vector<256x64xi32>
    %c14_i32_38 = arith.constant 14 : i32
    %99 = vector.broadcast %c14_i32_38 : i32 to vector<256x64xi32>
    %100 = arith.cmpi sle, %80, %99 : vector<256x64xi32>
    %101 = arith.andi %98, %100 : vector<256x64xi1>
    %cst_39 = arith.constant 0.000000e+00 : f32
    %102 = vector.broadcast %cst_39 : f32 to vector<256x64xf32>
    %103 = arith.select %101, %96, %102 : vector<256x64xi1>, vector<256x64xf32>
    %104 = arith.truncf %103 : vector<256x64xf32> to vector<256x64xbf16>
    %c1_i32_40 = arith.constant 1 : i32
    %105 = tpu.dynamic_rotate %77 by %c1_i32_40 dim 0 : vector<256x64xf32>, i32 -> vector<256x64xf32>
    %c1_i32_41 = arith.constant 1 : i32
    %106 = vector.broadcast %c1_i32_41 : i32 to vector<256x64xi32>
    %107 = arith.cmpi sge, %80, %106 : vector<256x64xi32>
    %cst_42 = arith.constant 0.000000e+00 : f32
    %108 = vector.broadcast %cst_42 : f32 to vector<256x64xf32>
    %109 = arith.select %107, %105, %108 : vector<256x64xi1>, vector<256x64xf32>
    %110 = arith.truncf %109 : vector<256x64xf32> to vector<256x64xbf16>
    %111 = arith.truncf %77 : vector<256x64xf32> to vector<256x64xbf16>
    %c255_i32_43 = arith.constant 255 : i32
    %112 = tpu.dynamic_rotate %77 by %c255_i32_43 dim 0 : vector<256x64xf32>, i32 -> vector<256x64xf32>
    %c14_i32_44 = arith.constant 14 : i32
    %113 = vector.broadcast %c14_i32_44 : i32 to vector<256x64xi32>
    %114 = arith.cmpi sle, %80, %113 : vector<256x64xi32>
    %cst_45 = arith.constant 0.000000e+00 : f32
    %115 = vector.broadcast %cst_45 : f32 to vector<256x64xf32>
    %116 = arith.select %114, %112, %115 : vector<256x64xi1>, vector<256x64xf32>
    %117 = arith.truncf %116 : vector<256x64xf32> to vector<256x64xbf16>
    %c241_i32_46 = arith.constant 241 : i32
    %118 = tpu.dynamic_rotate %77 by %c241_i32_46 dim 0 : vector<256x64xf32>, i32 -> vector<256x64xf32>
    %c240_i32_47 = arith.constant 240 : i32
    %119 = vector.broadcast %c240_i32_47 : i32 to vector<256x64xi32>
    %120 = arith.cmpi slt, %78, %119 : vector<256x64xi32>
    %c1_i32_48 = arith.constant 1 : i32
    %121 = vector.broadcast %c1_i32_48 : i32 to vector<256x64xi32>
    %122 = arith.cmpi sge, %80, %121 : vector<256x64xi32>
    %123 = arith.andi %120, %122 : vector<256x64xi1>
    %cst_49 = arith.constant 0.000000e+00 : f32
    %124 = vector.broadcast %cst_49 : f32 to vector<256x64xf32>
    %125 = arith.select %123, %118, %124 : vector<256x64xi1>, vector<256x64xf32>
    %126 = arith.truncf %125 : vector<256x64xf32> to vector<256x64xbf16>
    %c240_i32_50 = arith.constant 240 : i32
    %127 = tpu.dynamic_rotate %77 by %c240_i32_50 dim 0 : vector<256x64xf32>, i32 -> vector<256x64xf32>
    %c240_i32_51 = arith.constant 240 : i32
    %128 = vector.broadcast %c240_i32_51 : i32 to vector<256x64xi32>
    %129 = arith.cmpi slt, %78, %128 : vector<256x64xi32>
    %cst_52 = arith.constant 0.000000e+00 : f32
    %130 = vector.broadcast %cst_52 : f32 to vector<256x64xf32>
    %131 = arith.select %129, %127, %130 : vector<256x64xi1>, vector<256x64xf32>
    %132 = arith.truncf %131 : vector<256x64xf32> to vector<256x64xbf16>
    %c239_i32_53 = arith.constant 239 : i32
    %133 = tpu.dynamic_rotate %77 by %c239_i32_53 dim 0 : vector<256x64xf32>, i32 -> vector<256x64xf32>
    %c240_i32_54 = arith.constant 240 : i32
    %134 = vector.broadcast %c240_i32_54 : i32 to vector<256x64xi32>
    %135 = arith.cmpi slt, %78, %134 : vector<256x64xi32>
    %c14_i32_55 = arith.constant 14 : i32
    %136 = vector.broadcast %c14_i32_55 : i32 to vector<256x64xi32>
    %137 = arith.cmpi sle, %80, %136 : vector<256x64xi32>
    %138 = arith.andi %135, %137 : vector<256x64xi1>
    %cst_56 = arith.constant 0.000000e+00 : f32
    %139 = vector.broadcast %cst_56 : f32 to vector<256x64xf32>
    %140 = arith.select %138, %133, %139 : vector<256x64xi1>, vector<256x64xf32>
    %141 = arith.truncf %140 : vector<256x64xf32> to vector<256x64xbf16>
    %142 = tpu.concatenate %89, %95, %104, %110, %111, %117, %126, %132, %141 in 1 : vector<256x64xbf16>, vector<256x64xbf16>, vector<256x64xbf16>, vector<256x64xbf16>, vector<256x64xbf16>, vector<256x64xbf16>, vector<256x64xbf16>, vector<256x64xbf16>, vector<256x64xbf16> -> vector<256x576xbf16>
    %c0_57 = arith.constant 0 : index
    %c0_58 = arith.constant 0 : index
    %143 = vector.load %arg3[%c0_57, %c0_58] : memref<576x64xbf16, #tpu.memory_space<vmem>>, vector<576x64xbf16>
    %cst_59 = arith.constant dense<0.000000e+00> : vector<256x64xf32>
    %144 = tpu.matmul %142, %143, %cst_59 {dimension_numbers = #tpu.dot_dimension_numbers<[1], [0], [0], [1], [0, 0, 1, 1], [], []>} : vector<256x576xbf16>, vector<576x64xbf16>, vector<256x64xf32> -> vector<256x64xf32>
    %c0_60 = arith.constant 0 : index
    %c0_61 = arith.constant 0 : index
    %145 = vector.load %arg7[%c0_60, %c0_61] : memref<1x64xf32, #tpu.memory_space<vmem>>, vector<1x64xf32>
    %146 = vector.broadcast %145 : vector<1x64xf32> to vector<256x64xf32>
    %147 = arith.mulf %144, %146 : vector<256x64xf32>
    %c0_62 = arith.constant 0 : index
    %c0_63 = arith.constant 0 : index
    %148 = vector.load %arg8[%c0_62, %c0_63] : memref<1x64xf32, #tpu.memory_space<vmem>>, vector<1x64xf32>
    %149 = vector.broadcast %148 : vector<1x64xf32> to vector<256x64xf32>
    %150 = arith.addf %147, %149 : vector<256x64xf32>
    %c0_64 = arith.constant 0 : index
    %c0_65 = arith.constant 0 : index
    %c0_66 = arith.constant 0 : index
    %c0_67 = arith.constant 0 : index
    %151 = vector.load %arg1[%c0_64, %c0_65, %c0_66, %c0_67] : memref<1x16x16x64xf32, #tpu.memory_space<vmem>>, vector<1x16x16x64xf32>
    %152 = vector.shape_cast %151 : vector<1x16x16x64xf32> to vector<16x16x64xf32>
    %153 = vector.shape_cast %152 : vector<16x16x64xf32> to vector<256x64xf32>
    %154 = arith.addf %150, %153 : vector<256x64xf32>
    %cst_68 = arith.constant 0.000000e+00 : f32
    %155 = vector.broadcast %cst_68 : f32 to vector<256x64xf32>
    %156 = arith.maximumf %154, %155 : vector<256x64xf32>
    %157 = vector.shape_cast %156 : vector<256x64xf32> to vector<16x16x64xf32>
    %c0_69 = arith.constant 0 : index
    %c0_70 = arith.constant 0 : index
    %c0_71 = arith.constant 0 : index
    %c0_72 = arith.constant 0 : index
    %158 = vector.load %arg11[%c0_69, %c0_70, %c0_71, %c0_72] : memref<1x16x16x64xf32, #tpu.memory_space<vmem>>, vector<1x16x16x64xf32>
    %159 = vector.shape_cast %158 : vector<1x16x16x64xf32> to vector<16x16x64xf32>
    %160 = vector.shape_cast %157 : vector<16x16x64xf32> to vector<1x16x16x64xf32>
    tpu.vector_store %arg11[%c0_69, %c0_70, %c0_71, %c0_72], %160 {strides = array<i32>} : memref<1x16x16x64xf32, #tpu.memory_space<vmem>>, vector<1x16x16x64xf32>,
    return
  }
  func.func @transform_0(%arg0: i32) -> (i32, i32, i32, i32) {
    %c0_i32 = arith.constant 0 : i32
    %c0_i32_0 = arith.constant 0 : i32
    %c0_i32_1 = arith.constant 0 : i32
    %c0_i32_2 = arith.constant 0 : i32
    return %arg0, %c0_i32, %c0_i32_0, %c0_i32_1 : i32, i32, i32, i32
  }
  func.func @transform_1(%arg0: i32) -> (i32, i32) {
    %c0_i32 = arith.constant 0 : i32
    %c0_i32_0 = arith.constant 0 : i32
    %c0_i32_1 = arith.constant 0 : i32
    return %c0_i32, %c0_i32_0 : i32, i32
  }
  func.func @transform_2(%arg0: i32) -> (i32, i32) {
    %c0_i32 = arith.constant 0 : i32
    %c0_i32_0 = arith.constant 0 : i32
    %c0_i32_1 = arith.constant 0 : i32
    return %c0_i32, %c0_i32_0 : i32, i32
  }
  func.func @transform_3(%arg0: i32) -> (i32, i32) {
    %c0_i32 = arith.constant 0 : i32
    %c0_i32_0 = arith.constant 0 : i32
    %c0_i32_1 = arith.constant 0 : i32
    return %c0_i32, %c0_i32_0 : i32, i32
  }
  func.func @transform_4(%arg0: i32) -> (i32, i32) {
    %c0_i32 = arith.constant 0 : i32
    %c0_i32_0 = arith.constant 0 : i32
    %c0_i32_1 = arith.constant 0 : i32
    return %c0_i32, %c0_i32_0 : i32, i32
  }
  func.func @transform_5(%arg0: i32) -> (i32, i32) {
    %c0_i32 = arith.constant 0 : i32
    %c0_i32_0 = arith.constant 0 : i32
    %c0_i32_1 = arith.constant 0 : i32
    return %c0_i32, %c0_i32_0 : i32, i32
  }
  func.func @transform_6(%arg0: i32) -> (i32, i32) {
    %c0_i32 = arith.constant 0 : i32
    %c0_i32_0 = arith.constant 0 : i32
    %c0_i32_1 = arith.constant 0 : i32
    return %c0_i32, %c0_i32_0 : i32, i32
  }
  func.func @transform_7(%arg0: i32) -> (i32, i32) {
    %c0_i32 = arith.constant 0 : i32
    %c0_i32_0 = arith.constant 0 : i32
    %c0_i32_1 = arith.constant 0 : i32
    return %c0_i32, %c0_i32_0 : i32, i32
  }
  func.func @transform_8(%arg0: i32) -> (i32, i32) {
    %c0_i32 = arith.constant 0 : i32
    %c0_i32_0 = arith.constant 0 : i32
    %c0_i32_1 = arith.constant 0 : i32
    return %c0_i32, %c0_i32_0 : i32, i32
  }
  func.func @transform_9(%arg0: i32) -> (i32, i32) {
    %c0_i32 = arith.constant 0 : i32
    %c0_i32_0 = arith.constant 0 : i32
    %c0_i32_1 = arith.constant 0 : i32
    return %c0_i32, %c0_i32_0 : i32, i32
  }
  func.func @transform_10(%arg0: i32) -> (i32, i32, i32, i32) {
    %c0_i32 = arith.constant 0 : i32
    %c0_i32_0 = arith.constant 0 : i32
    %c0_i32_1 = arith.constant 0 : i32
    %c0_i32_2 = arith.constant 0 : i32
    return %arg0, %c0_i32, %c0_i32_0, %c0_i32_1 : i32, i32, i32, i32
  }
}

</mosaic_0001>

<bundles_post_ra>
// kernel: tpu_custom_call.1
= control target key start
LH: loop header
LB: loop body
LE: loop exit
PB: predicated region body
PF: predicated region fallthrough
CT: control target
= control target key end

     0   :  { %15 = vsyncpa [#allocation3], 0  ;;  %s8109_s0 = inlined_call_operand.vmem [shape: f32[2,16,16,64], index: 0, kind: input, shape index: {}]   ;;  %s8110_s1 = inlined_call_operand.vmem [shape: bf16[576,64], index: 1, kind: input, shape index: {}]   ;;  %s8111_s2 = inlined_call_operand.vmem [shape: bf16[576,64], index: 2, kind: input, shape index: {}]   ;;  %s8112_s3 = inlined_call_operand.vmem [shape: bf16[64,64], index: 3, kind: input, shape index: {}]   ;;  %s8113_s4 = inlined_call_operand.vmem [shape: f32[1,64], index: 4, kind: input, shape index: {}]   ;;  %s8114_s5 = inlined_call_operand.vmem [shape: f32[1,64], index: 5, kind: input, shape index: {}]   ;;  %s8115_s6 = inlined_call_operand.vmem [shape: f32[1,64], index: 6, kind: input, shape index: {}]   ;;  %s8116_s7 = inlined_call_operand.vmem [shape: f32[1,64], index: 7, kind: input, shape index: {}]   ;;  %s8117_s8 = inlined_call_operand.vmem [shape: f32[1,64], index: 8, kind: input, shape index: {}]   ;;  %s8118_s9 = inlined_call_operand.vmem [shape: f32[1,64], index: 9, kind: input, shape index: {}]   ;;  %s8119_s10 = inlined_call_operand.hbm [shape: f32[2,16,16,64], index: 10, kind: output, shape index: {}]  }
   0x1   :  { %17 = vsyncpa [#allocation3 + $0x1], 0  ;;  %s5532_s12 = smov 0   ;;  %s5534_s13 = smov 0  }
   0x2   :  { %s5536_s14 = smov 0   ;;  %s5538_s15 = smov 0  }
   0x3 LB: > { %s5553_s8 = sadd.s32 4294967295, %s5470_s15   ;;  %s4573_s9 = sadd.s32 4294967294, %s5470_s15   ;;  %s5470_s15 = sphi %s5538_s15, %s8253_s15   ;;  %s5466_s14 = sphi %s5536_s14, %s8252_s14   ;;  %s5462_s13 = sphi %s5534_s13, %s8251_s13   ;;  %s5458_s12 = sphi %s5532_s12, %s8250_s12  }
   0x4   : > { %s5557_s16 = sadd.s32 1, %s5470_s15   ;;  %s245_s17 = sadd.s32 1, %s5466_s14 }
   0x5   : > { %s242_s18 = ssub.s32 %s5470_s15, %s5557_s16  ;;  %p255_p0 = scmp.ne.s32.totalorder %s5466_s14, %s5462_s13 }
   0x6   : > { %p243_p1 = scmp.eq.s32.totalorder %s242_s18, 0  ;;  %p256_p2 = scmp.eq.s32.totalorder %s5553_s8, 1 }
   0x7   : > { %p261_p3 = scmp.ne.s32.totalorder %s5462_s13, %s5458_s12  ;;  %p262_p4 = scmp.eq.s32.totalorder %s4573_s9, 1 }
   0x8   : > { %s5568_s19 = scalar_select %p243_p1, %s5466_s14, %s245_s17  }
   0x9   : > { %p5570_p5 = por %p256_p2, %p255_p0  ;;  %p5574_p6 = por %p262_p4, %p261_p3 }
   0xa   : > { %p4576_p7 = scmp.ge.s32.totalorder %s5470_s15, 1  ;;  %p315_p8 = scmp.lt.s32.totalorder %s5470_s15, 3 }
   0xc   : > { %p316_p9 = pnand %p4576_p7, %p315_p8 }
   0xe   : > { %319 = sbr.rel (%p316_p9) target bundleno = 1107 (0x453), region = 60 }
  0x15   : > { %p353_p10 = scmp.lt.s32.totalorder %s5553_s8, 1  ;;  %v391_v0 = vlaneseq  ;;  %v5304_v1 = vld [vmem:[%s8110_s1 + $0x40] sm:$0xff]   ;;  %v5306_v4 = vld [vmem:[%s8110_s1 + $0x48] sm:$0xff]   ;;  %v5308_v6 = vld [vmem:[%s8110_s1 + $0x50] sm:$0xff]   ;;  %s5472_s23 = smov 64   ;;  %v8120_v42 = vmov 0.0|0.0  }
  0x16   : > { %4693 = vmatprep.subr.bf16.mxu0 %v5304_v1  ;;  %v5305_v3 = vld [vmem:[%s8110_s1] sm:$0xff]   ;;  %v5307_v5 = vld [vmem:[%s8110_s1 + $0x8] sm:$0xff]   ;;  %v5309_v45 = vld [vmem:[%s8110_s1 + $0x10] sm:$0xff]   ;;  %vm1342_vm4 = vcmask 523264   ;;  %s350_s11 = sand.u32 1, %s5462_s13  }
  0x17   : > { %s354_s24 = scalar_select %p353_p10, %s5553_s8, 1  ;;  %v5585_v2 = vshrl.u32 %v391_v0, 7  ;;  %4694 = vmatpush3.bf16.msra.mxu0 %v5305_v3  ;;  %v5310_v46 = vld [vmem:[%s8110_s1 + $0x58] sm:$0xff]   ;;  %v5312_v57 = vld [vmem:[%s8110_s1 + $0x60] sm:$0xff]   ;;  %v5314_v3 = vld [vmem:[%s8110_s1 + $0x68] sm:$0xff]  }
  0x18   : > { %4695 = vmatprep.subr.bf16.mxu0 %v5306_v4  ;;  %v5311_v54 = vld [vmem:[%s8110_s1 + $0x18] sm:$0xff]   ;;  %v5313_v0 = vld [vmem:[%s8110_s1 + $0x20] sm:$0xff]   ;;  %s4577_s18 = sshll.u32 %s350_s11, 8 }
  0x19   : > { %s4691_s29 = sshll.u32 %s354_s24, 8  ;;  %vm456_vm0 = vcmp.lt.s32.totalorder %v5585_v2, 1  ;;  %vm521_vm1 = vcmp.ge.s32.totalorder %v5585_v2, 1  ;;  %vm683_vm2 = vcmp.lt.s32.totalorder %v5585_v2, 7  ;;  %s7863_s22 = scalar_lea.vmem [#allocation2], %s4577_s18 }
  0x1a   : > { %s5599_s17 = scalar_lea.vmem %s8109_s0, %s4691_s29  ;;  %s4692_s24 = sshll.u32 %s5553_s8, 12 }
  0x1b   : > { %v5605_v7 = vld [vmem:[%s5599_s17] sm:$0xff]  ;;  %v5608_v8 = vld [vmem:[%s5599_s17 + $0x8] sm:$0xff]  ;;  %v5611_v9 = vld [vmem:[%s5599_s17 + $0xf8] sm:$0xff]  ;;  %4696 = vmatpush3.bf16.msra.mxu0 %v5307_v5  ;;  %s4511_s25 = sshll.u32 %s7863_s22, 4  ;;  %s8056_s28 = scalar_lea.hbm %s8119_s10, %s4692_s24  ;;  %s8058_s25 = int_to_ptr.vmem [resolvable:$true] %s4511_s25 }
  0x1c   : > { %v424_v10 = vrot.slane %v5605_v7, 7  ;;  %v425_v11 = vrot.slane %v5608_v8, 7  ;;  %v8123_v12 = vrot.slane %v5611_v9, 7  ;;  %v5619_v13 = vld [vmem:[%s5599_s17 + $0x10] sm:$0xff]  ;;  %v5622_v14 = vld [vmem:[%s5599_s17 + $0x18] sm:$0xff]  ;;  %v5625_v15 = vld [vmem:[%s5599_s17 + $0x20] sm:$0xff]  ;;  %4697 = vmatprep.subr.bf16.mxu0 %v5308_v6  ;;  %v5670_v34 = vpack.c.bf16 %v5608_v8, %v5605_v7 }
  0x1d   : > { %v426_v16 = vrot.slane %v5619_v13, 7  ;;  %v427_v17 = vrot.slane %v5622_v14, 7  ;;  %v5630_v18 = vld [vmem:[%s5599_s17 + $0x28] sm:$0xff]  ;;  %v428_v19 = vrot.slane %v5625_v15, 7  ;;  %v5634_v20 = vld [vmem:[%s5599_s17 + $0x30] sm:$0xff]  ;;  %v5656_v30 = vld [vmem:[%s5599_s17 + $0x38] sm:$0xff]  ;;  %v5703_v47 = vpack.c.bf16 %v5622_v14, %v5619_v13 }
  0x1e   : > { %v487_v21 = vsel %vm456_vm0, %v424_v10, %v425_v11  ;;  %v488_v22 = vsel %vm456_vm0, %v8123_v12, %v424_v10  ;;  %v429_v26 = vrot.slane %v5630_v18, 7  ;;  %v430_v31 = vrot.slane %v5634_v20, 7  ;;  %v5662_v33 = vld [vmem:[%s5599_s17 + $0x40] sm:$0xff]  ;;  %v5680_v39 = vld [vmem:[%s5599_s17 + $0x48] sm:$0xff]  ;;  %v5684_v41 = vld [vmem:[%s5599_s17 + $0x50] sm:$0xff]  ;;  %s8068_s8 = scalar_lea.sflag [#allocation3], %s350_s11 }
  0x1f   : > { %v557_v23 = vsel %vm521_vm1, %v488_v22, 0.0  ;;  %v485_v24 = vsel %vm456_vm0, %v426_v16, %v427_v17  ;;  %v486_v25 = vsel %vm456_vm0, %v425_v11, %v426_v16  ;;  %v484_v29 = vsel %vm456_vm0, %v427_v17, %v428_v19  ;;  %v5691_v44 = vld [vmem:[%s5599_s17 + $0x58] sm:$0xff]  ;;  %v5714_v53 = vld [vmem:[%s5599_s17 + $0x60] sm:$0xff]  ;;  %4698 = vmatpush3.bf16.msra.mxu0 %v5309_v45  ;;  %v5724_v56 = vld [vmem:[%s5599_s17 + $0x68] sm:$0xff]  ;;  %s5474_s29 = smov [#allocation2]  }
  0x20   : > { %v5649_v27 = vpack.c.bf16 %v487_v21, %v557_v23  ;;  %v559_v28 = vsel %vm521_vm1, %v486_v25, 0.0  ;;  %v483_v35 = vsel %vm456_vm0, %v428_v19, %v429_v26  ;;  %v561_v36 = vsel %vm521_vm1, %v484_v29, 0.0  ;;  %4699 = vmatprep.subr.bf16.mxu0 %v5310_v46  ;;  %v5747_v1 = vld [vmem:[%s5599_s17 + $0x70] sm:$0xff]  ;;  %v5757_v5 = vld [vmem:[%s5599_s17 + $0x78] sm:$0xff]  ;;  %v5315_v22 = vld [vmem:[%s8110_s1 + $0x28] sm:$0xff]  }
  0x21   : > { %v5659_v32 = vpack.c.bf16 %v485_v24, %v559_v28  ;;  %v431_v37 = vrot.slane %v5656_v30, 7  ;;  %v482_v38 = vsel %vm456_vm0, %v429_v26, %v430_v31  ;;  %v432_v40 = vrot.slane %v5662_v33, 7  ;;  %v5316_v23 = vld [vmem:[%s8110_s1 + $0x70] sm:$0xff]   ;;  %v5789_v26 = vld [vmem:[%s5599_s17 + $0x80] sm:$0xff]  ;;  %v5318_v45 = vld [vmem:[%s8110_s1 + $0x78] sm:$0xff]  }
  0x22   : > { %1214 = vrot.lane.b32.xlu0 %v5649_v27, %s5472_s23  ;;  %v5688_v43 = vpack.c.bf16 %v483_v35, %v561_v36  ;;  %v563_v49 = vsel %vm521_vm1, %v482_v38, 0.0  ;;  %v433_v50 = vrot.slane %v5680_v39, 7  ;;  %v434_v52 = vrot.slane %v5684_v41, 7  ;;  %v5317_v35 = vld [vmem:[%s8110_s1 + $0x30] sm:$0xff]   ;;  %v5321_v46 = vld [vmem:[%s8110_s1 + $0x80] sm:$0xff]  }
  0x23   : > { %1216 = vrot.lane.b32.xlu1 %v5659_v32, %s5472_s23  ;;  %v481_v48 = vsel %vm456_vm0, %v430_v31, %v431_v37  ;;  %v480_v51 = vsel %vm456_vm0, %v431_v37, %v432_v40  ;;  %v5733_v58 = vpack.c.bf16 %v5630_v18, %v5625_v15  ;;  %v435_v61 = vrot.slane %v5691_v44, 7  ;;  %4700 = vmatpush3.bf16.msra.mxu0 %v5311_v54  ;;  %v5320_v37 = vld [vmem:[%s8110_s1 + $0xc0] sm:$0xff]  }
  0x24   : > { %v5721_v55 = vpack.c.bf16 %v481_v48, %v563_v49  ;;  %v479_v59 = vsel %vm456_vm0, %v432_v40, %v433_v50  ;;  %v565_v60 = vsel %vm521_vm1, %v480_v51, 0.0  ;;  %v478_v62 = vsel %vm456_vm0, %v433_v50, %v434_v52  ;;  %4701 = vmatprep.subr.bf16.mxu0 %v5312_v57  ;;  %v5824_v50 = vld [vmem:[%s5599_s17 + $0x88] sm:$0xff]  ;;  %4805 = vmatprep.subr.bf16.mxu1 %v5320_v37 }
  0x25   : > { %v436_v63 = vrot.slane %v5714_v53, 7  ;;  %v5754_v4 = vpack.c.bf16 %v479_v59, %v565_v60  ;;  %v5760_v6 = vadd.s32 8, %v5585_v2  ;;  %v5766_v10 = vpack.c.bf16 %v5656_v30, %v5634_v20  ;;  %4806 = vmatpush3.bf16.msra.mxu1 %v5321_v46  ;;  %v5843_v59 = vld [vmem:[%s8110_s1 + $0x100] sm:$0xff]   ;;  %v5323_v60 = vld [vmem:[%s8110_s1 + $0xc8] sm:$0xff]   ;;  %v5328_v46 = vld [vmem:[%s8110_s1 + $0x98] sm:$0xff]  }
  0x26   : > { %1166 = vrot.lane.b32.xlu0 %v8120_v42, %s5472_s23  ;;  %v477_v11 = vsel %vm456_vm0, %v434_v52, %v435_v61  ;;  %v567_v16 = vsel %vm521_vm1, %v478_v62, 0.0  ;;  %v437_v17 = vrot.slane %v5724_v56, 7  ;;  %v438_v21 = vrot.slane %v5747_v1, 7  ;;  %v5324_v62 = vld [vmem:[%s8110_s1 + $0x88] sm:$0xff]   ;;  %4807 = vmatprep.subr.bf16.mxu1 %v5323_v60 }
  0x27   : > { %1168 = vrot.lane.b32.xlu1 %v5670_v34, %s5472_s23  ;;  %v476_v19 = vsel %vm456_vm0, %v435_v61, %v436_v63  ;;  %4702 = vmatpush3.bf16.msra.mxu0 %v5313_v0  ;;  %v5785_v24 = vpack.c.bf16 %v477_v11, %v567_v16  ;;  %v439_v25 = vrot.slane %v5757_v5, 7  ;;  %v5795_v28 = vpack.c.bf16 %v5680_v39, %v5662_v33  ;;  %v5865_v11 = vld [vmem:[%s5599_s17 + $0x90] sm:$0xff] }
  0x28   : > { %4703 = vmatprep.subr.bf16.mxu0 %v5314_v3  ;;  %v475_v29 = vsel %vm456_vm0, %v436_v63, %v437_v17  ;;  %v569_v31 = vsel %vm521_vm1, %v476_v19, 0.0  ;;  %v474_v36 = vsel %vm456_vm0, %v437_v17, %v438_v21  ;;  %vm717_vm3 = vcmp.le.s32.totalorder %v5760_v6, 14  ;;  %v5325_v3 = vld [vmem:[%s8110_s1 + $0xd0] sm:$0xff]  }
  0x29   : > { %v652_v38 = vrot.slane %v5608_v8, 1  ;;  %v653_v40 = vrot.slane %v5619_v13, 1  ;;  %v5820_v48 = vpack.c.bf16 %v475_v29, %v569_v31  ;;  %v8122_v49 = vrot.slane %v5605_v7, 1  ;;  %v5319_v8 = vld [vmem:[%s8110_s1 + $0x38] sm:$0xff]   ;;  %4808 = vmatpush3.bf16.msra.mxu1 %v5324_v62  ;;  %v5326_v19 = vld [vmem:[%s8110_s1 + $0x90] sm:$0xff]  }
  0x2a   : > { %1218 = vrot.lane.b32.xlu0 %v5688_v43, %s5472_s23  ;;  %v5833_v51 = vpack.c.bf16 %v5691_v44, %v5684_v41  ;;  %v473_v52 = vsel %vm456_vm0, %v438_v21, %v439_v25  ;;  %v571_v54 = vsel %vm521_vm1, %v474_v36, 0.0  ;;  %v440_v57 = vrot.slane %v5789_v26, 7  ;;  %4809 = vmatprep.subr.bf16.mxu1 %v5325_v3  ;;  %v5327_v29 = vld [vmem:[%s8110_s1 + $0xd8] sm:$0xff]   ;;  %v5900_v36 = vld [vmem:[%s5599_s17 + $0xa0] sm:$0xff] }
  0x2b   : > { %1170 = vrot.lane.b32.xlu1 %v5703_v47, %s5472_s23  ;;  %4704 = vmatpush3.bf16.msra.mxu0 %v5315_v22  ;;  %8157 = vst [vmem:[#allocation5_spill] sm:$0xff] %v5820_v48  ;;  %v654_v61 = vrot.slane %v5622_v14, 1  ;;  %v713_v63 = vsel %vm683_vm2, %v652_v38, %v653_v40  ;;  %v655_v0 = vrot.slane %v5625_v15, 1  ;;  %v5862_v14 = vpack.c.bf16 %v473_v52, %v571_v54  ;;  %v5917_v54 = vld [vmem:[%s5599_s17 + $0xb0] sm:$0xff] }
  0x2c   : > { %4705 = vmatprep.subr.bf16.mxu0 %v5316_v23  ;;  %v5871_v16 = vpack.c.bf16 %v5724_v56, %v5714_v53  ;;  %v441_v17 = vrot.slane %v5824_v50, 7  ;;  %v714_v21 = vsel %vm683_vm2, %v8122_v49, %v652_v38  ;;  %v753_v22 = vsel %vm717_vm3, %v713_v63, 0.0  ;;  %v5925_v63 = vld [vmem:[%s5599_s17 + $0xa8] sm:$0xff] }
  0x2d   : > { %8158 = vst [vmem:[#allocation6_spill] sm:$0xff] %v5862_v14  ;;  %v472_v23 = vsel %vm456_vm0, %v439_v25, %v440_v57  ;;  %v711_v31 = vsel %vm683_vm2, %v654_v61, %v655_v0  ;;  %v442_v25 = vrot.slane %v5865_v11, 7  ;;  %v5904_v37 = vpack.c.bf16 %v753_v22, %v714_v21  ;;  %4810 = vmatpush3.bf16.msra.mxu1 %v5326_v19 }
  0x2e   : > { %1220 = vrot.lane.b32.xlu0 %v5721_v55, %s5472_s23  ;;  %v471_v38 = vsel %vm456_vm0, %v440_v57, %v441_v17  ;;  %4811 = vmatprep.subr.bf16.mxu1 %v5327_v29  ;;  %v5329_v57 = vld [vmem:[%s8110_s1 + $0xe0] sm:$0xff]   ;;  %v656_v60 = vrot.slane %v5630_v18, 1  ;;  %v8125_v62 = vrot.slane %v5634_v20, 1  ;;  %v444_v21 = vrot.slane %v5900_v36, 7 }
  0x2f   : > { %1172 = vrot.lane.b32.xlu1 %v5733_v58, %s5472_s23  ;;  %4706 = vmatpush3.bf16.msra.mxu0 %v5317_v35  ;;  %v5893_v35 = vld [vmem:[%s5599_s17 + $0x98] sm:$0xff]  ;;  %v470_v19 = vsel %vm456_vm0, %v441_v17, %v442_v25  ;;  %v8127_v22 = vrot.slane %v5656_v30, 1  ;;  %v5939_v18 = vpack.c.bf16 %v5757_v5, %v5747_v1  ;;  %v8124_v29 = vrot.slane %v5662_v33, 1  ;;  %v5330_v17 = vld [vmem:[%s8110_s1 + $0xa0] sm:$0xff]  }
  0x30   : > { %4707 = vmatprep.subr.bf16.mxu0 %v5318_v45  ;;  %v573_v45 = vsel %vm521_vm1, %v472_v23, 0.0  ;;  %v443_v52 = vrot.slane %v5893_v35, 7  ;;  %v712_v23 = vsel %vm683_vm2, %v653_v40, %v654_v61  ;;  %v575_v13 = vsel %vm521_vm1, %v470_v19, 0.0  ;;  %v5959_v40 = vld [vmem:[%s5599_s17 + $0xc0] sm:$0xff] }
  0x31   : > { %v5929_v3 = vpack.c.bf16 %v471_v38, %v573_v45  ;;  %4812 = vmatpush3.bf16.msra.mxu1 %v5328_v46  ;;  %v5331_v38 = vld [vmem:[%s8110_s1 + $0xe8] sm:$0xff]   ;;  %v5956_v45 = vld [vmem:[%s5599_s17 + $0xb8] sm:$0xff]  ;;  %v660_v42 = vrot.slane %v5680_v39, 1  ;;  %v709_v19 = vsel %vm683_vm2, %v656_v60, %v8125_v62  ;;  %v8132_v39 = vrot.slane %v5684_v41, 1 }
  0x32   : > { %1222 = vrot.lane.b32.xlu0 %v5754_v4, %s5472_s23  ;;  %4813 = vmatprep.subr.bf16.mxu1 %v5329_v57  ;;  %v469_v46 = vsel %vm456_vm0, %v442_v25, %v443_v52  ;;  %v445_v57 = vrot.slane %v5925_v63, 7  ;;  %v468_v49 = vsel %vm456_vm0, %v443_v52, %v444_v21  ;;  %v707_v25 = vsel %vm683_vm2, %v8127_v22, %v8124_v29  ;;  %v5997_v29 = vld [vmem:[%s5599_s17 + $0xc8] sm:$0xff] }
  0x33   : > { %1174 = vrot.lane.b32.xlu1 %v5766_v10, %s5472_s23  ;;  %4708 = vmatpush3.bf16.msra.mxu0 %v5319_v8  ;;  %v755_v8 = vsel %vm717_vm3, %v711_v31, 0.0  ;;  %8159 = vst [vmem:[#allocation7_spill] sm:$0xff] %v5929_v3  ;;  %v8126_v31 = vrot.slane %v5917_v54, 7  ;;  %v5994_v12 = vpack.c.bf16 %v469_v46, %v575_v13  ;;  %v757_v62 = vsel %vm717_vm3, %v709_v19, 0.0  ;;  %v6022_v19 = vld [vmem:[%s5599_s17 + $0xd0] sm:$0xff] }
  0x34   : > { %5181 = vmatprep.subr.bf16.mxu0 %v5843_v59  ;;  %v5963_v61 = vpack.c.bf16 %v755_v8, %v712_v23  ;;  %v5332_v8 = vld [vmem:[%s8110_s1 + $0xa8] sm:$0xff]   ;;  %v5333_v23 = vld [vmem:[%s8110_s1 + $0xf0] sm:$0xff]   ;;  %v447_v22 = vrot.slane %v5956_v45, 7  ;;  %v6013_v13 = vpack.c.bf16 %v5824_v50, %v5789_v26 }
  0x35   : > { %4814 = vmatpush3.bf16.msra.mxu1 %v5330_v17  ;;  %v466_v52 = vsel %vm456_vm0, %v445_v57, %v8126_v31  ;;  %v448_v17 = vrot.slane %v5959_v40, 7  ;;  %v577_v31 = vsel %vm521_vm1, %v468_v49, 0.0  ;;  %v705_v49 = vsel %vm683_vm2, %v660_v42, %v8132_v39 }
  0x36   : > { %1224 = vrot.lane.b32.xlu0 %v5785_v24, %s5472_s23  ;;  %4815 = vmatprep.subr.bf16.mxu1 %v5331_v38  ;;  %v759_v38 = vsel %vm717_vm3, %v707_v25, 0.0  ;;  %v579_v46 = vsel %vm521_vm1, %v466_v52, 0.0  ;;  %v5334_v25 = vld [vmem:[%s8110_s1 + $0xb0] sm:$0xff]   ;;  %v5335_v52 = vld [vmem:[%s8110_s1 + $0xf8] sm:$0xff]   ;;  %v761_v15 = vsel %vm717_vm3, %v705_v49, 0.0 }
  0x37   : > { %1176 = vrot.lane.b32.xlu1 %v5795_v28, %s5472_s23  ;;  %v464_v39 = vsel %vm456_vm0, %v447_v22, %v448_v17 }
  0x39   : > { %4816 = vmatpush3.bf16.msra.mxu1 %v5332_v8  ;;  %v662_v8 = vrot.slane %v5691_v44, 1  ;;  %v467_v44 = vsel %vm456_vm0, %v444_v21, %v445_v57  ;;  %v8161_v21 = vrot.slane %v5634_v20, 1 }
  0x3a   : > { %1226 = vrot.lane.b32.xlu0 %v5820_v48, %s5472_s23  ;;  %4817 = vmatprep.subr.bf16.mxu1 %v5333_v23  ;;  %v663_v48 = vrot.slane %v5714_v53, 1  ;;  %v581_v53 = vsel %vm521_vm1, %v464_v39, 0.0  ;;  %v450_v23 = vrot.slane %v6022_v19, 7  ;;  %v6057_v49 = vpack.c.bf16 %v467_v44, %v577_v31  ;;  %v6072_v39 = vld [vmem:[%s5599_s17 + $0xd8] sm:$0xff] }
  0x3b   : > { %1178 = vrot.lane.b32.xlu1 %v5833_v51, %s5472_s23 }
  0x3c   : > { %v703_v31 = vsel %vm683_vm2, %v662_v8, %v663_v48 }
  0x3d   : > { %4818 = vmatpush3.bf16.msra.mxu1 %v5334_v25 }
  0x3e   : > { %1228 = vrot.lane.b32.xlu0 %v5862_v14, %s5472_s23  ;;  %v449_v14 = vrot.slane %v5997_v29, 7  ;;  %4819 = vmatprep.subr.bf16.mxu1 %v5335_v52  ;;  %v763_v52 = vsel %vm717_vm3, %v703_v31, 0.0  ;;  %v664_v31 = vrot.slane %v5724_v56, 1  ;;  %v6143_v56 = vld [vmem:[%s5599_s17 + $0xe8] sm:$0xff] }
  0x3f   : > { %1180 = vrot.lane.b32.xlu1 %v5871_v16, %s5472_s23 }
  0x42   : > { %1310 = vrot.lane.b32.xlu0 %v5703_v47, %s5472_s23 }
  0x43   : > { %1262 = vrot.lane.b32.xlu1 %v5904_v37, %s5472_s23 }
  0x46   : > { %1230 = vrot.lane.b32.xlu0 %v5929_v3, %s5472_s23  ;;  %v710_v3 = vsel %vm683_vm2, %v655_v0, %v656_v60  ;;  %v5336_v0 = vld [vmem:[%s8110_s1 + $0xb8] sm:$0xff]  }
  0x47   : > { %1182 = vrot.lane.b32.xlu1 %v5939_v18, %s5472_s23  ;;  %v6048_v60 = vpack.c.bf16 %v757_v62, %v710_v3  ;;  %v6063_v62 = vpack.c.bf16 %v5893_v35, %v5865_v11  ;;  %4820 = vmatpush3.bf16.msra.mxu1 %v5336_v0  ;;  %v8160_v3 = vrot.slane %v5656_v30, 1  ;;  %v8162_v30 = vrot.slane %v5917_v54, 7 }
  0x48   : > { %v451_v0 = vrot.slane %v6072_v39, 7 }
  0x49   : > { %v708_v57 = vsel %vm683_vm2, %v8161_v21, %v8160_v3  ;;  %v465_v20 = vsel %vm456_vm0, %v8162_v30, %v447_v22  ;;  %v8163_v22 = vrot.slane %v5662_v33, 1  ;;  %v463_v21 = vsel %vm456_vm0, %v448_v17, %v449_v14  ;;  %v6130_v30 = vld [vmem:[%s5599_s17 + $0xe0] sm:$0xff] }
  0x4a   : > { %1312 = vrot.lane.b32.xlu0 %v5733_v58, %s5472_s23  ;;  %v6080_v25 = vpack.c.bf16 %v759_v38, %v708_v57  ;;  %v6091_v44 = vpack.c.bf16 %v465_v20, %v579_v46  ;;  %v6097_v38 = vpack.c.bf16 %v5925_v63, %v5900_v36  ;;  %v6113_v57 = vpack.c.bf16 %v463_v21, %v581_v53 }
  0x4b   : > { %1264 = vrot.lane.b32.xlu1 %v5963_v61, %s5472_s23  ;;  %v706_v3 = vsel %vm683_vm2, %v8163_v22, %v660_v42  ;;  %v6119_v33 = vpack.c.bf16 %v5956_v45, %v5917_v54  ;;  %v8164_v42 = vrot.slane %v5684_v41, 1  ;;  %v462_v17 = vsel %vm456_vm0, %v449_v14, %v450_v23 }
  0x4c   : > { %v6107_v46 = vpack.c.bf16 %v761_v15, %v706_v3  ;;  %v665_v53 = vrot.slane %v5747_v1, 1  ;;  %v461_v41 = vsel %vm456_vm0, %v450_v23, %v451_v0  ;;  %v583_v14 = vsel %vm521_vm1, %v462_v17, 0.0 }
  0x4d   : > { %v704_v15 = vsel %vm683_vm2, %v8164_v42, %v662_v8  ;;  %v452_v1 = vrot.slane %v6130_v30, 7  ;;  %v6150_v22 = vpack.c.bf16 %v461_v41, %v583_v14  ;;  %v6156_v23 = vpack.c.bf16 %v5997_v29, %v5959_v40  ;;  %v6168_v41 = vld [vmem:[%s5599_s17 + $0xf0] sm:$0xff] }
  0x4e   : > { %1232 = vrot.lane.b32.xlu0 %v5994_v12, %s5472_s23  ;;  %v6136_v20 = vpack.c.bf16 %v763_v52, %v704_v15  ;;  %v701_v8 = vsel %vm683_vm2, %v664_v31, %v665_v53  ;;  %v453_v52 = vrot.slane %v6143_v56, 7  ;;  %v702_v3 = vsel %vm683_vm2, %v663_v48, %v664_v31 }
  0x4f   : > { %1184 = vrot.lane.b32.xlu1 %v6013_v13, %s5472_s23  ;;  %v765_v21 = vsel %vm717_vm3, %v701_v8, 0.0  ;;  %v460_v42 = vsel %vm456_vm0, %v451_v0, %v452_v1  ;;  %v666_v15 = vrot.slane %v5757_v5, 1  ;;  %v667_v17 = vrot.slane %v5789_v26, 1 }
  0x50   : > { %v6174_v14 = vpack.c.bf16 %v765_v21, %v702_v3  ;;  %v459_v48 = vsel %vm456_vm0, %v452_v1, %v453_v52  ;;  %v585_v0 = vsel %vm521_vm1, %v460_v42, 0.0  ;;  %v454_v5 = vrot.slane %v6168_v41, 7 }
  0x51   : > { %v699_v26 = vsel %vm683_vm2, %v666_v15, %v667_v17  ;;  %v6185_v31 = vpack.c.bf16 %v459_v48, %v585_v0  ;;  %v6191_v8 = vpack.c.bf16 %v6072_v39, %v6022_v19  ;;  %v700_v1 = vsel %vm683_vm2, %v665_v53, %v666_v15 }
  0x52   : > { %1314 = vrot.lane.b32.xlu0 %v5766_v10, %s5472_s23  ;;  %v767_v3 = vsel %vm717_vm3, %v699_v26, 0.0  ;;  %v458_v21 = vsel %vm456_vm0, %v453_v52, %v454_v5  ;;  %v668_v42 = vrot.slane %v5824_v50, 1  ;;  %v669_v48 = vrot.slane %v5865_v11, 1 }
  0x53   : > { %1266 = vrot.lane.b32.xlu1 %v6048_v60, %s5472_s23  ;;  %v6205_v0 = vpack.c.bf16 %v767_v3, %v700_v1  ;;  %v8165_v53 = vrot.slane %v5611_v9, 7  ;;  %v828_v52 = vsel %vm521_vm1, %v458_v21, 0.0  ;;  %v670_v11 = vrot.slane %v5893_v35, 1 }
  0x54   : > { %v697_v50 = vsel %vm683_vm2, %v668_v42, %v669_v48  ;;  %v671_v26 = vrot.slane %v5900_v36, 1  ;;  %v698_v3 = vsel %vm683_vm2, %v667_v17, %v668_v42  ;;  %v672_v21 = vrot.slane %v5925_v63, 1 }
  0x55   : > { %v457_v15 = vsel %vm456_vm0, %v454_v5, %v8165_v53  ;;  %v6225_v5 = vpack.c.bf16 %v6143_v56, %v6130_v30  ;;  %v769_v35 = vsel %vm717_vm3, %v697_v50, 0.0  ;;  %v673_v53 = vrot.slane %v5917_v54, 1 }
  0x56   : > { %1234 = vrot.lane.b32.xlu0 %v6057_v49, %s5472_s23  ;;  %v6219_v1 = vpack.c.bf16 %v457_v15, %v828_v52  ;;  %v695_v36 = vsel %vm683_vm2, %v670_v11, %v671_v26  ;;  %v6239_v15 = vpack.c.bf16 %v769_v35, %v698_v3  ;;  %v696_v17 = vsel %vm683_vm2, %v669_v48, %v670_v11 }
  0x57   : > { %1186 = vrot.lane.b32.xlu1 %v6063_v62, %s5472_s23  ;;  %v771_v42 = vsel %vm717_vm3, %v695_v36, 0.0  ;;  %v693_v52 = vsel %vm683_vm2, %v672_v21, %v673_v53  ;;  %v674_v63 = vrot.slane %v5956_v45, 1  ;;  %v675_v54 = vrot.slane %v5959_v40, 1 }
  0x58   : > { %v6253_v50 = vpack.c.bf16 %v771_v42, %v696_v17  ;;  %v694_v48 = vsel %vm683_vm2, %v671_v26, %v672_v21  ;;  %v773_v11 = vsel %vm717_vm3, %v693_v52, 0.0  ;;  %v676_v45 = vrot.slane %v5997_v29, 1 }
  0x59   : > { %v691_v3 = vsel %vm683_vm2, %v674_v63, %v675_v54  ;;  %v677_v40 = vrot.slane %v6022_v19, 1  ;;  %v6267_v35 = vpack.c.bf16 %v773_v11, %v694_v48  ;;  %v692_v26 = vsel %vm683_vm2, %v673_v53, %v674_v63 }
  0x5a   : > { %1316 = vrot.lane.b32.xlu0 %v5795_v28, %s5472_s23  ;;  %v775_v36 = vsel %vm717_vm3, %v691_v3, 0.0  ;;  %v678_v29 = vrot.slane %v6072_v39, 1  ;;  %v679_v19 = vrot.slane %v6130_v30, 1  ;;  %v690_v53 = vsel %vm683_vm2, %v675_v54, %v676_v45 }
  0x5b   : > { %1268 = vrot.lane.b32.xlu1 %v6080_v25, %s5472_s23  ;;  %v689_v21 = vsel %vm683_vm2, %v676_v45, %v677_v40  ;;  %v6281_v17 = vpack.c.bf16 %v775_v36, %v692_v26  ;;  %v680_v39 = vrot.slane %v6143_v56, 1  ;;  %v681_v30 = vrot.slane %v6168_v41, 1 }
  0x5c   : > { %v777_v42 = vsel %vm717_vm3, %v689_v21, 0.0  ;;  %v687_v52 = vsel %vm683_vm2, %v678_v29, %v679_v19  ;;  %v688_v54 = vsel %vm683_vm2, %v677_v40, %v678_v29  ;;  %v682_v11 = vrot.slane %v5611_v9, 1 }
  0x5d   : > { %v6295_v63 = vpack.c.bf16 %v777_v42, %v690_v53  ;;  %v779_v48 = vsel %vm717_vm3, %v687_v52, 0.0  ;;  %v685_v56 = vsel %vm683_vm2, %v680_v39, %v681_v30  ;;  %v686_v36 = vsel %vm683_vm2, %v679_v19, %v680_v39 }
  0x5e   : > { %1236 = vrot.lane.b32.xlu0 %v6091_v44, %s5472_s23  ;;  %v6308_v3 = vpack.c.bf16 %v779_v48, %v688_v54  ;;  %v781_v21 = vsel %vm717_vm3, %v685_v56, 0.0  ;;  %v6319_v29 = vpack.c.bf16 %v5611_v9, %v6168_v41  ;;  %v8166_v53 = vrot.slane %v5605_v7, 1  ;;  %v5337_v54 = vld [vmem:[%s8110_s1 + $0x108] sm:$0xff]  }
  0x5f   : > { %1188 = vrot.lane.b32.xlu1 %v6097_v38, %s5472_s23  ;;  %v6329_v39 = vpack.c.bf16 %v781_v21, %v686_v36  ;;  %v684_v7 = vsel %vm683_vm2, %v681_v30, %v682_v11  ;;  %v5338_v30 = vld [vmem:[%s8110_s1 + $0x110] sm:$0xff]   ;;  %v5339_v36 = vld [vmem:[%s8110_s1 + $0x118] sm:$0xff]  }
  0x60   : > { %v715_v42 = vsel %vm683_vm2, %v682_v11, %v8166_v53 }
  0x61   : > { %v893_v48 = vsel %vm717_vm3, %v715_v42, 0.0 }
  0x62   : > { %1318 = vrot.lane.b32.xlu0 %v5833_v51, %s5472_s23  ;;  %v6344_v56 = vpack.c.bf16 %v893_v48, %v684_v7 }
  0x63   : > { %1270 = vrot.lane.b32.xlu1 %v6107_v46, %s5472_s23 }
  0x66   : > { %1238 = vrot.lane.b32.xlu0 %v6113_v57, %s5472_s23 }
  0x67   : > { %1190 = vrot.lane.b32.xlu1 %v6119_v33, %s5472_s23 }
  0x6a   : > { %1320 = vrot.lane.b32.xlu0 %v5871_v16, %s5472_s23 }
  0x6b   : > { %1272 = vrot.lane.b32.xlu1 %v6136_v20, %s5472_s23 }
  0x6e   : > { %1240 = vrot.lane.b32.xlu0 %v6150_v22, %s5472_s23 }
  0x6f   : > { %1192 = vrot.lane.b32.xlu1 %v6156_v23, %s5472_s23 }
  0x72   : > { %1322 = vrot.lane.b32.xlu0 %v5939_v18, %s5472_s23 }
  0x73   : > { %1274 = vrot.lane.b32.xlu1 %v6174_v14, %s5472_s23 }
  0x76   : > { %1242 = vrot.lane.b32.xlu0 %v6185_v31, %s5472_s23 }
  0x77   : > { %1194 = vrot.lane.b32.xlu1 %v6191_v8, %s5472_s23 }
  0x7a   : > { %1324 = vrot.lane.b32.xlu0 %v6013_v13, %s5472_s23 }
  0x7b   : > { %1276 = vrot.lane.b32.xlu1 %v6205_v0, %s5472_s23 }
  0x7e   : > { %1244 = vrot.lane.b32.xlu0 %v6219_v1, %s5472_s23 }
  0x7f   : > { %1196 = vrot.lane.b32.xlu1 %v6225_v5, %s5472_s23 }
  0x82   : > { %1326 = vrot.lane.b32.xlu0 %v6063_v62, %s5472_s23 }
  0x83   : > { %1278 = vrot.lane.b32.xlu1 %v6239_v15, %s5472_s23 }
  0x86   : > { %1328 = vrot.lane.b32.xlu0 %v6097_v38, %s5472_s23 }
  0x87   : > { %1280 = vrot.lane.b32.xlu1 %v6253_v50, %s5472_s23 }
  0x8a   : > { %1330 = vrot.lane.b32.xlu0 %v6119_v33, %s5472_s23 }
  0x8b   : > { %1282 = vrot.lane.b32.xlu1 %v6267_v35, %s5472_s23 }
  0x8e   : > { %1332 = vrot.lane.b32.xlu0 %v6156_v23, %s5472_s23 }
  0x8f   : > { %1284 = vrot.lane.b32.xlu1 %v6281_v17, %s5472_s23 }
  0x92   : > { %1334 = vrot.lane.b32.xlu0 %v6191_v8, %s5472_s23 }
  0x93   : > { %1286 = vrot.lane.b32.xlu1 %v6295_v63, %s5472_s23 }
  0x94   : > { %v1215_v45 = vpop.permute.xlu0 %1214 }
  0x95   : > { %v1217_v26 = vpop.permute.xlu1 %1216  ;;  %v1409_v40 = vsel %vm1342_vm4, 0.0|0.0, %v1215_v45  ;;  %v8167_v45 = vmov 0.0|0.0  }
  0x96   : > { %1967 = vmatprep.mubr.bf16.mxu0 %v1409_v40  ;;  %1336 = vrot.lane.b32.xlu0 %v6225_v5, %s5472_s23  ;;  %v1413_v52 = vsel %vm1342_vm4, %v5904_v37, %v1217_v26 }
  0x97   : > { %1288 = vrot.lane.b32.xlu1 %v6308_v3, %s5472_s23 }
  0x98   : > { %v1167_v19 = vpop.permute.xlu0 %1166 }
  0x99   : > { %v1169_v9 = vpop.permute.xlu1 %1168  ;;  %v1345_v41 = vsel %vm1342_vm4, 0.0|0.0, %v1167_v19 }
  0x9a   : > { %1968 = vmatmul.mubr.bf16.vlgmr.msra.gmra.mrb[0].mxu0 %v1345_v41  ;;  %1338 = vrot.lane.b32.xlu0 %v6319_v29, %s5472_s23  ;;  %v1349_v26 = vsel %vm1342_vm4, %v5649_v27, %v1169_v9 }
  0x9b   : > { %5182 = vmatpush3.bf16.msra.mxu0 %v5843_v59  ;;  %1975 = vmatprep.mubr.bf16.mxu0 %v1413_v52 }
  0x9c   : > { %v1219_v37 = vpop.permute.xlu0 %1218  ;;  %1290 = vrot.lane.b32.xlu1 %v6329_v39, %s5472_s23  ;;  %5183 = vmatprep.subr.bf16.mxu0 %v5337_v54 }
  0x9d   : > { %v1171_v11 = vpop.permute.xlu1 %1170  ;;  %v1417_v40 = vsel %vm1342_vm4, %v5963_v61, %v1219_v37 }
  0x9e   : > { %1340 = vrot.lane.b32.xlu0 %v8167_v45, %s5472_s23  ;;  %v1353_v42 = vsel %vm1342_vm4, %v5659_v32, %v1171_v11 }
  0x9f   : > { %5184 = vmatpush3.bf16.msra.mxu0 %v5337_v54 }
  0xa0   : > { %v1221_v59 = vpop.permute.xlu0 %1220  ;;  %1292 = vrot.lane.b32.xlu1 %v6344_v56, %s5472_s23  ;;  %5185 = vmatprep.subr.bf16.mxu0 %v5338_v30 }
  0xa1   : > { %v1173_v21 = vpop.permute.xlu1 %1172  ;;  %v1421_v52 = vsel %vm1342_vm4, %v6048_v60, %v1221_v59 }
  0xa2   : > { %1976 = vmatmul.mubr.bf16.gmra.mrb[4].mxu0 %v1349_v26  ;;  %v1357_v7 = vsel %vm1342_vm4, %v5688_v43, %v1173_v21 }
  0xa3   : > { %1983 = vmatprep.mubr.bf16.mxu0 %v1417_v40  ;;  %5186 = vmatpush3.bf16.msra.mxu0 %v5338_v30 }
  0xa4   : > { %v1223_v53 = vpop.permute.xlu0 %1222  ;;  %5187 = vmatprep.subr.bf16.mxu0 %v5339_v36  ;;  %3072 = vrot.lane.b32.xlu1 %v8167_v45, %s5472_s23 }
  0xa5   : > { %v1175_v27 = vpop.permute.xlu1 %1174  ;;  %v1425_v37 = vsel %vm1342_vm4, %v6080_v25, %v1223_v53 }
  0xa7   : > { %5188 = vmatpush3.bf16.msra.mxu0 %v5339_v36  ;;  %v1361_v36 = vsel %vm1342_vm4, %v5721_v55, %v1175_v27 }
  0xa8   : > { %v1225_v19 = vpop.permute.xlu0 %1224 }
  0xa9   : > { %v1177_v54 = vpop.permute.xlu1 %1176  ;;  %v1429_v53 = vsel %vm1342_vm4, %v6107_v46, %v1225_v19 }
  0xaa   : > { %1984 = vmatmul.mubr.bf16.gmra.mrb[8].mxu0 %v1353_v42  ;;  %v1365_v27 = vsel %vm1342_vm4, %v5754_v4, %v1177_v54 }
  0xab   : > { %1991 = vmatprep.mubr.bf16.mxu0 %v1421_v52 }
  0xac   : > { %v1227_v9 = vpop.permute.xlu0 %1226 }
  0xad   : > { %v1179_v41 = vpop.permute.xlu1 %1178  ;;  %v1433_v19 = vsel %vm1342_vm4, %v6136_v20, %v1227_v9 }
  0xae   : > { %v1369_v54 = vsel %vm1342_vm4, %v5785_v24, %v1179_v41 }
  0xb0   : > { %v1229_v48 = vpop.permute.xlu0 %1228 }
  0xb1   : > { %v1181_v30 = vpop.permute.xlu1 %1180  ;;  %v1437_v9 = vsel %vm1342_vm4, %v6174_v14, %v1229_v48 }
  0xb2   : > { %1992 = vmatmul.mubr.bf16.gmra.mrb[12].mxu0 %v1357_v7 }
  0xb3   : > { %1999 = vmatprep.mubr.bf16.mxu0 %v1425_v37 }
  0xb4   : > { %v1311_v11 = vpop.permute.xlu0 %1310 }
  0xb5   : > { %v1263_v26 = vpop.permute.xlu1 %1262  ;;  %v1537_v59 = vsel %vm1342_vm4, %v5659_v32, %v1311_v11 }
  0xb6   : > { %2128 = vmatprep.mubr.bf16.mxu1 %v1537_v59  ;;  %v1473_v40 = vsel %vm1342_vm4, %v5670_v34, %v1263_v26 }
  0xb7   : > { %2129 = vmatmul.mubr.bf16.vlgmr.msra.gmra.mrb[0].mxu1 %v1473_v40 }
  0xb8   : > { %v1231_v21 = vpop.permute.xlu0 %1230 }
  0xb9   : > { %v1183_v42 = vpop.permute.xlu1 %1182  ;;  %v1441_v48 = vsel %vm1342_vm4, %v6205_v0, %v1231_v21 }
  0xba   : > { %2000 = vmatmul.mubr.bf16.gmra.mrb[16].mxu0 %v1361_v36 }
  0xbb   : > { %2007 = vmatprep.mubr.bf16.mxu0 %v1429_v53 }
  0xbc   : > { %v1313_v52 = vpop.permute.xlu0 %1312 }
  0xbd   : > { %v1265_v7 = vpop.permute.xlu1 %1264  ;;  %v1541_v32 = vsel %vm1342_vm4, %v5688_v43, %v1313_v52 }
  0xbe   : > { %2136 = vmatprep.mubr.bf16.mxu1 %v1541_v32  ;;  %v1477_v34 = vsel %vm1342_vm4, %v5703_v47, %v1265_v7  ;;  %v8168_v7 = vld [vmem:[#allocation5_spill] sm:$0xff] }
  0xbf   : > { %2137 = vmatmul.mubr.bf16.gmra.mrb[4].mxu1 %v1477_v34  ;;  %v1373_v41 = vsel %vm1342_vm4, %v8168_v7, %v1181_v30 }
  0xc0   : > { %v1233_v37 = vpop.permute.xlu0 %1232 }
  0xc1   : > { %v1185_v11 = vpop.permute.xlu1 %1184  ;;  %v1445_v21 = vsel %vm1342_vm4, %v6239_v15, %v1233_v37 }
  0xc2   : > { %2008 = vmatmul.mubr.bf16.gmra.mrb[20].mxu0 %v1365_v27 }
  0xc3   : > { %2015 = vmatprep.mubr.bf16.mxu0 %v1433_v19 }
  0xc4   : > { %v1315_v26 = vpop.permute.xlu0 %1314 }
  0xc5   : > { %v1267_v59 = vpop.permute.xlu1 %1266  ;;  %v1545_v43 = vsel %vm1342_vm4, %v5721_v55, %v1315_v26  ;;  %v8169_v26 = vld [vmem:[#allocation6_spill] sm:$0xff] }
  0xc6   : > { %2144 = vmatprep.mubr.bf16.mxu1 %v1545_v43  ;;  %v1481_v47 = vsel %vm1342_vm4, %v5733_v58, %v1267_v59  ;;  %v1377_v30 = vsel %vm1342_vm4, %v8169_v26, %v1183_v42 }
  0xc7   : > { %2145 = vmatmul.mubr.bf16.gmra.mrb[8].mxu1 %v1481_v47 }
  0xc8   : > { %v1235_v40 = vpop.permute.xlu0 %1234 }
  0xc9   : > { %v1187_v36 = vpop.permute.xlu1 %1186  ;;  %v1449_v37 = vsel %vm1342_vm4, %v6253_v50, %v1235_v40 }
  0xca   : > { %2016 = vmatmul.mubr.bf16.gmra.mrb[24].mxu0 %v1369_v54 }
  0xcb   : > { %2023 = vmatprep.mubr.bf16.mxu0 %v1437_v9  ;;  %v8170_v9 = vld [vmem:[#allocation7_spill] sm:$0xff] }
  0xcc   : > { %v1317_v53 = vpop.permute.xlu0 %1316  ;;  %v1381_v42 = vsel %vm1342_vm4, %v8170_v9, %v1185_v11  ;;  %v1385_v11 = vsel %vm1342_vm4, %v5994_v12, %v1187_v36 }
  0xcd   : > { %v1269_v52 = vpop.permute.xlu1 %1268  ;;  %v1549_v55 = vsel %vm1342_vm4, %v5754_v4, %v1317_v53 }
  0xce   : > { %2152 = vmatprep.mubr.bf16.mxu1 %v1549_v55  ;;  %v1485_v58 = vsel %vm1342_vm4, %v5766_v10, %v1269_v52 }
  0xcf   : > { %2153 = vmatmul.mubr.bf16.gmra.mrb[12].mxu1 %v1485_v58 }
  0xd0   : > { %v1237_v32 = vpop.permute.xlu0 %1236 }
  0xd1   : > { %v1189_v34 = vpop.permute.xlu1 %1188  ;;  %v1453_v40 = vsel %vm1342_vm4, %v6267_v35, %v1237_v32 }
  0xd2   : > { %2024 = vmatmul.mubr.bf16.gmra.mrb[28].mxu0 %v1373_v41  ;;  %v1389_v36 = vsel %vm1342_vm4, %v6057_v49, %v1189_v34 }
  0xd3   : > { %2031 = vmatprep.mubr.bf16.mxu0 %v1441_v48 }
  0xd4   : > { %v1319_v27 = vpop.permute.xlu0 %1318 }
  0xd5   : > { %v1271_v19 = vpop.permute.xlu1 %1270  ;;  %v1553_v4 = vsel %vm1342_vm4, %v5785_v24, %v1319_v27 }
  0xd6   : > { %2160 = vmatprep.mubr.bf16.mxu1 %v1553_v4  ;;  %v1489_v10 = vsel %vm1342_vm4, %v5795_v28, %v1271_v19 }
  0xd7   : > { %2161 = vmatmul.mubr.bf16.gmra.mrb[16].mxu1 %v1489_v10 }
  0xd8   : > { %v1239_v59 = vpop.permute.xlu0 %1238 }
  0xd9   : > { %v1191_v43 = vpop.permute.xlu1 %1190  ;;  %v1457_v32 = vsel %vm1342_vm4, %v6281_v17, %v1239_v59 }
  0xda   : > { %2032 = vmatmul.mubr.bf16.gmra.mrb[32].mxu0 %v1377_v30  ;;  %v1393_v34 = vsel %vm1342_vm4, %v6091_v44, %v1191_v43 }
  0xdb   : > { %2039 = vmatprep.mubr.bf16.mxu0 %v1445_v21 }
  0xdc   : > { %v1321_v47 = vpop.permute.xlu0 %1320 }
  0xdd   : > { %v1273_v54 = vpop.permute.xlu1 %1272  ;;  %v1557_v24 = vsel %vm1342_vm4, %v8168_v7, %v1321_v47 }
  0xde   : > { %2168 = vmatprep.mubr.bf16.mxu1 %v1557_v24  ;;  %v1493_v28 = vsel %vm1342_vm4, %v5833_v51, %v1273_v54 }
  0xdf   : > { %2169 = vmatmul.mubr.bf16.gmra.mrb[20].mxu1 %v1493_v28 }
  0xe0   : > { %v1241_v53 = vpop.permute.xlu0 %1240 }
  0xe1   : > { %v1193_v52 = vpop.permute.xlu1 %1192  ;;  %v1461_v59 = vsel %vm1342_vm4, %v6295_v63, %v1241_v53 }
  0xe2   : > { %2040 = vmatmul.mubr.bf16.gmra.mrb[36].mxu0 %v1381_v42  ;;  %v1397_v43 = vsel %vm1342_vm4, %v6113_v57, %v1193_v52 }
  0xe3   : > { %2047 = vmatprep.mubr.bf16.mxu0 %v1449_v37 }
  0xe4   : > { %v1323_v55 = vpop.permute.xlu0 %1322 }
  0xe5   : > { %v1275_v58 = vpop.permute.xlu1 %1274  ;;  %v1561_v7 = vsel %vm1342_vm4, %v8169_v26, %v1323_v55 }
  0xe6   : > { %2176 = vmatprep.mubr.bf16.mxu1 %v1561_v7  ;;  %v1497_v51 = vsel %vm1342_vm4, %v5871_v16, %v1275_v58 }
  0xe7   : > { %2177 = vmatmul.mubr.bf16.gmra.mrb[24].mxu1 %v1497_v51 }
  0xe8   : > { %v1243_v41 = vpop.permute.xlu0 %1242 }
  0xe9   : > { %v1195_v48 = vpop.permute.xlu1 %1194  ;;  %v1465_v42 = vsel %vm1342_vm4, %v6308_v3, %v1243_v41 }
  0xea   : > { %2048 = vmatmul.mubr.bf16.gmra.mrb[40].mxu0 %v1385_v11 }
  0xeb   : > { %2055 = vmatprep.mubr.bf16.mxu0 %v1453_v40 }
  0xec   : > { %v1325_v27 = vpop.permute.xlu0 %1324 }
  0xed   : > { %v1277_v19 = vpop.permute.xlu1 %1276  ;;  %v1565_v4 = vsel %vm1342_vm4, %v8170_v9, %v1325_v27 }
  0xee   : > { %2184 = vmatprep.mubr.bf16.mxu1 %v1565_v4  ;;  %v1501_v16 = vsel %vm1342_vm4, %v5939_v18, %v1277_v19 }
  0xef   : > { %2185 = vmatmul.mubr.bf16.gmra.mrb[28].mxu1 %v1501_v16 }
  0xf0   : > { %v1245_v10 = vpop.permute.xlu0 %1244 }
  0xf1   : > { %v1197_v26 = vpop.permute.xlu1 %1196  ;;  %v1469_v52 = vsel %vm1342_vm4, %v6329_v39, %v1245_v10 }
  0xf2   : > { %2056 = vmatmul.mubr.bf16.gmra.mrb[44].mxu0 %v1389_v36 }
  0xf3   : > { %2063 = vmatprep.mubr.bf16.mxu0 %v1457_v32 }
  0xf4   : > { %v1327_v30 = vpop.permute.xlu0 %1326 }
  0xf5   : > { %v1279_v21 = vpop.permute.xlu1 %1278  ;;  %v1569_v47 = vsel %vm1342_vm4, %v5994_v12, %v1327_v30 }
  0xf6   : > { %2192 = vmatprep.mubr.bf16.mxu1 %v1569_v47  ;;  %v1505_v18 = vsel %vm1342_vm4, %v6013_v13, %v1279_v21 }
  0xf7   : > { %2193 = vmatmul.mubr.bf16.gmra.mrb[32].mxu1 %v1505_v18 }
  0xf8   : > { %v1329_v54 = vpop.permute.xlu0 %1328 }
  0xf9   : > { %v1281_v24 = vpop.permute.xlu1 %1280  ;;  %v1573_v28 = vsel %vm1342_vm4, %v6057_v49, %v1329_v54 }
  0xfa   : > { %2064 = vmatmul.mubr.bf16.gmra.mrb[48].mxu0 %v1393_v34  ;;  %2200 = vmatprep.mubr.bf16.mxu1 %v1573_v28  ;;  %v1509_v12 = vsel %vm1342_vm4, %v6063_v62, %v1281_v24 }
  0xfb   : > { %2071 = vmatprep.mubr.bf16.mxu0 %v1461_v59 }
  0xfc   : > { %v1331_v9 = vpop.permute.xlu0 %1330 }
  0xfd   : > { %v1577_v13 = vsel %vm1342_vm4, %v6091_v44, %v1331_v9  ;;  %v1283_v53 = vpop.permute.xlu1 %1282  ;;  %v1401_v44 = vsel %vm1342_vm4, %v6150_v22, %v1195_v48 }
  0xfe   : > { %v1513_v37 = vsel %vm1342_vm4, %v6097_v38, %v1283_v53 }
  0xff   : > { %2201 = vmatmul.mubr.bf16.gmra.mrb[36].mxu1 %v1509_v12 }
 0x100   : > { %2208 = vmatprep.mubr.bf16.mxu1 %v1577_v13  ;;  %v1333_v49 = vpop.permute.xlu0 %1332 }
 0x101   : > { %v1581_v62 = vsel %vm1342_vm4, %v6113_v57, %v1333_v49  ;;  %v1285_v55 = vpop.permute.xlu1 %1284  ;;  %v1405_v57 = vsel %vm1342_vm4, %v6185_v31, %v1197_v26 }
 0x102   : > { %2072 = vmatmul.mubr.bf16.gmra.mrb[52].mxu0 %v1397_v43  ;;  %v1517_v7 = vsel %vm1342_vm4, %v6119_v33, %v1285_v55 }
 0x103   : > { %2079 = vmatprep.mubr.bf16.mxu0 %v1465_v42 }
 0x104   : > { %v1335_v58 = vpop.permute.xlu0 %1334 }
 0x105   : > { %v1585_v38 = vsel %vm1342_vm4, %v6150_v22, %v1335_v58  ;;  %v1287_v51 = vpop.permute.xlu1 %1286 }
 0x106   : > { %v1521_v41 = vsel %vm1342_vm4, %v6156_v23, %v1287_v51 }
 0x107   : > { %2209 = vmatmul.mubr.bf16.gmra.mrb[40].mxu1 %v1513_v37 }
 0x108   : > { %2216 = vmatprep.mubr.bf16.mxu1 %v1581_v62  ;;  %v1337_v11 = vpop.permute.xlu0 %1336 }
 0x109   : > { %v1589_v33 = vsel %vm1342_vm4, %v6185_v31, %v1337_v11  ;;  %v1289_v22 = vpop.permute.xlu1 %1288 }
 0x10a   : > { %2080 = vmatmul.mubr.bf16.gmra.mrb[56].mxu0 %v1401_v44  ;;  %v1525_v48 = vsel %vm1342_vm4, %v6191_v8, %v1289_v22 }
 0x10b   : > { %2087 = vmatprep.mubr.bf16.mxu0 %v1469_v52 }
 0x10c   : > { %v1339_v40 = vpop.permute.xlu0 %1338 }
 0x10e   : > { %v1291_v23 = vpop.permute.xlu1 %1290 }
 0x10f   : > { %2217 = vmatmul.mubr.bf16.gmra.mrb[44].mxu1 %v1517_v7 }
 0x110   : > { %2224 = vmatprep.mubr.bf16.mxu1 %v1585_v38  ;;  %v1341_v31 = vpop.permute.xlu0 %1340 }
 0x112   : > { %2088 = vmatmul.mubr.bf16.gmra.mrb[60].mxu0 %v1405_v57  ;;  %v1293_v8 = vpop.permute.xlu1 %1292 }
 0x113   : > { %5189 = vmatprep.mubr.msk.bf16.mxu0 %vm1342_vm4, %v5963_v61  ;;  %v1593_v61 = vsel %vm1342_vm4, %v6219_v1, %v1339_v40 }
 0x116   : > { %v3073_v2 = vpop.permute.xlu1 %3072 }
 0x117   : > { %2225 = vmatmul.mubr.bf16.gmra.mrb[48].mxu1 %v1521_v41 }
 0x118   : > { %2232 = vmatprep.mubr.bf16.mxu1 %v1589_v33 }
 0x11a   : > { %5190 = vmatmul.mubr.msk.bf16.vlgmr.msra.gmra.mrb[64].mxu0 %vm1342_vm4, %v6048_v60  ;;  %v1529_v60 = vsel %vm1342_vm4, %v6225_v5, %v1291_v23 }
 0x11b   : > { %5193 = vmatprep.mubr.msk.bf16.mxu0 %vm1342_vm4, %v6080_v25  ;;  %v1597_v25 = vsel %vm1342_vm4, 0.0|0.0, %v1341_v31 }
 0x11f   : > { %2233 = vmatmul.mubr.bf16.gmra.mrb[52].mxu1 %v1525_v48 }
 0x120   : > { %2240 = vmatprep.mubr.bf16.mxu1 %v1593_v61 }
 0x122   : > { %5194 = vmatmul.mubr.msk.bf16.gmra.mrb[68].mxu0 %vm1342_vm4, %v6107_v46  ;;  %v1533_v46 = vsel %vm1342_vm4, %v6319_v29, %v1293_v8 }
 0x123   : > { %5197 = vmatprep.mubr.msk.bf16.mxu0 %vm1342_vm4, %v6136_v20 }
 0x127   : > { %2241 = vmatmul.mubr.bf16.gmra.mrb[56].mxu1 %v1529_v60 }
 0x128   : > { %2248 = vmatprep.mubr.bf16.mxu1 %v1597_v25 }
 0x12a   : > { %5198 = vmatmul.mubr.msk.bf16.gmra.mrb[72].mxu0 %vm1342_vm4, %v6174_v14 }
 0x12b   : > { %5201 = vmatprep.mubr.msk.bf16.mxu0 %vm1342_vm4, %v6205_v0 }
 0x12f   : > { %2249 = vmatmul.mubr.bf16.gmra.mrb[60].mxu1 %v1533_v46 }
 0x132   : > { %5202 = vmatmul.mubr.msk.bf16.gmra.mrb[76].mxu0 %vm1342_vm4, %v6239_v15 }
 0x133   : > { %5205 = vmatprep.mubr.msk.bf16.mxu0 %vm1342_vm4, %v6253_v50 }
 0x13a   : > { %5206 = vmatmul.mubr.msk.bf16.gmra.mrb[80].mxu0 %vm1342_vm4, %v6267_v35 }
 0x13b   : > { %5209 = vmatprep.mubr.msk.bf16.mxu0 %vm1342_vm4, %v6281_v17 }
 0x142   : > { %5210 = vmatmul.mubr.msk.bf16.gmra.mrb[84].mxu0 %vm1342_vm4, %v6295_v63 }
 0x143   : > { %5213 = vmatprep.mubr.msk.bf16.mxu0 %vm1342_vm4, %v6308_v3 }
 0x14a   : > { %5214 = vmatmul.mubr.msk.bf16.gmra.mrb[88].mxu0 %vm1342_vm4, %v6329_v39 }
 0x14b   : > { %5217 = vmatprep.mubr.msk.bf16.mxu0 %vm1342_vm4, %v6344_v56 }
 0x152   : > { %5218 = vmatmul.mubr.bf16.gmra.mrb[92].mxu0 %v8167_v45 }
 0x16d   : > { %v4709_v20 = vpop.f32.mrb[0].mxu0 }
 0x16e   : > { %v4710_v14 = vpop.f32.mrb[1].mxu0 }
 0x16f   : > { %v4711_v0 = vadd.f32 %v4710_v14, %v4709_v20  ;;  %v4712_v1 = vpop.f32.mrb[2].mxu0 }
 0x170   : > { %v4713_v5 = vpop.f32.mrb[3].mxu0 }
 0x171   : > { %v4714_v15 = vadd.f32 %v4713_v5, %v4712_v1 }
 0x175   : > { %v4715_v50 = vpop.f32.mrb[4].mxu0 }
 0x176   : > { %v4716_v35 = vpop.f32.mrb[5].mxu0 }
 0x177   : > { %v4717_v17 = vadd.f32 %v4716_v35, %v4715_v50  ;;  %v4718_v63 = vpop.f32.mrb[6].mxu0 }
 0x178   : > { %v4719_v29 = vpop.f32.mrb[7].mxu0 }
 0x179   : > { %v4720_v3 = vadd.f32 %v4719_v29, %v4718_v63 }
 0x17d   : > { %v4721_v27 = vpop.f32.mrb[8].mxu0 }
 0x17e   : > { %v4722_v19 = vpop.f32.mrb[9].mxu0 }
 0x17f   : > { %v4723_v39 = vadd.f32 %v4722_v19, %v4721_v27  ;;  %v4724_v4 = vpop.f32.mrb[10].mxu0 }
 0x180   : > { %v4725_v16 = vpop.f32.mrb[11].mxu0 }
 0x181   : > { %v4726_v56 = vadd.f32 %v4725_v16, %v4724_v4 }
 0x185   : > { %v4727_v36 = vpop.f32.mrb[12].mxu0 }
 0x186   : > { %v4728_v10 = vpop.f32.mrb[13].mxu0 }
 0x187   : > { %v4729_v32 = vadd.f32 %v4728_v10, %v4727_v36  ;;  %v4730_v26 = vpop.f32.mrb[14].mxu0 }
 0x188   : > { %v4731_v30 = vpop.f32.mrb[15].mxu0 }
 0x189   : > { %v4732_v21 = vadd.f32 %v4731_v30, %v4730_v26 }
 0x18a   : > { %v4821_v47 = vpop.f32.mrb[0].mxu1 }
 0x18b   : > { %v4822_v18 = vpop.f32.mrb[1].mxu1 }
 0x18c   : > { %v4823_v34 = vadd.f32 %v4822_v18, %v4821_v47  ;;  %v4824_v54 = vpop.f32.mrb[2].mxu1 }
 0x18d   : > { %v4733_v59 = vpop.f32.mrb[16].mxu0  ;;  %v4825_v24 = vpop.f32.mrb[3].mxu1 }
 0x18e   : > { %v4826_v28 = vadd.f32 %v4825_v24, %v4824_v54  ;;  %v4734_v12 = vpop.f32.mrb[17].mxu0  ;;  %v6510_v9 = vadd.f32 %v4823_v34, %v4711_v0 }
 0x18f   : > { %v4735_v13 = vadd.f32 %v4734_v12, %v4733_v59  ;;  %v4736_v43 = vpop.f32.mrb[18].mxu0 }
 0x190   : > { %v4737_v42 = vpop.f32.mrb[19].mxu0  ;;  %v6512_v53 = vadd.f32 %v4826_v28, %v4714_v15 }
 0x191   : > { %v4738_v49 = vadd.f32 %v4737_v42, %v4736_v43  ;;  %v5340_v42 = vld [vmem:[%s8111_s2 + $0x40] sm:$0xff]  }
 0x192   : > { %v4827_v37 = vpop.f32.mrb[4].mxu1  ;;  %4937 = vmatprep.subr.bf16.mxu1 %v5340_v42 }
 0x193   : > { %v4828_v62 = vpop.f32.mrb[5].mxu1 }
 0x194   : > { %v4829_v44 = vadd.f32 %v4828_v62, %v4827_v37  ;;  %v4830_v52 = vpop.f32.mrb[6].mxu1  ;;  %v5341_v37 = vld [vmem:[%s8111_s2] sm:$0xff]  }
 0x195   : > { %v4739_v55 = vpop.f32.mrb[20].mxu0  ;;  %v4831_v58 = vpop.f32.mrb[7].mxu1  ;;  %4938 = vmatpush3.bf16.msra.mxu1 %v5341_v37 }
 0x196   : > { %v4832_v7 = vadd.f32 %v4831_v58, %v4830_v52  ;;  %v4740_v38 = vpop.f32.mrb[21].mxu0  ;;  %v6514_v57 = vadd.f32 %v4829_v44, %v4717_v17 }
 0x197   : > { %v4741_v51 = vadd.f32 %v4740_v38, %v4739_v55  ;;  %v4742_v11 = vpop.f32.mrb[22].mxu0 }
 0x198   : > { %v4743_v41 = vpop.f32.mrb[23].mxu0  ;;  %v6516_v33 = vadd.f32 %v4832_v7, %v4720_v3 }
 0x199   : > { %v4744_v22 = vadd.f32 %v4743_v41, %v4742_v11 }
 0x19a   : > { %v4833_v40 = vpop.f32.mrb[8].mxu1 }
 0x19b   : > { %v4834_v48 = vpop.f32.mrb[9].mxu1 }
 0x19c   : > { %v4835_v61 = vadd.f32 %v4834_v48, %v4833_v40  ;;  %v4836_v23 = vpop.f32.mrb[10].mxu1  ;;  %v5342_v40 = vld [vmem:[%s8111_s2 + $0x48] sm:$0xff]  }
 0x19d   : > { %v4745_v31 = vpop.f32.mrb[24].mxu0  ;;  %v4837_v60 = vpop.f32.mrb[11].mxu1  ;;  %4939 = vmatprep.subr.bf16.mxu1 %v5342_v40 }
 0x19e   : > { %v4838_v25 = vadd.f32 %v4837_v60, %v4836_v23  ;;  %v4746_v8 = vpop.f32.mrb[25].mxu0  ;;  %v6518_v46 = vadd.f32 %v4835_v61, %v4723_v39  ;;  %v5343_v60 = vld [vmem:[%s8111_s2 + $0x8] sm:$0xff]  }
 0x19f   : > { %v6520_v20 = vadd.f32 %v4746_v8, %v4745_v31  ;;  %v4748_v14 = vpop.f32.mrb[26].mxu0  ;;  %4940 = vmatpush3.bf16.msra.mxu1 %v5343_v60 }
 0x1a0   : > { %v4749_v0 = vpop.f32.mrb[27].mxu0  ;;  %v6522_v1 = vadd.f32 %v4838_v25, %v4726_v56 }
 0x1a1   : > { %v6524_v5 = vadd.f32 %v4749_v0, %v4748_v14 }
 0x1a2   : > { %v4839_v15 = vpop.f32.mrb[12].mxu1 }
 0x1a3   : > { %v4840_v50 = vpop.f32.mrb[13].mxu1 }
 0x1a4   : > { %v4841_v35 = vadd.f32 %v4840_v50, %v4839_v15  ;;  %v4842_v17 = vpop.f32.mrb[14].mxu1 }
 0x1a5   : > { %v4751_v63 = vpop.f32.mrb[28].mxu0  ;;  %v4843_v29 = vpop.f32.mrb[15].mxu1 }
 0x1a6   : > { %v4844_v3 = vadd.f32 %v4843_v29, %v4842_v17  ;;  %v4752_v27 = vpop.f32.mrb[29].mxu0  ;;  %v6526_v19 = vadd.f32 %v4841_v35, %v4729_v32 }
 0x1a7   : > { %v6528_v39 = vadd.f32 %v4752_v27, %v4751_v63  ;;  %v4754_v4 = vpop.f32.mrb[30].mxu0 }
 0x1a8   : > { %v4755_v16 = vpop.f32.mrb[31].mxu0  ;;  %v6530_v36 = vadd.f32 %v4844_v3, %v4732_v21 }
 0x1a9   : > { %v6532_v56 = vadd.f32 %v4755_v16, %v4754_v4 }
 0x1aa   : > { %v4845_v10 = vpop.f32.mrb[16].mxu1 }
 0x1ab   : > { %v4846_v26 = vpop.f32.mrb[17].mxu1 }
 0x1ac   : > { %v4847_v30 = vadd.f32 %v4846_v26, %v4845_v10  ;;  %v4848_v47 = vpop.f32.mrb[18].mxu1 }
 0x1ad   : > { %v4757_v18 = vpop.f32.mrb[32].mxu0  ;;  %v4849_v34 = vpop.f32.mrb[19].mxu1 }
 0x1ae   : > { %v4850_v54 = vadd.f32 %v4849_v34, %v4848_v47  ;;  %v4758_v59 = vpop.f32.mrb[33].mxu0  ;;  %v6534_v24 = vadd.f32 %v4847_v30, %v4735_v13 }
 0x1af   : > { %v6536_v32 = vadd.f32 %v4758_v59, %v4757_v18  ;;  %v4760_v28 = vpop.f32.mrb[34].mxu0 }
 0x1b0   : > { %v4761_v12 = vpop.f32.mrb[35].mxu0  ;;  %v6538_v43 = vadd.f32 %v4850_v54, %v4738_v49 }
 0x1b1   : > { %v6540_v21 = vadd.f32 %v4761_v12, %v4760_v28 }
 0x1b2   : > { %v4851_v62 = vpop.f32.mrb[20].mxu1 }
 0x1b3   : > { %v4852_v44 = vpop.f32.mrb[21].mxu1 }
 0x1b4   : > { %v4853_v13 = vadd.f32 %v4852_v44, %v4851_v62  ;;  %v4854_v52 = vpop.f32.mrb[22].mxu1 }
 0x1b5   : > { %v4763_v55 = vpop.f32.mrb[36].mxu0  ;;  %v4855_v58 = vpop.f32.mrb[23].mxu1 }
 0x1b6   : > { %v4856_v49 = vadd.f32 %v4855_v58, %v4854_v52  ;;  %v4764_v7 = vpop.f32.mrb[37].mxu0  ;;  %v6548_v38 = vadd.f32 %v4853_v13, %v4741_v51 }
 0x1b7   : > { %v6550_v11 = vadd.f32 %v4764_v7, %v4763_v55  ;;  %v4766_v41 = vpop.f32.mrb[38].mxu0 }
 0x1b8   : > { %v4767_v48 = vpop.f32.mrb[39].mxu0  ;;  %v6555_v61 = vadd.f32 %v4856_v49, %v4744_v22 }
 0x1b9   : > { %v6557_v23 = vadd.f32 %v4767_v48, %v4766_v41 }
 0x1ba   : > { %v4857_v31 = vpop.f32.mrb[24].mxu1 }
 0x1bb   : > { %v4858_v51 = vpop.f32.mrb[25].mxu1 }
 0x1bc   : > { %v4859_v25 = vadd.f32 %v4858_v51, %v4857_v31  ;;  %v4860_v8 = vpop.f32.mrb[26].mxu1 }
 0x1bd   : > { %v4769_v14 = vpop.f32.mrb[40].mxu0  ;;  %v4861_v0 = vpop.f32.mrb[27].mxu1 }
 0x1be   : > { %v4862_v15 = vadd.f32 %v4861_v0, %v4860_v8  ;;  %v4770_v50 = vpop.f32.mrb[41].mxu0  ;;  %v6563_v35 = vadd.f32 %v4859_v25, %v6520_v20 }
 0x1bf   : > { %v6565_v22 = vadd.f32 %v4770_v50, %v4769_v14  ;;  %v4772_v17 = vpop.f32.mrb[42].mxu0 }
 0x1c0   : > { %v4773_v63 = vpop.f32.mrb[43].mxu0  ;;  %v6568_v29 = vadd.f32 %v4862_v15, %v6524_v5  ;;  %v5344_v5 = vld [vmem:[%s8111_s2 + $0x50] sm:$0xff]  }
 0x1c1   : > { %v6570_v3 = vadd.f32 %v4773_v63, %v4772_v17  ;;  %4941 = vmatprep.subr.bf16.mxu1 %v5344_v5 }
 0x1c2   : > { %v4863_v27 = vpop.f32.mrb[28].mxu1 }
 0x1c3   : > { %v4864_v4 = vpop.f32.mrb[29].mxu1 }
 0x1c4   : > { %v4865_v16 = vadd.f32 %v4864_v4, %v4863_v27  ;;  %v4866_v10 = vpop.f32.mrb[30].mxu1 }
 0x1c5   : > { %v4775_v26 = vpop.f32.mrb[44].mxu0  ;;  %v4867_v30 = vpop.f32.mrb[31].mxu1 }
 0x1c6   : > { %v4868_v47 = vadd.f32 %v4867_v30, %v4866_v10  ;;  %v4776_v18 = vpop.f32.mrb[45].mxu0  ;;  %v6573_v20 = vadd.f32 %v4865_v16, %v6528_v39  ;;  %v5345_v39 = vld [vmem:[%s8111_s2 + $0x10] sm:$0xff]  }
 0x1c7   : > { %v6575_v34 = vadd.f32 %v4776_v18, %v4775_v26  ;;  %v4778_v54 = vpop.f32.mrb[46].mxu0  ;;  %4942 = vmatpush3.bf16.msra.mxu1 %v5345_v39 }
 0x1c8   : > { %v4779_v59 = vpop.f32.mrb[47].mxu0  ;;  %v6581_v28 = vadd.f32 %v4868_v47, %v6532_v56 }
 0x1c9   : > { %v6583_v12 = vadd.f32 %v4779_v59, %v4778_v54 }
 0x1ca   : > { %v4869_v42 = vpop.f32.mrb[32].mxu1 }
 0x1cb   : > { %v4870_v37 = vpop.f32.mrb[33].mxu1 }
 0x1cc   : > { %v4871_v62 = vadd.f32 %v4870_v37, %v4869_v42  ;;  %v4872_v44 = vpop.f32.mrb[34].mxu1 }
 0x1cd   : > { %v4781_v13 = vpop.f32.mrb[48].mxu0  ;;  %v4873_v52 = vpop.f32.mrb[35].mxu1 }
 0x1ce   : > { %v4874_v55 = vadd.f32 %v4873_v52, %v4872_v44  ;;  %v4782_v58 = vpop.f32.mrb[49].mxu0  ;;  %v6589_v49 = vadd.f32 %v4871_v62, %v6536_v32 }
 0x1cf   : > { %v6591_v56 = vadd.f32 %v4782_v58, %v4781_v13  ;;  %v4784_v7 = vpop.f32.mrb[50].mxu0 }
 0x1d0   : > { %v4785_v41 = vpop.f32.mrb[51].mxu0  ;;  %v6594_v40 = vadd.f32 %v4874_v55, %v6540_v21  ;;  %v5346_v21 = vld [vmem:[%s8111_s2 + $0x58] sm:$0xff]  }
 0x1d1   : > { %v6596_v48 = vadd.f32 %v4785_v41, %v4784_v7  ;;  %4943 = vmatprep.subr.bf16.mxu1 %v5346_v21 }
 0x1d2   : > { %v4875_v31 = vpop.f32.mrb[36].mxu1 }
 0x1d3   : > { %v4876_v60 = vpop.f32.mrb[37].mxu1 }
 0x1d4   : > { %v4877_v51 = vadd.f32 %v4876_v60, %v4875_v31  ;;  %v4878_v25 = vpop.f32.mrb[38].mxu1 }
 0x1d5   : > { %v4787_v8 = vpop.f32.mrb[52].mxu0  ;;  %v4879_v14 = vpop.f32.mrb[39].mxu1 }
 0x1d6   : > { %v4880_v0 = vadd.f32 %v4879_v14, %v4878_v25  ;;  %v4788_v15 = vpop.f32.mrb[53].mxu0  ;;  %v6599_v32 = vadd.f32 %v4877_v51, %v6550_v11  ;;  %v5347_v11 = vld [vmem:[%s8111_s2 + $0x18] sm:$0xff]  }
 0x1d7   : > { %v6601_v50 = vadd.f32 %v4788_v15, %v4787_v8  ;;  %v4790_v17 = vpop.f32.mrb[54].mxu0  ;;  %4944 = vmatpush3.bf16.msra.mxu1 %v5347_v11  ;;  %v6643_v11 = vld [vmem:[%s8113_s4] ss:$0 sm:$0xff] }
 0x1d8   : > { %v4791_v63 = vpop.f32.mrb[55].mxu0  ;;  %v6607_v27 = vadd.f32 %v4880_v0, %v6557_v23 }
 0x1d9   : > { %v6609_v4 = vadd.f32 %v4791_v63, %v4790_v17 }
 0x1da   : > { %v4881_v16 = vpop.f32.mrb[40].mxu1 }
 0x1db   : > { %v4882_v10 = vpop.f32.mrb[41].mxu1 }
 0x1dc   : > { %v4883_v26 = vadd.f32 %v4882_v10, %v4881_v16  ;;  %v4884_v30 = vpop.f32.mrb[42].mxu1 }
 0x1dd   : > { %v4793_v47 = vpop.f32.mrb[56].mxu0  ;;  %v4885_v18 = vpop.f32.mrb[43].mxu1 }
 0x1de   : > { %v4886_v54 = vadd.f32 %v4885_v18, %v4884_v30  ;;  %v4794_v5 = vpop.f32.mrb[57].mxu0  ;;  %v6615_v59 = vadd.f32 %v4883_v26, %v6565_v22 }
 0x1df   : > { %v6617_v23 = vadd.f32 %v4794_v5, %v4793_v47  ;;  %v4796_v42 = vpop.f32.mrb[58].mxu0  ;;  %v6652_v47 = vld [vmem:[%s8114_s5] ss:$0 sm:$0xff] }
 0x1e0   : > { %v4797_v39 = vpop.f32.mrb[59].mxu0  ;;  %v6620_v37 = vadd.f32 %v4886_v54, %v6570_v3  ;;  %v5348_v3 = vld [vmem:[%s8111_s2 + $0x60] sm:$0xff]  }
 0x1e1   : > { %v6622_v62 = vadd.f32 %v4797_v39, %v4796_v42  ;;  %4945 = vmatprep.subr.bf16.mxu1 %v5348_v3 }
 0x1e2   : > { %v4887_v44 = vpop.f32.mrb[44].mxu1 }
 0x1e3   : > { %v4888_v13 = vpop.f32.mrb[45].mxu1 }
 0x1e4   : > { %v4889_v52 = vadd.f32 %v4888_v13, %v4887_v44  ;;  %v4890_v55 = vpop.f32.mrb[46].mxu1 }
 0x1e5   : > { %v4799_v58 = vpop.f32.mrb[60].mxu0  ;;  %v4891_v7 = vpop.f32.mrb[47].mxu1 }
 0x1e6   : > { %v4892_v41 = vadd.f32 %v4891_v7, %v4890_v55  ;;  %v4800_v31 = vpop.f32.mrb[61].mxu0  ;;  %v6625_v22 = vadd.f32 %v4889_v52, %v6575_v34  ;;  %v5349_v34 = vld [vmem:[%s8111_s2 + $0x20] sm:$0xff]  }
 0x1e7   : > { %v6627_v60 = vadd.f32 %v4800_v31, %v4799_v58  ;;  %v4802_v51 = vpop.f32.mrb[62].mxu0  ;;  %4946 = vmatpush3.bf16.msra.mxu1 %v5349_v34 }
 0x1e8   : > { %v4803_v25 = vpop.f32.mrb[63].mxu0  ;;  %v6633_v8 = vadd.f32 %v4892_v41, %v6583_v12 }
 0x1e9   : > { %v6635_v14 = vadd.f32 %v4803_v25, %v4802_v51 }
 0x1ea   : > { %v4893_v0 = vpop.f32.mrb[48].mxu1 }
 0x1eb   : > { %v4894_v15 = vpop.f32.mrb[49].mxu1 }
 0x1ec   : > { %v4895_v17 = vadd.f32 %v4894_v15, %v4893_v0  ;;  %v4896_v21 = vpop.f32.mrb[50].mxu1 }
 0x1ed   : > { %v4897_v63 = vpop.f32.mrb[51].mxu1  ;;  %v5191_v16 = vpop.f32.mrb[64].mxu0 }
 0x1ee   : > { %v4898_v12 = vadd.f32 %v4897_v63, %v4896_v21  ;;  %v2300_v10 = vadd.f32 %v5191_v16, %v6514_v57  ;;  %v2291_v26 = vpop.f32.mrb[65].mxu0  ;;  %v6647_v30 = vadd.f32 %v4895_v17, %v6591_v56 }
 0x1ef   : > { %v2292_v18 = vadd.f32 %v2291_v26, %v6510_v9  ;;  %v5192_v54 = vpop.f32.mrb[66].mxu0 }
 0x1f0   : > { %v2427_v5 = vmul.f32 %v6643_v11, %v2300_v10  ;;  %v2303_v42 = vadd.f32 %v5192_v54, %v6516_v33  ;;  %v2294_v39 = vpop.f32.mrb[67].mxu0  ;;  %v6658_v44 = vadd.f32 %v4898_v12, %v6596_v48 }
 0x1f1   : > { %v2425_v57 = vmul.f32 %v6643_v11, %v2292_v18  ;;  %v2295_v56 = vadd.f32 %v2294_v39, %v6512_v53 }
 0x1f2   : > { %v2466_v13 = vadd.f32 %v6652_v47, %v2427_v5  ;;  %v2428_v52 = vmul.f32 %v6643_v11, %v2303_v42  ;;  %v4899_v55 = vpop.f32.mrb[52].mxu1 }
 0x1f3   : > { %v2464_v9 = vadd.f32 %v6652_v47, %v2425_v57  ;;  %v2426_v58 = vmul.f32 %v6643_v11, %v2295_v56  ;;  %v4900_v7 = vpop.f32.mrb[53].mxu1 }
 0x1f4   : > { %v6666_v41 = vmax.f32 %v2466_v13, 0.0  ;;  %v2467_v33 = vadd.f32 %v6652_v47, %v2428_v52  ;;  %v4901_v48 = vadd.f32 %v4900_v7, %v4899_v55  ;;  %v4902_v31 = vpop.f32.mrb[54].mxu1 }
 0x1f5   : > { %v6669_v51 = vmax.f32 %v2464_v9, 0.0  ;;  %v2465_v53 = vadd.f32 %v6652_v47, %v2426_v58  ;;  %v4903_v3 = vpop.f32.mrb[55].mxu1  ;;  %v5195_v25 = vpop.f32.mrb[68].mxu0 }
 0x1f6   : > { %v2690_v0 = vrot.slane %v6666_v41, 1  ;;  %v6673_v34 = vmax.f32 %v2467_v33, 0.0  ;;  %v4904_v15 = vadd.f32 %v4903_v3, %v4902_v31  ;;  %v2316_v17 = vadd.f32 %v5195_v25, %v6526_v19  ;;  %v2307_v21 = vpop.f32.mrb[69].mxu0 }
 0x1f7   : > { %v6676_v63 = vmax.f32 %v2465_v53, 0.0  ;;  %v2308_v16 = vadd.f32 %v2307_v21, %v6518_v46  ;;  %v5196_v12 = vpop.f32.mrb[70].mxu0  ;;  %v8135_v10 = vrot.slane %v6669_v51, 1  ;;  %v6681_v26 = vadd.f32 %v4901_v48, %v6601_v50 }
 0x1f8   : > { %v2431_v18 = vmul.f32 %v6643_v11, %v2316_v17  ;;  %v2319_v54 = vadd.f32 %v5196_v12, %v6530_v36  ;;  %v2310_v5 = vpop.f32.mrb[71].mxu0  ;;  %v6687_v42 = vpack.c.bf16 %v6673_v34, %v6666_v41  ;;  %v6690_v19 = vadd.f32 %v4904_v15, %v6609_v4  ;;  %v5350_v36 = vld [vmem:[%s8111_s2 + $0x68] sm:$0xff]  }
 0x1f9   : > { %v2429_v46 = vmul.f32 %v6643_v11, %v2308_v16  ;;  %v2311_v39 = vadd.f32 %v2310_v5, %v6522_v1  ;;  %v6696_v50 = vpack.c.bf16 %v6676_v63, %v6669_v51  ;;  %v2689_v57 = vrot.slane %v6676_v63, 1  ;;  %v5351_v1 = vld [vmem:[%s8111_s2 + $0x28] sm:$0xff]   ;;  %4947 = vmatprep.subr.bf16.mxu1 %v5350_v36 }
 0x1fa   : > { %v2470_v56 = vadd.f32 %v6652_v47, %v2431_v18  ;;  %v2432_v13 = vmul.f32 %v6643_v11, %v2319_v54  ;;  %v4905_v4 = vpop.f32.mrb[56].mxu1  ;;  %v2691_v52 = vrot.slane %v6673_v34, 1  ;;  %v8136_v55 = vrot.slane %v6669_v51, 7  ;;  %4948 = vmatpush3.bf16.msra.mxu1 %v5351_v1 }
 0x1fb   : > { %8171 = vst [vmem:[#allocation5_spill] sm:$0xff] %v6696_v50  ;;  %v2468_v9 = vadd.f32 %v6652_v47, %v2429_v46  ;;  %v2430_v58 = vmul.f32 %v6643_v11, %v2311_v39  ;;  %v4906_v7 = vpop.f32.mrb[57].mxu1  ;;  %3074 = vrot.lane.b32.xlu1 %v6696_v50, %s5472_s23  ;;  %v2749_v33 = vsel %vm683_vm2, %v2689_v57, %v2690_v0 }
 0x1fc   : > { %v2750_v48 = vsel %vm683_vm2, %v8135_v10, %v2689_v57  ;;  %v6719_v31 = vmax.f32 %v2470_v56, 0.0  ;;  %v2471_v53 = vadd.f32 %v6652_v47, %v2432_v13  ;;  %v4907_v3 = vadd.f32 %v4906_v7, %v4905_v4  ;;  %v4908_v25 = vpop.f32.mrb[58].mxu1 }
 0x1fd   : > { %v2755_v15 = vsel %vm717_vm3, %v2749_v33, 0.0  ;;  %v6724_v17 = vmax.f32 %v2468_v9, 0.0  ;;  %v2469_v21 = vadd.f32 %v6652_v47, %v2430_v58  ;;  %v4909_v16 = vpop.f32.mrb[59].mxu1  ;;  %v5199_v12 = vpop.f32.mrb[72].mxu0  ;;  %v2748_v54 = vsel %vm683_vm2, %v2690_v0, %v2691_v52 }
 0x1fe   : > { %v6727_v18 = vpack.c.bf16 %v2755_v15, %v2750_v48  ;;  %v2694_v5 = vrot.slane %v6719_v31, 1  ;;  %v6732_v46 = vmax.f32 %v2471_v53, 0.0  ;;  %v4910_v39 = vadd.f32 %v4909_v16, %v4908_v25  ;;  %v2323_v36 = vpop.f32.mrb[73].mxu0 }
 0x1ff   : > { %v2332_v57 = vadd.f32 %v5199_v12, %v6548_v38  ;;  %v2692_v56 = vrot.slane %v6724_v17, 1  ;;  %v6736_v13 = vmax.f32 %v2469_v21, 0.0  ;;  %v2324_v4 = vadd.f32 %v2323_v36, %v6534_v24  ;;  %v5200_v9 = vpop.f32.mrb[74].mxu0  ;;  %3076 = vrot.lane.b32.xlu1 %v6687_v42, %s5472_s23 }
 0x200   : > { %v6742_v0 = vadd.f32 %v4907_v3, %v6617_v23  ;;  %v2335_v58 = vadd.f32 %v5200_v9, %v6555_v61  ;;  %v2326_v7 = vpop.f32.mrb[75].mxu0  ;;  %v6748_v38 = vpack.c.bf16 %v6732_v46, %v6719_v31  ;;  %v6751_v33 = vadd.f32 %v4910_v39, %v6622_v62 }
 0x201   : > { %v2435_v1 = vmul.f32 %v6643_v11, %v2332_v57  ;;  %v2433_v24 = vmul.f32 %v6643_v11, %v2324_v4  ;;  %v2327_v48 = vadd.f32 %v2326_v7, %v6538_v43  ;;  %v6757_v23 = vpack.c.bf16 %v6736_v13, %v6724_v17 }
 0x202   : > { %v2747_v53 = vsel %vm683_vm2, %v2691_v52, %v2692_v56  ;;  %v2436_v3 = vmul.f32 %v6643_v11, %v2335_v58  ;;  %v4911_v25 = vpop.f32.mrb[60].mxu1  ;;  %v2693_v15 = vrot.slane %v6736_v13, 1  ;;  %v2695_v52 = vrot.slane %v6732_v46, 1 }
 0x203   : > { %v2474_v61 = vadd.f32 %v6652_v47, %v2435_v1  ;;  %v2757_v62 = vsel %vm717_vm3, %v2747_v53, 0.0  ;;  %v2472_v21 = vadd.f32 %v6652_v47, %v2433_v24  ;;  %v2434_v43 = vmul.f32 %v6643_v11, %v2327_v48  ;;  %v4912_v16 = vpop.f32.mrb[61].mxu1  ;;  %3078 = vrot.lane.b32.xlu1 %v6757_v23, %s5472_s23 }
 0x204   : > { %v6770_v12 = vpack.c.bf16 %v2757_v62, %v2748_v54  ;;  %v2475_v57 = vadd.f32 %v6652_v47, %v2436_v3  ;;  %v4913_v36 = vadd.f32 %v4912_v16, %v4911_v25  ;;  %v4914_v4 = vpop.f32.mrb[62].mxu1  ;;  %v2745_v9 = vsel %vm683_vm2, %v2693_v15, %v2694_v5 }
 0x205   : > { %v6773_v39 = vmax.f32 %v2474_v61, 0.0  ;;  %v6780_v1 = vmax.f32 %v2472_v21, 0.0  ;;  %v2473_v58 = vadd.f32 %v6652_v47, %v2434_v43  ;;  %v4915_v7 = vpop.f32.mrb[63].mxu1  ;;  %v5203_v54 = vpop.f32.mrb[76].mxu0  ;;  %v2746_v24 = vsel %vm683_vm2, %v2692_v56, %v2693_v15 }
 0x206   : > { %v2759_v48 = vsel %vm717_vm3, %v2745_v9, 0.0  ;;  %v6788_v61 = vmax.f32 %v2475_v57, 0.0  ;;  %v4916_v3 = vadd.f32 %v4915_v7, %v4914_v4  ;;  %v2348_v25 = vadd.f32 %v5203_v54, %v6573_v20  ;;  %v2339_v62 = vpop.f32.mrb[77].mxu0 }
 0x207   : > { %v8137_v53 = vrot.slane %v6773_v39, 1  ;;  %v2696_v21 = vrot.slane %v6780_v1, 1  ;;  %v6792_v16 = vmax.f32 %v2473_v58, 0.0  ;;  %v2340_v43 = vadd.f32 %v2339_v62, %v6563_v35  ;;  %v5204_v10 = vpop.f32.mrb[78].mxu0  ;;  %3080 = vrot.lane.b32.xlu1 %v6748_v38, %s5472_s23 }
 0x208   : > { %v6798_v56 = vadd.f32 %v4913_v36, %v6627_v60  ;;  %v2439_v57 = vmul.f32 %v6643_v11, %v2348_v25  ;;  %v2351_v20 = vadd.f32 %v5204_v10, %v6581_v28  ;;  %v2342_v4 = vpop.f32.mrb[79].mxu0  ;;  %v6805_v9 = vpack.c.bf16 %v6788_v61, %v6773_v39  ;;  %v5353_v25 = vld [vmem:[%s8111_s2 + $0x30] sm:$0xff]  }
 0x209   : > { %v2437_v35 = vmul.f32 %v6643_v11, %v2340_v43  ;;  %v2343_v58 = vadd.f32 %v2342_v4, %v6568_v29  ;;  %v6811_v7 = vpack.c.bf16 %v6792_v16, %v6780_v1  ;;  %v6814_v60 = vadd.f32 %v4916_v3, %v6635_v14  ;;  %v5352_v29 = vld [vmem:[%s8111_s2 + $0x70] sm:$0xff]  }
 0x20a   : > { %v2478_v36 = vadd.f32 %v6652_v47, %v2439_v57  ;;  %v2440_v28 = vmul.f32 %v6643_v11, %v2351_v20  ;;  %v6818_v10 = vpack.c.bf16 %v2759_v48, %v2746_v24  ;;  %v2743_v54 = vsel %vm683_vm2, %v2695_v52, %v2696_v21  ;;  %4949 = vmatprep.subr.bf16.mxu1 %v5352_v29 }
 0x20b   : > { %v2476_v14 = vadd.f32 %v6652_v47, %v2437_v35  ;;  %v2438_v3 = vmul.f32 %v6643_v11, %v2343_v58  ;;  %3082 = vrot.lane.b32.xlu1 %v6811_v7, %s5472_s23  ;;  %v2744_v24 = vsel %vm683_vm2, %v2694_v5, %v2695_v52  ;;  %v2761_v48 = vsel %vm717_vm3, %v2743_v54, 0.0  ;;  %4950 = vmatpush3.bf16.msra.mxu1 %v5353_v25 }
 0x20c   : > { %8172 = vst [vmem:[#allocation6_spill] sm:$0xff] %v6818_v10  ;;  %v6838_v62 = vmax.f32 %v2478_v36, 0.0  ;;  %v2479_v43 = vadd.f32 %v6652_v47, %v2440_v28  ;;  %v6841_v57 = vpack.c.bf16 %v2761_v48, %v2744_v24  ;;  %v2529_v20 = vrot.slane %v6676_v63, 7 }
 0x20d   : > { %v6844_v4 = vmax.f32 %v2476_v14, 0.0  ;;  %v2477_v35 = vadd.f32 %v6652_v47, %v2438_v3  ;;  %v5207_v58 = vpop.f32.mrb[80].mxu0  ;;  %v2697_v15 = vrot.slane %v6792_v16, 1  ;;  %v2530_v5 = vrot.slane %v6666_v41, 7 }
 0x20e   : > { %8173 = vst [vmem:[#allocation7_spill] sm:$0xff] %v6841_v57  ;;  %v6850_v36 = vmax.f32 %v2479_v43, 0.0  ;;  %v2364_v28 = vadd.f32 %v5207_v58, %v6599_v32  ;;  %v2355_v54 = vpop.f32.mrb[81].mxu0  ;;  %v6857_v63 = vsel %vm456_vm0, %v8136_v55, %v2529_v20 }
 0x20f   : > { %v8139_v29 = vrot.slane %v6844_v4, 1  ;;  %v6860_v14 = vmax.f32 %v2477_v35, 0.0  ;;  %v2356_v41 = vadd.f32 %v2355_v54, %v6589_v49  ;;  %v5208_v25 = vpop.f32.mrb[82].mxu0  ;;  %3084 = vrot.lane.b32.xlu1 %v6805_v9, %s5472_s23  ;;  %v2741_v32 = vsel %vm683_vm2, %v2697_v15, %v8137_v53 }
 0x210   : > { %v2443_v24 = vmul.f32 %v6643_v11, %v2364_v28  ;;  %v2367_v48 = vadd.f32 %v5208_v25, %v6607_v27  ;;  %v2358_v43 = vpop.f32.mrb[83].mxu0  ;;  %v6874_v35 = vpack.c.bf16 %v6850_v36, %v6838_v62  ;;  %v2742_v27 = vsel %vm683_vm2, %v2696_v21, %v2697_v15 }
 0x211   : > { %v2441_v58 = vmul.f32 %v6643_v11, %v2356_v41  ;;  %v2359_v54 = vadd.f32 %v2358_v43, %v6594_v40  ;;  %v6881_v55 = vpack.c.bf16 %v6860_v14, %v6844_v4  ;;  %v2763_v25 = vsel %vm717_vm3, %v2741_v32, 0.0 }
 0x212   : > { %v2482_v3 = vadd.f32 %v6652_v47, %v2443_v24  ;;  %v2444_v28 = vmul.f32 %v6643_v11, %v2367_v48  ;;  %v6893_v40 = vpack.c.bf16 %v2763_v25, %v2742_v27  ;;  %v2531_v43 = vrot.slane %v6673_v34, 7 }
 0x213   : > { %v2480_v49 = vadd.f32 %v6652_v47, %v2441_v58  ;;  %v2442_v41 = vmul.f32 %v6643_v11, %v2359_v54  ;;  %3086 = vrot.lane.b32.xlu1 %v6881_v55, %s5472_s23  ;;  %v2589_v21 = vsel %vm456_vm0, %v2529_v20, %v2530_v5  ;;  %v2532_v15 = vrot.slane %v6724_v17, 7 }
 0x214   : > { %8174 = vst [vmem:[#allocation8_spill] sm:$0xff] %v6893_v40  ;;  %v6896_v24 = vmax.f32 %v2482_v3, 0.0  ;;  %v2483_v48 = vadd.f32 %v6652_v47, %v2444_v28  ;;  %v2588_v27 = vsel %vm456_vm0, %v2530_v5, %v2531_v43  ;;  %v2596_v34 = vsel %vm521_vm1, %v2589_v21, 0.0 }
 0x215   : > { %v6902_v32 = vmax.f32 %v2480_v49, 0.0  ;;  %v2481_v58 = vadd.f32 %v6652_v47, %v2442_v41  ;;  %v5211_v54 = vpop.f32.mrb[84].mxu0  ;;  %v6913_v52 = vpack.c.bf16 %v2588_v27, %v2596_v34  ;;  %v2533_v5 = vrot.slane %v6736_v13, 7 }
 0x216   : > { %v6910_v25 = vmax.f32 %v2483_v48, 0.0  ;;  %v2380_v28 = vadd.f32 %v5211_v54, %v6625_v22  ;;  %v2371_v20 = vpop.f32.mrb[85].mxu0  ;;  %v8177_v3 = vrot.slane %v6773_v39, 1 }
 0x217   : > { %v6916_v49 = vmax.f32 %v2481_v58, 0.0  ;;  %v2372_v41 = vadd.f32 %v2371_v20, %v6615_v59  ;;  %v5212_v53 = vpop.f32.mrb[86].mxu0  ;;  %3168 = vrot.lane.b32.xlu1 %v6727_v18, %s5472_s23  ;;  %v2586_v20 = vsel %vm456_vm0, %v2532_v15, %v2533_v5 }
 0x218   : > { %v2447_v21 = vmul.f32 %v6643_v11, %v2380_v28  ;;  %v2383_v22 = vadd.f32 %v5212_v53, %v6633_v8  ;;  %v2374_v54 = vpop.f32.mrb[87].mxu0  ;;  %v6927_v27 = vpack.c.bf16 %v6910_v25, %v6896_v24  ;;  %v5354_v28 = vld [vmem:[%s8111_s2 + $0x78] sm:$0xff]  }
 0x219   : > { %v2445_v59 = vmul.f32 %v6643_v11, %v2372_v41  ;;  %v2375_v34 = vadd.f32 %v2374_v54, %v6620_v37  ;;  %v6934_v13 = vpack.c.bf16 %v6916_v49, %v6902_v32  ;;  %v2587_v41 = vsel %vm456_vm0, %v2531_v43, %v2532_v15  ;;  %v5355_v37 = vld [vmem:[%s8111_s2 + $0x38] sm:$0xff]   ;;  %4951 = vmatprep.subr.bf16.mxu1 %v5354_v28 }
 0x21a   : > { %v2486_v8 = vadd.f32 %v6652_v47, %v2447_v21  ;;  %v2448_v53 = vmul.f32 %v6643_v11, %v2383_v22  ;;  %v2598_v21 = vsel %vm521_vm1, %v2587_v41, 0.0  ;;  %v8175_v22 = vrot.slane %v6788_v61, 1  ;;  %4952 = vmatpush3.bf16.msra.mxu1 %v5355_v37 }
 0x21b   : > { %v2484_v54 = vadd.f32 %v6652_v47, %v2445_v59  ;;  %v2446_v48 = vmul.f32 %v6643_v11, %v2375_v34  ;;  %3088 = vrot.lane.b32.xlu1 %v6874_v35, %s5472_s23  ;;  %v6963_v58 = vpack.c.bf16 %v2586_v20, %v2598_v21 }
 0x21c   : > { %v2739_v43 = vsel %vm683_vm2, %v8175_v22, %v8139_v29  ;;  %v6960_v15 = vmax.f32 %v2486_v8, 0.0  ;;  %v2487_v59 = vadd.f32 %v6652_v47, %v2448_v53  ;;  %v8176_v34 = vmov %v8175_v22 }
 0x21d   : > { %v2740_v41 = vsel %vm683_vm2, %v8177_v3, %v8176_v34  ;;  %v6971_v17 = vmax.f32 %v2484_v54, 0.0  ;;  %v2485_v50 = vadd.f32 %v6652_v47, %v2446_v48  ;;  %v5215_v22 = vpop.f32.mrb[88].mxu0  ;;  %v2765_v28 = vsel %vm717_vm3, %v2739_v43, 0.0 }
 0x21e   : > { %v2534_v8 = vrot.slane %v6719_v31, 7  ;;  %v6978_v20 = vmax.f32 %v2487_v59, 0.0  ;;  %v2396_v21 = vadd.f32 %v5215_v22, %v6681_v26  ;;  %v2387_v29 = vpop.f32.mrb[89].mxu0  ;;  %v6981_v45 = vpack.c.bf16 %v2765_v28, %v2740_v41 }
 0x21f   : > { %v6984_v37 = vmax.f32 %v2485_v50, 0.0  ;;  %v2388_v48 = vadd.f32 %v2387_v29, %v6647_v30  ;;  %v5216_v54 = vpop.f32.mrb[90].mxu0  ;;  %3170 = vrot.lane.b32.xlu1 %v6770_v12, %s5472_s23  ;;  %v2535_v31 = vrot.slane %v6732_v46, 7 }
 0x220   : > { %8178 = vst [vmem:[#allocation9_spill] sm:$0xff] %v6981_v45  ;;  %v2451_v59 = vmul.f32 %v6643_v11, %v2396_v21  ;;  %v2399_v26 = vadd.f32 %v5216_v54, %v6690_v19  ;;  %v2390_v34 = vpop.f32.mrb[91].mxu0  ;;  %v6995_v41 = vpack.c.bf16 %v6978_v20, %v6960_v15  ;;  %v2585_v21 = vsel %vm456_vm0, %v2533_v5, %v2534_v8 }
 0x221   : > { %v2449_v30 = vmul.f32 %v6643_v11, %v2388_v48  ;;  %v2391_v29 = vadd.f32 %v2390_v34, %v6658_v44  ;;  %v7002_v46 = vpack.c.bf16 %v6984_v37, %v6971_v17  ;;  %v2584_v19 = vsel %vm456_vm0, %v2534_v8, %v2535_v31 }
 0x222   : > { %v2490_v22 = vadd.f32 %v6652_v47, %v2451_v59  ;;  %v2452_v28 = vmul.f32 %v6643_v11, %v2399_v26  ;;  %v2600_v44 = vsel %vm521_vm1, %v2585_v21, 0.0  ;;  %v2536_v59 = vrot.slane %v6780_v1, 7 }
 0x223   : > { %v2488_v54 = vadd.f32 %v6652_v47, %v2449_v30  ;;  %v2450_v48 = vmul.f32 %v6643_v11, %v2391_v29  ;;  %3090 = vrot.lane.b32.xlu1 %v6934_v13, %s5472_s23  ;;  %v7020_v43 = vpack.c.bf16 %v2584_v19, %v2600_v44  ;;  %v2537_v5 = vrot.slane %v6792_v16, 7  ;;  %v5357_v44 = vld [vmem:[%s8111_s2 + $0x80] sm:$0xff]  }
 0x224   : > { %v7017_v34 = vmax.f32 %v2490_v22, 0.0  ;;  %v2491_v26 = vadd.f32 %v6652_v47, %v2452_v28  ;;  %v2583_v50 = vsel %vm456_vm0, %v2535_v31, %v2536_v59  ;;  %v8180_v21 = vrot.slane %v6838_v62, 1  ;;  %v5356_v28 = vld [vmem:[%s8111_s2 + $0xc0] sm:$0xff]  }
 0x225   : > { %8179 = vst [vmem:[#allocation10_spill] sm:$0xff] %v7020_v43  ;;  %v7023_v8 = vmax.f32 %v2488_v54, 0.0  ;;  %v2489_v30 = vadd.f32 %v6652_v47, %v2450_v48  ;;  %v5219_v29 = vpop.f32.mrb[92].mxu0  ;;  %v8181_v1 = vrot.slane %v6860_v14, 1  ;;  %5049 = vmatprep.subr.bf16.mxu0 %v5356_v28 }
 0x226   : > { %v7039_v54 = vmax.f32 %v2491_v26, 0.0  ;;  %v2412_v48 = vadd.f32 %v5219_v29, %v6798_v56  ;;  %v2403_v31 = vpop.f32.mrb[93].mxu0  ;;  %5050 = vmatpush3.bf16.msra.mxu0 %v5357_v44 }
 0x227   : > { %v2737_v22 = vsel %vm683_vm2, %v8181_v1, %v8180_v21  ;;  %v7047_v1 = vmax.f32 %v2489_v30, 0.0  ;;  %v2404_v3 = vadd.f32 %v2403_v31, %v6742_v0  ;;  %v5220_v16 = vpop.f32.mrb[94].mxu0  ;;  %3172 = vrot.lane.b32.xlu1 %v6818_v10, %s5472_s23  ;;  %v2538_v21 = vrot.slane %v6773_v39, 7 }
 0x228   : > { %v2455_v29 = vmul.f32 %v6643_v11, %v2412_v48  ;;  %v2415_v19 = vadd.f32 %v5220_v16, %v6814_v60  ;;  %v2406_v53 = vpop.f32.mrb[95].mxu0  ;;  %v2582_v60 = vsel %vm456_vm0, %v2536_v59, %v2537_v5  ;;  %v7071_v16 = vld [vmem:[%s8111_s2 + $0x100] sm:$0xff]   ;;  %v8183_v48 = vrot.slane %v6844_v4, 1 }
 0x229   : > { %v2453_v0 = vmul.f32 %v6643_v11, %v2404_v3  ;;  %v2407_v31 = vadd.f32 %v2406_v53, %v6751_v33  ;;  %v7064_v26 = vpack.c.bf16 %v7047_v1, %v7023_v8  ;;  %v2602_v53 = vsel %vm521_vm1, %v2583_v50, 0.0  ;;  %5221 = vmatprep.subr.bf16.mxu1 %v7071_v16 }
 0x22a   : > { %v2494_v28 = vadd.f32 %v6652_v47, %v2455_v29  ;;  %v2456_v56 = vmul.f32 %v6643_v11, %v2415_v19  ;;  %v8182_v19 = vrot.slane %v6860_v14, 1  ;;  %v8195_v39 = vrot.slane %v6910_v25, 1 }
 0x22b   : > { %v2492_v3 = vadd.f32 %v6652_v47, %v2453_v0  ;;  %v2454_v33 = vmul.f32 %v6643_v11, %v2407_v31  ;;  %3092 = vrot.lane.b32.xlu1 %v6927_v27, %s5472_s23  ;;  %v7088_v0 = vpack.c.bf16 %v2582_v60, %v2602_v53  ;;  %v2767_v11 = vsel %vm717_vm3, %v2737_v22, 0.0 }
 0x22c   : > { %v2738_v59 = vsel %vm683_vm2, %v8183_v48, %v8182_v19  ;;  %v7085_v44 = vmax.f32 %v2494_v28, 0.0  ;;  %v2495_v29 = vadd.f32 %v6652_v47, %v2456_v56  ;;  %v5359_v28 = vld [vmem:[%s8111_s2 + $0xc8] sm:$0xff]   ;;  %v2539_v22 = vrot.slane %v6788_v61, 7 }
 0x22d   : > { %v7093_v31 = vmax.f32 %v2492_v3, 0.0  ;;  %v2493_v50 = vadd.f32 %v6652_v47, %v2454_v33  ;;  %v7096_v30 = vpack.c.bf16 %v2767_v11, %v2738_v59  ;;  %v5360_v47 = vld [vmem:[%s8111_s2 + $0x88] sm:$0xff]   ;;  %v2581_v19 = vsel %vm456_vm0, %v2537_v5, %v2538_v21  ;;  %5051 = vmatprep.subr.bf16.mxu0 %v5359_v28 }
 0x22e   : > { %v7104_v53 = vmax.f32 %v2495_v29, 0.0  ;;  %v2580_v59 = vsel %vm456_vm0, %v2538_v21, %v2539_v22  ;;  %v2604_v29 = vsel %vm521_vm1, %v2581_v19, 0.0  ;;  %5052 = vmatpush3.bf16.msra.mxu0 %v5360_v47  ;;  %v7130_v5 = vpack.c.bf16 %v7039_v54, %v7017_v34 }
 0x22f   : > { %v7112_v33 = vmax.f32 %v2493_v50, 0.0  ;;  %3174 = vrot.lane.b32.xlu1 %v6841_v57, %s5472_s23  ;;  %v7126_v56 = vpack.c.bf16 %v2580_v59, %v2604_v29  ;;  %v8184_v28 = vrot.slane %v6669_v51, 7  ;;  %v2540_v19 = vrot.slane %v6844_v4, 7 }
 0x230   : > { %v8141_v48 = vrot.slane %v7104_v53, 7  ;;  %v2541_v47 = vrot.slane %v6860_v14, 7  ;;  %v8185_v3 = vrot.slane %v6902_v32, 1  ;;  %v8186_v59 = vrot.slane %v6850_v36, 1 }
 0x231   : > { %v2579_v50 = vsel %vm456_vm0, %v2539_v22, %v2540_v19  ;;  %v5363_v22 = vld [vmem:[%s8111_s2 + $0xd8] sm:$0xff]  }
 0x232   : > { %v2591_v21 = vsel %vm456_vm0, %v8141_v48, %v8184_v28  ;;  %v2735_v29 = vsel %vm683_vm2, %v8186_v59, %v8185_v3  ;;  %v8187_v61 = vmov %v8186_v59  ;;  %v8188_v28 = vrot.slane %v6838_v62, 1  ;;  %v5361_v3 = vld [vmem:[%s8111_s2 + $0xd0] sm:$0xff]  }
 0x233   : > { %3094 = vrot.lane.b32.xlu1 %v7002_v46, %s5472_s23  ;;  %v2594_v11 = vsel %vm521_vm1, %v2591_v21, 0.0  ;;  %v2769_v14 = vsel %vm717_vm3, %v2735_v29, 0.0  ;;  %v2542_v48 = vrot.slane %v6838_v62, 7  ;;  %v2578_v21 = vsel %vm456_vm0, %v2540_v19, %v2541_v47  ;;  %5053 = vmatprep.subr.bf16.mxu0 %v5361_v3 }
 0x234   : > { %v2736_v4 = vsel %vm683_vm2, %v8188_v28, %v8187_v61  ;;  %v7163_v59 = vpack.c.bf16 %v6857_v63, %v2594_v11  ;;  %v5362_v61 = vld [vmem:[%s8111_s2 + $0x90] sm:$0xff]   ;;  %v2606_v62 = vsel %vm521_vm1, %v2579_v50, 0.0  ;;  %v2543_v29 = vrot.slane %v6850_v36, 7 }
 0x235   : > { %v7169_v60 = vpack.c.bf16 %v2769_v14, %v2736_v4  ;;  %v2577_v63 = vsel %vm456_vm0, %v2541_v47, %v2542_v48  ;;  %v7181_v11 = vpack.c.bf16 %v7112_v33, %v7093_v31  ;;  %v7188_v19 = vpack.c.bf16 %v2578_v21, %v2606_v62  ;;  %5054 = vmatpush3.bf16.msra.mxu0 %v5362_v61  ;;  %v5364_v21 = vld [vmem:[%s8111_s2 + $0x98] sm:$0xff]  }
 0x236   : > { %3120 = vrot.lane.b32.xlu0 %v7163_v59, %s5472_s23  ;;  %v2608_v36 = vsel %vm521_vm1, %v2577_v63, 0.0  ;;  %v8190_v50 = vrot.slane %v6896_v24, 1  ;;  %v8191_v47 = vrot.slane %v6916_v49, 1  ;;  %v8193_v14 = vrot.slane %v6902_v32, 1  ;;  %5055 = vmatprep.subr.bf16.mxu0 %v5363_v22 }
 0x237   : > { %8189 = vst [vmem:[#allocation11_spill] sm:$0xff] %v7181_v11  ;;  %3176 = vrot.lane.b32.xlu1 %v6893_v40, %s5472_s23  ;;  %v2576_v62 = vsel %vm456_vm0, %v2542_v48, %v2543_v29  ;;  %v8196_v48 = vmov %v8195_v39 }
 0x238   : > { %v2733_v28 = vsel %vm683_vm2, %v8191_v47, %v8190_v50  ;;  %v8192_v4 = vmov %v8191_v47  ;;  %v2544_v50 = vrot.slane %v6902_v32, 7  ;;  %v2545_v47 = vrot.slane %v6916_v49, 7 }
 0x239   : > { %v2734_v3 = vsel %vm683_vm2, %v8193_v14, %v8192_v4  ;;  %v2771_v63 = vsel %vm717_vm3, %v2733_v28, 0.0  ;;  %v7215_v4 = vpack.c.bf16 %v2576_v62, %v2608_v36  ;;  %v8194_v14 = vrot.slane %v6971_v17, 1  ;;  %5056 = vmatpush3.bf16.msra.mxu0 %v5364_v21 }
 0x23a   : > { %v7217_v61 = vpack.c.bf16 %v2771_v63, %v2734_v3  ;;  %v8197_v28 = vrot.slane %v6896_v24, 1  ;;  %v2574_v49 = vsel %vm456_vm0, %v2544_v50, %v2545_v47  ;;  %v2575_v22 = vsel %vm456_vm0, %v2543_v29, %v2544_v50  ;;  %3122 = vrot.lane.b32.xlu0 %v6913_v52, %s5472_s23 }
 0x23b   : > { %v2731_v40 = vsel %vm683_vm2, %v8195_v39, %v8194_v14  ;;  %v8198_v3 = vrot.slane %v6960_v15, 1  ;;  %v8199_v39 = vrot.slane %v6984_v37, 1  ;;  %v2610_v63 = vsel %vm521_vm1, %v2575_v22, 0.0  ;;  %3096 = vrot.lane.b32.xlu1 %v6995_v41, %s5472_s23 }
 0x23c   : > { %v2732_v32 = vsel %vm683_vm2, %v8197_v28, %v8196_v48  ;;  %v2773_v36 = vsel %vm717_vm3, %v2731_v40, 0.0  ;;  %v8201_v50 = vrot.slane %v6971_v17, 1  ;;  %v7259_v28 = vpack.c.bf16 %v2574_v49, %v2610_v63 }
 0x23d   : > { %v2729_v62 = vsel %vm683_vm2, %v8199_v39, %v8198_v3  ;;  %v7247_v14 = vpack.c.bf16 %v2773_v36, %v2732_v32  ;;  %v8200_v29 = vmov %v8199_v39  ;;  %v2546_v32 = vrot.slane %v6896_v24, 7  ;;  %v5365_v36 = vld [vmem:[%s8111_s2 + $0xe0] sm:$0xff]  }
 0x23e   : > { %v2730_v40 = vsel %vm683_vm2, %v8201_v50, %v8200_v29  ;;  %v2775_v48 = vsel %vm717_vm3, %v2729_v62, 0.0  ;;  %v2547_v22 = vrot.slane %v6910_v25, 7  ;;  %v5366_v39 = vld [vmem:[%s8111_s2 + $0xa0] sm:$0xff]   ;;  %v8202_v21 = vrot.slane %v7023_v8, 1  ;;  %5057 = vmatprep.subr.bf16.mxu0 %v5365_v36  ;;  %3124 = vrot.lane.b32.xlu0 %v6963_v58, %s5472_s23  ;;  %v5368_v36 = vld [vmem:[%s8111_s2 + $0xa8] sm:$0xff]  }
 0x23f   : > { %v7261_v3 = vpack.c.bf16 %v2775_v48, %v2730_v40  ;;  %v8203_v62 = vrot.slane %v6978_v20, 1  ;;  %v8205_v24 = vrot.slane %v6960_v15, 1  ;;  %v8206_v29 = vrot.slane %v7017_v34, 1  ;;  %5058 = vmatpush3.bf16.msra.mxu0 %v5366_v39  ;;  %3178 = vrot.lane.b32.xlu1 %v6981_v45, %s5472_s23 }
 0x240   : > { %v8207_v50 = vrot.slane %v7047_v1, 1  ;;  %v8209_v57 = vmov %v8202_v21  ;;  %v8213_v39 = vrot.slane %v7017_v34, 1 }
 0x241   : > { %v2727_v49 = vsel %vm683_vm2, %v8203_v62, %v8202_v21  ;;  %v8204_v63 = vmov %v8203_v62  ;;  %v2572_v62 = vsel %vm456_vm0, %v2546_v32, %v2547_v22 }
 0x242   : > { %v2728_v25 = vsel %vm683_vm2, %v8205_v24, %v8204_v63  ;;  %v2725_v40 = vsel %vm683_vm2, %v8207_v50, %v8206_v29  ;;  %v8208_v48 = vmov %v8207_v50  ;;  %v2573_v63 = vsel %vm456_vm0, %v2545_v47, %v2546_v32  ;;  %v5367_v29 = vld [vmem:[%s8111_s2 + $0xe8] sm:$0xff]   ;;  %3126 = vrot.lane.b32.xlu0 %v7020_v43, %s5472_s23 }
 0x243   : > { %v2726_v21 = vsel %vm683_vm2, %v8209_v57, %v8208_v48  ;;  %v2777_v24 = vsel %vm717_vm3, %v2727_v49, 0.0  ;;  %v2779_v10 = vsel %vm717_vm3, %v2725_v40, 0.0  ;;  %v2612_v57 = vsel %vm521_vm1, %v2573_v63, 0.0  ;;  %5059 = vmatprep.subr.bf16.mxu0 %v5367_v29  ;;  %3098 = vrot.lane.b32.xlu1 %v7064_v26, %s5472_s23 }
 0x244   : > { %v7310_v50 = vpack.c.bf16 %v2777_v24, %v2728_v25  ;;  %v7312_v47 = vpack.c.bf16 %v2779_v10, %v2726_v21  ;;  %v2548_v32 = vrot.slane %v6971_v17, 7  ;;  %v7320_v49 = vpack.c.bf16 %v2572_v62, %v2612_v57  ;;  %5060 = vmatpush3.bf16.msra.mxu0 %v5368_v36 }
 0x245   : > { %v2549_v40 = vrot.slane %v6984_v37, 7  ;;  %v8210_v48 = vrot.slane %v7093_v31, 1  ;;  %v8211_v25 = vrot.slane %v7039_v54, 1  ;;  %v8214_v63 = vrot.slane %v7085_v44, 1 }
 0x246   : > { %v2571_v62 = vsel %vm456_vm0, %v2547_v22, %v2548_v32  ;;  %v8215_v24 = vrot.slane %v7112_v33, 1  ;;  %v8223_v36 = vrot.slane %v7023_v8, 7  ;;  %v8228_v43 = vrot.slane %v7017_v34, 7  ;;  %v5371_v8 = vld [vmem:[%s8111_s2 + $0xf8] sm:$0xff]   ;;  %3128 = vrot.lane.b32.xlu0 %v7088_v0, %s5472_s23 }
 0x247   : > { %v2723_v10 = vsel %vm683_vm2, %v8211_v25, %v8210_v48  ;;  %v8212_v17 = vmov %v8211_v25  ;;  %v8217_v25 = vrot.slane %v7093_v31, 1  ;;  %v2570_v22 = vsel %vm456_vm0, %v2548_v32, %v2549_v40  ;;  %3180 = vrot.lane.b32.xlu1 %v7096_v30, %s5472_s23 }
 0x248   : > { %v2724_v21 = vsel %vm683_vm2, %v8213_v39, %v8212_v17  ;;  %v2781_v37 = vsel %vm717_vm3, %v2723_v10, 0.0  ;;  %v2721_v57 = vsel %vm683_vm2, %v8215_v24, %v8214_v63  ;;  %v8216_v48 = vmov %v8215_v24 }
 0x249   : > { %v2722_v29 = vsel %vm683_vm2, %v8217_v25, %v8216_v48  ;;  %v2614_v10 = vsel %vm521_vm1, %v2571_v62, 0.0  ;;  %v7355_v17 = vpack.c.bf16 %v2781_v37, %v2724_v21  ;;  %v2783_v39 = vsel %vm717_vm3, %v2721_v57, 0.0 }
 0x24a   : > { %v7361_v63 = vpack.c.bf16 %v2570_v22, %v2614_v10  ;;  %v7363_v24 = vpack.c.bf16 %v2783_v39, %v2722_v29  ;;  %v2550_v48 = vrot.slane %v6960_v15, 7  ;;  %v2551_v25 = vrot.slane %v6978_v20, 7  ;;  %3130 = vrot.lane.b32.xlu0 %v7126_v56, %s5472_s23 }
 0x24b   : > { %v8218_v32 = vrot.slane %v7104_v53, 1  ;;  %v8219_v21 = vrot.slane %v7085_v44, 1  ;;  %v8220_v37 = vrot.slane %v6669_v51, 1  ;;  %v8222_v20 = vrot.slane %v7047_v1, 7  ;;  %v5369_v51 = vld [vmem:[%s8111_s2 + $0xf0] sm:$0xff]   ;;  %3100 = vrot.lane.b32.xlu1 %v7130_v5, %s5472_s23 }
 0x24c   : > { %v8224_v22 = vrot.slane %v7039_v54, 7  ;;  %v8225_v10 = vrot.slane %v7017_v34, 7  ;;  %5061 = vmatprep.subr.bf16.mxu0 %v5369_v51  ;;  %v8233_v51 = vrot.slane %v7039_v54, 7 }
 0x24d   : > { %v2720_v62 = vsel %vm683_vm2, %v8219_v21, %v8218_v32  ;;  %v8221_v57 = vmov %v8218_v32  ;;  %v2566_v29 = vsel %vm456_vm0, %v8223_v36, %v8222_v20  ;;  %v5370_v32 = vld [vmem:[%s8111_s2 + $0xb0] sm:$0xff]   ;;  %v2568_v21 = vsel %vm456_vm0, %v2550_v48, %v2551_v25 }
 0x24e   : > { %v2751_v15 = vsel %vm683_vm2, %v8221_v57, %v8220_v37  ;;  %v2564_v39 = vsel %vm456_vm0, %v8225_v10, %v8224_v22  ;;  %v2569_v37 = vsel %vm456_vm0, %v2549_v40, %v2550_v48  ;;  %v8226_v20 = vmov %v8223_v36  ;;  %5062 = vmatpush3.bf16.msra.mxu0 %v5370_v32 }
 0x24f   : > { %v2895_v57 = vsel %vm717_vm3, %v2751_v15, 0.0  ;;  %v2567_v36 = vsel %vm456_vm0, %v2551_v25, %v8226_v20  ;;  %v2616_v22 = vsel %vm521_vm1, %v2569_v37, 0.0  ;;  %v8229_v40 = vrot.slane %v7047_v1, 7  ;;  %v5372_v15 = vld [vmem:[%s8111_s2 + $0xb8] sm:$0xff]   ;;  %5063 = vmatprep.subr.bf16.mxu0 %v5371_v8  ;;  %3132 = vrot.lane.b32.xlu0 %v7188_v19, %s5472_s23 }
 0x250   : > { %v7411_v10 = vpack.c.bf16 %v2895_v57, %v2720_v62  ;;  %v2618_v45 = vsel %vm521_vm1, %v2567_v36, 0.0  ;;  %v7426_v48 = vpack.c.bf16 %v2568_v21, %v2616_v22  ;;  %v8230_v1 = vrot.slane %v7112_v33, 7  ;;  %3182 = vrot.lane.b32.xlu1 %v7169_v60, %s5472_s23 }
 0x251   : > { %v2565_v6 = vsel %vm456_vm0, %v8229_v40, %v8228_v43  ;;  %v7428_v25 = vpack.c.bf16 %v2566_v29, %v2618_v45  ;;  %v8231_v62 = vrot.slane %v7093_v31, 7  ;;  %v8234_v37 = vrot.slane %v7104_v53, 7 }
 0x252   : > { %8227 = vst [vmem:[#allocation12_spill] sm:$0xff] %v7411_v10  ;;  %v2620_v34 = vsel %vm521_vm1, %v2565_v6, 0.0  ;;  %v8235_v32 = vrot.slane %v7085_v44, 7  ;;  %v8237_v36 = vmov %v8230_v1  ;;  %v7469_v22 = vpack.c.bf16 %v7104_v53, %v7085_v44  ;;  %5064 = vmatpush3.bf16.msra.mxu0 %v5372_v15 }
 0x253   : > { %v2562_v43 = vsel %vm456_vm0, %v8231_v62, %v8230_v1  ;;  %v7443_v45 = vpack.c.bf16 %v2564_v39, %v2620_v34  ;;  %v8232_v29 = vmov %v8231_v62  ;;  %3134 = vrot.lane.b32.xlu0 %v7215_v4, %s5472_s23  ;;  %v3250_v15 = vsel %vm1342_vm4, 0.0|0.0, %v3073_v2 }
 0x254   : > { %v2563_v21 = vsel %vm456_vm0, %v8233_v51, %v8232_v29  ;;  %v2560_v57 = vsel %vm456_vm0, %v8235_v32, %v8234_v37  ;;  %v8236_v20 = vmov %v8235_v32  ;;  %8238 = vst [vmem:[#allocation13_spill] sm:$0xff] %v7469_v22  ;;  %3102 = vrot.lane.b32.xlu1 %v7181_v11, %s5472_s23 }
 0x255   : > { %v2561_v39 = vsel %vm456_vm0, %v8237_v36, %v8236_v20  ;;  %v2622_v54 = vsel %vm521_vm1, %v2563_v21, 0.0  ;;  %v5373_v21 = vld [vmem:[%s8111_s2 + $0x108] sm:$0xff]   ;;  %v5374_v20 = vld [vmem:[%s8111_s2 + $0x110] sm:$0xff]  }
 0x256   : > { %v2830_v31 = vsel %vm521_vm1, %v2561_v39, 0.0  ;;  %v7471_v40 = vpack.c.bf16 %v2562_v43, %v2622_v54 }
 0x257   : > { %v7473_v6 = vpack.c.bf16 %v2560_v57, %v2830_v31  ;;  %3216 = vrot.lane.b32.xlu0 %v6687_v42, %s5472_s23 }
 0x258   : > { %3184 = vrot.lane.b32.xlu1 %v7217_v61, %s5472_s23 }
 0x25b   : > { %3136 = vrot.lane.b32.xlu0 %v7259_v28, %s5472_s23 }
 0x25c   : > { %3186 = vrot.lane.b32.xlu1 %v7247_v14, %s5472_s23 }
 0x25f   : > { %3218 = vrot.lane.b32.xlu0 %v6757_v23, %s5472_s23 }
 0x260   : > { %3188 = vrot.lane.b32.xlu1 %v7261_v3, %s5472_s23 }
 0x263   : > { %3138 = vrot.lane.b32.xlu0 %v7320_v49, %s5472_s23 }
 0x264   : > { %3190 = vrot.lane.b32.xlu1 %v7310_v50, %s5472_s23 }
 0x267   : > { %3220 = vrot.lane.b32.xlu0 %v6748_v38, %s5472_s23 }
 0x268   : > { %3192 = vrot.lane.b32.xlu1 %v7312_v47, %s5472_s23 }
 0x26b   : > { %3140 = vrot.lane.b32.xlu0 %v7361_v63, %s5472_s23 }
 0x26c   : > { %3194 = vrot.lane.b32.xlu1 %v7355_v17, %s5472_s23 }
 0x26d   : > { %v3075_v44 = vpop.permute.xlu1 %3074 }
 0x26e   : > { %v3254_v39 = vsel %vm1342_vm4, %v7163_v59, %v3075_v44  ;;  %v8240_v59 = vld [vmem:[#allocation6_spill] sm:$0xff] }
 0x26f   : > { %3222 = vrot.lane.b32.xlu0 %v6811_v7, %s5472_s23 }
 0x270   : > { %3196 = vrot.lane.b32.xlu1 %v7363_v24, %s5472_s23 }
 0x271   : > { %v3077_v53 = vpop.permute.xlu1 %3076 }
 0x273   : > { %3142 = vrot.lane.b32.xlu0 %v7426_v48, %s5472_s23 }
 0x274   : > { %3198 = vrot.lane.b32.xlu1 %v7411_v10, %s5472_s23 }
 0x275   : > { %v3079_v33 = vpop.permute.xlu1 %3078 }
 0x277   : > { %3224 = vrot.lane.b32.xlu0 %v6805_v9, %s5472_s23 }
 0x279   : > { %v3081_v8 = vpop.permute.xlu1 %3080 }
 0x27b   : > { %3144 = vrot.lane.b32.xlu0 %v7428_v25, %s5472_s23 }
 0x27d   : > { %v7535_v34 = vpop.permute.xlu1 %3082 }
 0x27f   : > { %3226 = vrot.lane.b32.xlu0 %v6881_v55, %s5472_s23 }
 0x281   : > { %v7541_v1 = vpop.permute.xlu1 %3084 }
 0x283   : > { %3146 = vrot.lane.b32.xlu0 %v7443_v45, %s5472_s23 }
 0x285   : > { %v7545_v62 = vpop.permute.xlu1 %3086 }
 0x287   : > { %3228 = vrot.lane.b32.xlu0 %v6874_v35, %s5472_s23 }
 0x289   : > { %v3169_v43 = vpop.permute.xlu1 %3168 }
 0x28b   : > { %3148 = vrot.lane.b32.xlu0 %v7471_v40, %s5472_s23 }
 0x28d   : > { %v7559_v32 = vpop.permute.xlu1 %3088 }
 0x28f   : > { %3230 = vrot.lane.b32.xlu0 %v6934_v13, %s5472_s23 }
 0x291   : > { %v3171_v54 = vpop.permute.xlu1 %3170 }
 0x293   : > { %3150 = vrot.lane.b32.xlu0 %v7473_v6, %s5472_s23 }
 0x297   : > { %3232 = vrot.lane.b32.xlu0 %v6927_v27, %s5472_s23 }
 0x29b   : > { %3234 = vrot.lane.b32.xlu0 %v7002_v46, %s5472_s23 }
 0x29f   : > { %3236 = vrot.lane.b32.xlu0 %v6995_v41, %s5472_s23 }
 0x2a3   : > { %3238 = vrot.lane.b32.xlu0 %v7064_v26, %s5472_s23 }
 0x2a7   : > { %3240 = vrot.lane.b32.xlu0 %v7130_v5, %s5472_s23 }
 0x2a8   : > { %v3121_v29 = vpop.permute.xlu0 %3120 }
 0x2a9   : > { %v3314_v51 = vsel %vm1342_vm4, 0.0|0.0, %v3121_v29  ;;  %v7577_v29 = vpop.permute.xlu1 %3090 }
 0x2aa   : > { %3872 = vmatprep.mubr.bf16.mxu1 %v3314_v51  ;;  %v3258_v51 = vsel %vm1342_vm4, %v6913_v52, %v3077_v53 }
 0x2ab   : > { %3242 = vrot.lane.b32.xlu0 %v7181_v11, %s5472_s23  ;;  %3873 = vmatmul.mubr.bf16.vlgmr.msra.gmra.mrb[64].mxu1 %v3250_v15 }
 0x2ac   : > { %5222 = vmatpush3.bf16.msra.mxu1 %v7071_v16  ;;  %v3123_v37 = vpop.permute.xlu0 %3122  ;;  %v5375_v16 = vld [vmem:[%s8111_s2 + $0x118] sm:$0xff]  }
 0x2ad   : > { %v3318_v57 = vsel %vm1342_vm4, %v6727_v18, %v3123_v37  ;;  %5223 = vmatprep.subr.bf16.mxu1 %v5373_v21  ;;  %v8239_v18 = vmov 0.0|0.0   ;;  %v3173_v37 = vpop.permute.xlu1 %3172 }
 0x2ae   : > { %3880 = vmatprep.mubr.bf16.mxu1 %v3318_v57 }
 0x2af   : > { %3244 = vrot.lane.b32.xlu0 %v7469_v22, %s5472_s23 }
 0x2b0   : > { %v3125_v36 = vpop.permute.xlu0 %3124  ;;  %5224 = vmatpush3.bf16.msra.mxu1 %v5373_v21 }
 0x2b1   : > { %5225 = vmatprep.subr.bf16.mxu1 %v5374_v20  ;;  %v3322_v31 = vsel %vm1342_vm4, %v6770_v12, %v3125_v36  ;;  %v3262_v36 = vsel %vm1342_vm4, %v6963_v58, %v3079_v33 }
 0x2b3   : > { %3246 = vrot.lane.b32.xlu0 %v8239_v18, %s5472_s23  ;;  %3881 = vmatmul.mubr.bf16.gmra.mrb[68].mxu1 %v3254_v39  ;;  %v8243_v18 = vld [vmem:[#allocation10_spill] sm:$0xff]  ;;  %s5412_s23 = sshll.u32 %s5474_s29, 4  ;;  %s5413_s23 = int_to_ptr.vmem [resolvable:$false] %s5412_s23 }
 0x2b4   : > { %3888 = vmatprep.mubr.bf16.mxu1 %v3322_v31  ;;  %v3127_v2 = vpop.permute.xlu0 %3126  ;;  %5226 = vmatpush3.bf16.msra.mxu1 %v5374_v20  ;;  %v8241_v20 = vld [vmem:[#allocation7_spill] sm:$0xff]  ;;  %v7587_v31 = vpop.permute.xlu1 %3092  ;;  %v3266_v10 = vsel %vm1342_vm4, %v8243_v18, %v3081_v8  ;;  %v8245_v8 = vld [vmem:[#allocation9_spill] sm:$0xff]  ;;  %s5414_s30 = scalar_lea.vmem %s5413_s23, 8192  ;;  %p5415_p0 = scmp.lt.s32.totalorder %s8058_s25, %s5413_s23 }
 0x2b5   : > { %5227 = vmatprep.subr.bf16.mxu1 %v5375_v16  ;;  %v3326_v44 = vsel %vm1342_vm4, %v8240_v59, %v3127_v2  ;;  %v8242_v2 = vld [vmem:[#allocation5_spill] sm:$0xff] }
 0x2b8   : > { %v3129_v15 = vpop.permute.xlu0 %3128  ;;  %5228 = vmatpush3.bf16.msra.mxu1 %v5375_v16  ;;  %v3175_v33 = vpop.permute.xlu1 %3174 }
 0x2b9   : > { %v3330_v16 = vsel %vm1342_vm4, %v8241_v20, %v3129_v15 }
 0x2bb   : > { %3889 = vmatmul.mubr.bf16.gmra.mrb[72].mxu1 %v3258_v51 }
 0x2bc   : > { %v3131_v21 = vpop.permute.xlu0 %3130  ;;  %3896 = vmatprep.mubr.bf16.mxu1 %v3326_v44  ;;  %v3378_v44 = vsel %vm1342_vm4, %v8242_v2, %v3169_v43  ;;  %v7597_v11 = vpop.permute.xlu1 %3094  ;;  %v3270_v43 = vsel %vm1342_vm4, %v7088_v0, %v7535_v34 }
 0x2c1   : > { %v3133_v57 = vpop.permute.xlu0 %3132 }
 0x2c3   : > { %3897 = vmatmul.mubr.bf16.gmra.mrb[76].mxu1 %v3262_v36  ;;  %v8244_v36 = vld [vmem:[#allocation8_spill] sm:$0xff] }
 0x2c4   : > { %3904 = vmatprep.mubr.bf16.mxu1 %v3330_v16  ;;  %v3334_v15 = vsel %vm1342_vm4, %v8244_v36, %v3131_v21  ;;  %v3338_v21 = vsel %vm1342_vm4, %v8245_v8, %v3133_v57 }
 0x2c5   : > { %v3135_v39 = vpop.permute.xlu0 %3134 }
 0x2c6   : > { %v3342_v34 = vsel %vm1342_vm4, %v7096_v30, %v3135_v39 }
 0x2c9   : > { %v3217_v53 = vpop.permute.xlu0 %3216 }
 0x2ca   : > { %v3442_v51 = vsel %vm1342_vm4, %v6913_v52, %v3217_v53 }
 0x2cb   : > { %4033 = vmatprep.mubr.bf16.mxu0 %v3442_v51  ;;  %3905 = vmatmul.mubr.bf16.gmra.mrb[80].mxu1 %v3266_v10  ;;  %v3382_v10 = vsel %vm1342_vm4, %v6687_v42, %v3171_v54  ;;  %v3177_v51 = vpop.permute.xlu1 %3176  ;;  %v3386_v42 = vsel %vm1342_vm4, %v6757_v23, %v3173_v37  ;;  %v3390_v23 = vsel %vm1342_vm4, %v6748_v38, %v3175_v33 }
 0x2cc   : > { %4034 = vmatmul.mubr.bf16.vlgmr.msra.gmra.mrb[96].mxu0 %v3378_v44  ;;  %3912 = vmatprep.mubr.bf16.mxu1 %v3334_v15  ;;  %v3394_v38 = vsel %vm1342_vm4, %v6811_v7, %v3177_v51 }
 0x2cd   : > { %v3137_v16 = vpop.permute.xlu0 %3136 }
 0x2ce   : > { %v3346_v39 = vsel %vm1342_vm4, %v7169_v60, %v3137_v16 }
 0x2cf   : > { %v3097_v57 = vpop.permute.xlu1 %3096 }
 0x2d1   : > { %v3219_v22 = vpop.permute.xlu0 %3218 }
 0x2d2   : > { %v3446_v52 = vsel %vm1342_vm4, %v6963_v58, %v3219_v22  ;;  %v3274_v22 = vsel %vm1342_vm4, %v7126_v56, %v7541_v1  ;;  %v3278_v1 = vsel %vm1342_vm4, %v7188_v19, %v7545_v62  ;;  %v3282_v62 = vsel %vm1342_vm4, %v7215_v4, %v7559_v32 }
 0x2d3   : > { %4041 = vmatprep.mubr.bf16.mxu0 %v3446_v52  ;;  %3913 = vmatmul.mubr.bf16.gmra.mrb[84].mxu1 %v3270_v43  ;;  %v3179_v37 = vpop.permute.xlu1 %3178  ;;  %v3286_v32 = vsel %vm1342_vm4, %v7259_v28, %v7577_v29  ;;  %v3290_v29 = vsel %vm1342_vm4, %v7320_v49, %v7587_v31  ;;  %v3294_v31 = vsel %vm1342_vm4, %v7361_v63, %v7597_v11 }
 0x2d4   : > { %4042 = vmatmul.mubr.bf16.gmra.mrb[100].mxu0 %v3382_v10  ;;  %3920 = vmatprep.mubr.bf16.mxu1 %v3338_v21  ;;  %v3398_v7 = vsel %vm1342_vm4, %v6805_v9, %v3179_v37 }
 0x2d5   : > { %v3139_v53 = vpop.permute.xlu0 %3138 }
 0x2d6   : > { %v3350_v33 = vsel %vm1342_vm4, %v7217_v61, %v3139_v53 }
 0x2d7   : > { %v3099_v43 = vpop.permute.xlu1 %3098 }
 0x2d9   : > { %v3221_v2 = vpop.permute.xlu0 %3220 }
 0x2da   : > { %v3450_v58 = vsel %vm1342_vm4, %v8243_v18, %v3221_v2 }
 0x2db   : > { %4049 = vmatprep.mubr.bf16.mxu0 %v3450_v58  ;;  %3921 = vmatmul.mubr.bf16.gmra.mrb[88].mxu1 %v3274_v22  ;;  %v3181_v10 = vpop.permute.xlu1 %3180 }
 0x2dc   : > { %4050 = vmatmul.mubr.bf16.gmra.mrb[104].mxu0 %v3386_v42  ;;  %3928 = vmatprep.mubr.bf16.mxu1 %v3342_v34  ;;  %v3402_v9 = vsel %vm1342_vm4, %v6881_v55, %v3181_v10 }
 0x2dd   : > { %v3141_v54 = vpop.permute.xlu0 %3140 }
 0x2de   : > { %v3354_v53 = vsel %vm1342_vm4, %v7247_v14, %v3141_v54 }
 0x2df   : > { %v3101_v2 = vpop.permute.xlu1 %3100 }
 0x2e1   : > { %v3223_v44 = vpop.permute.xlu0 %3222 }
 0x2e2   : > { %v3454_v18 = vsel %vm1342_vm4, %v7088_v0, %v3223_v44 }
 0x2e3   : > { %4057 = vmatprep.mubr.bf16.mxu0 %v3454_v18  ;;  %3929 = vmatmul.mubr.bf16.gmra.mrb[92].mxu1 %v3278_v1  ;;  %v3183_v22 = vpop.permute.xlu1 %3182 }
 0x2e4   : > { %4058 = vmatmul.mubr.bf16.gmra.mrb[108].mxu0 %v3390_v23  ;;  %3936 = vmatprep.mubr.bf16.mxu1 %v3346_v39  ;;  %v3406_v55 = vsel %vm1342_vm4, %v6874_v35, %v3183_v22  ;;  %v3298_v39 = vsel %vm1342_vm4, %v7426_v48, %v3097_v57 }
 0x2e5   : > { %v3143_v15 = vpop.permute.xlu0 %3142 }
 0x2e6   : > { %v3358_v42 = vsel %vm1342_vm4, %v7261_v3, %v3143_v15 }
 0x2e7   : > { %v3103_v44 = vpop.permute.xlu1 %3102 }
 0x2e9   : > { %v3225_v52 = vpop.permute.xlu0 %3224 }
 0x2ea   : > { %v3458_v0 = vsel %vm1342_vm4, %v7126_v56, %v3225_v52 }
 0x2eb   : > { %4065 = vmatprep.mubr.bf16.mxu0 %v3458_v0  ;;  %3937 = vmatmul.mubr.bf16.gmra.mrb[96].mxu1 %v3282_v62  ;;  %v3185_v23 = vpop.permute.xlu1 %3184  ;;  %v3302_v62 = vsel %vm1342_vm4, %v7428_v25, %v3099_v43 }
 0x2ec   : > { %4066 = vmatmul.mubr.bf16.gmra.mrb[112].mxu0 %v3394_v38  ;;  %3944 = vmatprep.mubr.bf16.mxu1 %v3350_v33  ;;  %v3410_v11 = vsel %vm1342_vm4, %v6934_v13, %v3185_v23 }
 0x2ed   : > { %v3145_v16 = vpop.permute.xlu0 %3144 }
 0x2ee   : > { %v3362_v18 = vsel %vm1342_vm4, %v7310_v50, %v3145_v16  ;;  %v3306_v16 = vsel %vm1342_vm4, %v7443_v45, %v3101_v2  ;;  %v8246_v2 = vld [vmem:[#allocation11_spill] sm:$0xff] }
 0x2ef   : > { %v3187_v0 = vpop.permute.xlu1 %3186 }
 0x2f0   : > { %v3414_v57 = vsel %vm1342_vm4, %v6927_v27, %v3187_v0 }
 0x2f1   : > { %v3227_v21 = vpop.permute.xlu0 %3226 }
 0x2f2   : > { %v3462_v56 = vsel %vm1342_vm4, %v7188_v19, %v3227_v21 }
 0x2f3   : > { %4073 = vmatprep.mubr.bf16.mxu0 %v3462_v56  ;;  %3945 = vmatmul.mubr.bf16.gmra.mrb[100].mxu1 %v3286_v32  ;;  %v3310_v56 = vsel %vm1342_vm4, %v7471_v40, %v3103_v44 }
 0x2f4   : > { %4074 = vmatmul.mubr.bf16.gmra.mrb[116].mxu0 %v3398_v7  ;;  %3952 = vmatprep.mubr.bf16.mxu1 %v3354_v53 }
 0x2f5   : > { %v3147_v51 = vpop.permute.xlu0 %3146 }
 0x2f6   : > { %v3366_v35 = vsel %vm1342_vm4, %v7312_v47, %v3147_v51 }
 0x2f9   : > { %v3229_v58 = vpop.permute.xlu0 %3228 }
 0x2fa   : > { %v3466_v19 = vsel %vm1342_vm4, %v7215_v4, %v3229_v58 }
 0x2fb   : > { %4081 = vmatprep.mubr.bf16.mxu0 %v3466_v19  ;;  %3953 = vmatmul.mubr.bf16.gmra.mrb[104].mxu1 %v3290_v29 }
 0x2fc   : > { %4082 = vmatmul.mubr.bf16.gmra.mrb[120].mxu0 %v3402_v9  ;;  %3960 = vmatprep.mubr.bf16.mxu1 %v3358_v42 }
 0x2fd   : > { %v3149_v34 = vpop.permute.xlu0 %3148 }
 0x2fe   : > { %v3370_v38 = vsel %vm1342_vm4, %v7355_v17, %v3149_v34 }
 0x301   : > { %v3231_v54 = vpop.permute.xlu0 %3230 }
 0x302   : > { %v3470_v4 = vsel %vm1342_vm4, %v7259_v28, %v3231_v54 }
 0x303   : > { %4089 = vmatprep.mubr.bf16.mxu0 %v3470_v4  ;;  %3961 = vmatmul.mubr.bf16.gmra.mrb[108].mxu1 %v3294_v31 }
 0x304   : > { %4090 = vmatmul.mubr.bf16.gmra.mrb[124].mxu0 %v3406_v55  ;;  %3968 = vmatprep.mubr.bf16.mxu1 %v3362_v18 }
 0x305   : > { %v3151_v1 = vpop.permute.xlu0 %3150 }
 0x309   : > { %v3233_v37 = vpop.permute.xlu0 %3232 }
 0x30a   : > { %v3474_v28 = vsel %vm1342_vm4, %v7320_v49, %v3233_v37 }
 0x30b   : > { %4097 = vmatprep.mubr.bf16.mxu0 %v3474_v28  ;;  %3969 = vmatmul.mubr.bf16.gmra.mrb[112].mxu1 %v3298_v39 }
 0x30c   : > { %4098 = vmatmul.mubr.bf16.gmra.mrb[128].mxu0 %v3410_v11  ;;  %3976 = vmatprep.mubr.bf16.mxu1 %v3366_v35 }
 0x30d   : > { %v3235_v15 = vpop.permute.xlu0 %3234 }
 0x30e   : > { %v3478_v52 = vsel %vm1342_vm4, %v7361_v63, %v3235_v15  ;;  %v3189_v63 = vpop.permute.xlu1 %3188 }
 0x30f   : > { %4105 = vmatprep.mubr.bf16.mxu0 %v3478_v52  ;;  %v3418_v43 = vsel %vm1342_vm4, %v7002_v46, %v3189_v63 }
 0x311   : > { %v3237_v49 = vpop.permute.xlu0 %3236 }
 0x312   : > { %v3482_v13 = vsel %vm1342_vm4, %v7426_v48, %v3237_v49  ;;  %v3374_v48 = vsel %vm1342_vm4, %v7363_v24, %v3151_v1  ;;  %v3191_v10 = vpop.permute.xlu1 %3190 }
 0x313   : > { %3977 = vmatmul.mubr.bf16.gmra.mrb[116].mxu1 %v3302_v62  ;;  %v3422_v32 = vsel %vm1342_vm4, %v6995_v41, %v3191_v10 }
 0x314   : > { %4106 = vmatmul.mubr.bf16.gmra.mrb[132].mxu0 %v3414_v57  ;;  %3984 = vmatprep.mubr.bf16.mxu1 %v3370_v38 }
 0x315   : > { %4113 = vmatprep.mubr.bf16.mxu0 %v3482_v13  ;;  %v3239_v33 = vpop.permute.xlu0 %3238 }
 0x316   : > { %v3486_v27 = vsel %vm1342_vm4, %v7428_v25, %v3239_v33  ;;  %v3193_v25 = vpop.permute.xlu1 %3192 }
 0x317   : > { %v3426_v53 = vsel %vm1342_vm4, %v7064_v26, %v3193_v25 }
 0x319   : > { %v3241_v21 = vpop.permute.xlu0 %3240 }
 0x31a   : > { %v3490_v46 = vsel %vm1342_vm4, %v7443_v45, %v3241_v21  ;;  %v3195_v45 = vpop.permute.xlu1 %3194 }
 0x31b   : > { %3985 = vmatmul.mubr.bf16.gmra.mrb[120].mxu1 %v3306_v16 }
 0x31c   : > { %4114 = vmatmul.mubr.bf16.gmra.mrb[136].mxu0 %v3418_v43  ;;  %3992 = vmatprep.mubr.bf16.mxu1 %v3374_v48 }
 0x31d   : > { %4121 = vmatprep.mubr.bf16.mxu0 %v3486_v27  ;;  %v3243_v7 = vpop.permute.xlu0 %3242 }
 0x31e   : > { %v3494_v41 = vsel %vm1342_vm4, %v7471_v40, %v3243_v7 }
 0x321   : > { %v3245_v51 = vpop.permute.xlu0 %3244 }
 0x322   : > { %v3498_v26 = vsel %vm1342_vm4, %v7473_v6, %v3245_v51  ;;  %v8247_v6 = vld [vmem:[#allocation13_spill] sm:$0xff] }
 0x323   : > { %3993 = vmatmul.mubr.bf16.gmra.mrb[124].mxu1 %v3310_v56 }
 0x324   : > { %4122 = vmatmul.mubr.bf16.gmra.mrb[140].mxu0 %v3422_v32  ;;  %5229 = vmatprep.mubr.msk.bf16.mxu1 %vm1342_vm4, %v6770_v12  ;;  %v3430_v12 = vsel %vm1342_vm4, %v7130_v5, %v3195_v45 }
 0x325   : > { %4129 = vmatprep.mubr.bf16.mxu0 %v3490_v46  ;;  %v3247_v40 = vpop.permute.xlu0 %3246 }
 0x32b   : > { %5230 = vmatmul.mubr.msk.bf16.vlgmr.msra.gmra.mrb[128].mxu1 %vm1342_vm4, %v8240_v59  ;;  %v3197_v59 = vpop.permute.xlu1 %3196 }
 0x32c   : > { %4130 = vmatmul.mubr.bf16.gmra.mrb[144].mxu0 %v3426_v53  ;;  %5233 = vmatprep.mubr.msk.bf16.mxu1 %vm1342_vm4, %v8241_v20  ;;  %v3502_v20 = vsel %vm1342_vm4, 0.0|0.0, %v3247_v40  ;;  %v3434_v58 = vsel %vm1342_vm4, %v8246_v2, %v3197_v59 }
 0x32d   : > { %4137 = vmatprep.mubr.bf16.mxu0 %v3494_v41 }
 0x32f   : > { %v3199_v5 = vpop.permute.xlu1 %3198 }
 0x333   : > { %5234 = vmatmul.mubr.msk.bf16.gmra.mrb[132].mxu1 %vm1342_vm4, %v8244_v36  ;;  %v3438_v36 = vsel %vm1342_vm4, %v8247_v6, %v3199_v5 }
 0x334   : > { %4138 = vmatmul.mubr.bf16.gmra.mrb[148].mxu0 %v3430_v12  ;;  %5237 = vmatprep.mubr.msk.bf16.mxu1 %vm1342_vm4, %v8245_v8 }
 0x335   : > { %4145 = vmatprep.mubr.bf16.mxu0 %v3498_v26 }
 0x33b   : > { %5238 = vmatmul.mubr.msk.bf16.gmra.mrb[136].mxu1 %vm1342_vm4, %v7096_v30  ;;  %v8248_v30 = vld [vmem:[#allocation12_spill] sm:$0xff] }
 0x33c   : > { %4146 = vmatmul.mubr.bf16.gmra.mrb[152].mxu0 %v3434_v58  ;;  %5241 = vmatprep.mubr.msk.bf16.mxu1 %vm1342_vm4, %v7169_v60  ;;  %v8249_v60 = vmov 0.0|0.0  }
 0x33d   : > { %4153 = vmatprep.mubr.bf16.mxu0 %v3502_v20 }
 0x343   : > { %5242 = vmatmul.mubr.msk.bf16.gmra.mrb[140].mxu1 %vm1342_vm4, %v7217_v61 }
 0x344   : > { %4154 = vmatmul.mubr.bf16.gmra.mrb[156].mxu0 %v3438_v36  ;;  %5245 = vmatprep.mubr.msk.bf16.mxu1 %vm1342_vm4, %v7247_v14 }
 0x34b   : > { %5246 = vmatmul.mubr.msk.bf16.gmra.mrb[144].mxu1 %vm1342_vm4, %v7261_v3 }
 0x34c   : > { %5249 = vmatprep.mubr.msk.bf16.mxu1 %vm1342_vm4, %v7310_v50 }
 0x353   : > { %5250 = vmatmul.mubr.msk.bf16.gmra.mrb[148].mxu1 %vm1342_vm4, %v7312_v47 }
 0x354   : > { %5253 = vmatprep.mubr.msk.bf16.mxu1 %vm1342_vm4, %v7355_v17 }
 0x35b   : > { %5254 = vmatmul.mubr.msk.bf16.gmra.mrb[152].mxu1 %vm1342_vm4, %v7363_v24 }
 0x35c   : > { %5257 = vmatprep.mubr.msk.bf16.mxu1 %vm1342_vm4, %v8248_v30 }
 0x363   : > { %5258 = vmatmul.mubr.bf16.gmra.mrb[156].mxu1 %v8249_v60 }
 0x37e   : > { %v4953_v61 = vpop.f32.mrb[64].mxu1 }
 0x37f   : > { %v4954_v14 = vpop.f32.mrb[65].mxu1 }
 0x380   : > { %v4955_v3 = vadd.f32 %v4954_v14, %v4953_v61  ;;  %v4956_v8 = vpop.f32.mrb[66].mxu1 }
 0x381   : > { %v4957_v19 = vpop.f32.mrb[67].mxu1 }
 0x382   : > { %v4958_v50 = vadd.f32 %v4957_v19, %v4956_v8 }
 0x386   : > { %v4959_v29 = vpop.f32.mrb[68].mxu1 }
 0x387   : > { %v4960_v9 = vpop.f32.mrb[69].mxu1 }
 0x388   : > { %v4961_v47 = vadd.f32 %v4960_v9, %v4959_v29  ;;  %v4962_v22 = vpop.f32.mrb[70].mxu1 }
 0x389   : > { %v4963_v42 = vpop.f32.mrb[71].mxu1 }
 0x38a   : > { %v4964_v17 = vadd.f32 %v4963_v42, %v4962_v22 }
 0x38e   : > { %v4965_v34 = vpop.f32.mrb[72].mxu1 }
 0x38f   : > { %v4966_v54 = vpop.f32.mrb[73].mxu1 }
 0x390   : > { %v4967_v24 = vadd.f32 %v4966_v54, %v4965_v34  ;;  %v4968_v44 = vpop.f32.mrb[74].mxu1 }
 0x391   : > { %v4969_v4 = vpop.f32.mrb[75].mxu1 }
 0x392   : > { %v4970_v31 = vadd.f32 %v4969_v4, %v4968_v44 }
 0x396   : > { %v4971_v55 = vpop.f32.mrb[76].mxu1 }
 0x397   : > { %v4972_v18 = vpop.f32.mrb[77].mxu1 }
 0x398   : > { %v4973_v1 = vadd.f32 %v4972_v18, %v4971_v55  ;;  %v4974_v23 = vpop.f32.mrb[78].mxu1 }
 0x399   : > { %v4975_v37 = vpop.f32.mrb[79].mxu1 }
 0x39a   : > { %v4976_v28 = vadd.f32 %v4975_v37, %v4974_v23 }
 0x39e   : > { %v4977_v39 = vpop.f32.mrb[80].mxu1 }
 0x39f   : > { %v5065_v11 = vpop.f32.mrb[96].mxu0  ;;  %v4978_v35 = vpop.f32.mrb[81].mxu1 }
 0x3a0   : > { %v5066_v15 = vpop.f32.mrb[97].mxu0  ;;  %v7738_v52 = vadd.f32 %v4978_v35, %v4977_v39  ;;  %v4980_v49 = vpop.f32.mrb[82].mxu1 }
 0x3a1   : > { %v5067_v0 = vadd.f32 %v5066_v15, %v5065_v11  ;;  %v5068_v62 = vpop.f32.mrb[98].mxu0  ;;  %v4981_v57 = vpop.f32.mrb[83].mxu1 }
 0x3a2   : > { %v5069_v13 = vpop.f32.mrb[99].mxu0  ;;  %v4982_v38 = vadd.f32 %v4981_v57, %v4980_v49 }
 0x3a3   : > { %v5070_v63 = vadd.f32 %v5069_v13, %v5068_v62  ;;  %v7740_v33 = vadd.f32 %v5067_v0, %v4955_v3 }
 0x3a5   : > { %v7742_v16 = vadd.f32 %v5070_v63, %v4958_v50 }
 0x3a6   : > { %v4983_v43 = vpop.f32.mrb[84].mxu1 }
 0x3a7   : > { %v5071_v27 = vpop.f32.mrb[100].mxu0  ;;  %v4984_v48 = vpop.f32.mrb[85].mxu1 }
 0x3a8   : > { %v5072_v10 = vpop.f32.mrb[101].mxu0  ;;  %v7744_v21 = vadd.f32 %v4984_v48, %v4983_v43  ;;  %v4986_v32 = vpop.f32.mrb[86].mxu1 }
 0x3a9   : > { %v5073_v56 = vadd.f32 %v5072_v10, %v5071_v27  ;;  %v5074_v46 = vpop.f32.mrb[102].mxu0  ;;  %v4987_v25 = vpop.f32.mrb[87].mxu1 }
 0x3aa   : > { %v5075_v7 = vpop.f32.mrb[103].mxu0  ;;  %v4988_v53 = vadd.f32 %v4987_v25, %v4986_v32 }
 0x3ab   : > { %v5076_v41 = vadd.f32 %v5075_v7, %v5074_v46  ;;  %v7746_v45 = vadd.f32 %v5073_v56, %v4961_v47 }
 0x3ad   : > { %v7748_v51 = vadd.f32 %v5076_v41, %v4964_v17 }
 0x3ae   : > { %v4989_v12 = vpop.f32.mrb[88].mxu1 }
 0x3af   : > { %v5077_v26 = vpop.f32.mrb[104].mxu0  ;;  %v4990_v40 = vpop.f32.mrb[89].mxu1 }
 0x3b0   : > { %v5078_v59 = vpop.f32.mrb[105].mxu0  ;;  %v7750_v20 = vadd.f32 %v4990_v40, %v4989_v12  ;;  %v4992_v58 = vpop.f32.mrb[90].mxu1 }
 0x3b1   : > { %v5079_v2 = vadd.f32 %v5078_v59, %v5077_v26  ;;  %v5080_v5 = vpop.f32.mrb[106].mxu0  ;;  %v4993_v6 = vpop.f32.mrb[91].mxu1 }
 0x3b2   : > { %v5081_v36 = vpop.f32.mrb[107].mxu0  ;;  %v4994_v30 = vadd.f32 %v4993_v6, %v4992_v58 }
 0x3b3   : > { %v5082_v60 = vadd.f32 %v5081_v36, %v5080_v5  ;;  %v7752_v61 = vadd.f32 %v5079_v2, %v4967_v24 }
 0x3b5   : > { %v7754_v14 = vadd.f32 %v5082_v60, %v4970_v31 }
 0x3b6   : > { %v4995_v3 = vpop.f32.mrb[92].mxu1 }
 0x3b7   : > { %v5083_v8 = vpop.f32.mrb[108].mxu0  ;;  %v4996_v19 = vpop.f32.mrb[93].mxu1 }
 0x3b8   : > { %v5084_v50 = vpop.f32.mrb[109].mxu0  ;;  %v7756_v29 = vadd.f32 %v4996_v19, %v4995_v3  ;;  %v4998_v47 = vpop.f32.mrb[94].mxu1 }
 0x3b9   : > { %v5085_v9 = vadd.f32 %v5084_v50, %v5083_v8  ;;  %v5086_v22 = vpop.f32.mrb[110].mxu0  ;;  %v4999_v42 = vpop.f32.mrb[95].mxu1 }
 0x3ba   : > { %v5087_v17 = vpop.f32.mrb[111].mxu0  ;;  %v5000_v34 = vadd.f32 %v4999_v42, %v4998_v47 }
 0x3bb   : > { %v5088_v54 = vadd.f32 %v5087_v17, %v5086_v22  ;;  %v7758_v44 = vadd.f32 %v5085_v9, %v4973_v1 }
 0x3bd   : > { %v7760_v4 = vadd.f32 %v5088_v54, %v4976_v28 }
 0x3be   : > { %v5001_v24 = vpop.f32.mrb[96].mxu1 }
 0x3bf   : > { %v5089_v31 = vpop.f32.mrb[112].mxu0  ;;  %v5002_v55 = vpop.f32.mrb[97].mxu1 }
 0x3c0   : > { %v5090_v18 = vpop.f32.mrb[113].mxu0  ;;  %v7762_v23 = vadd.f32 %v5002_v55, %v5001_v24  ;;  %v5004_v39 = vpop.f32.mrb[98].mxu1 }
 0x3c1   : > { %v5091_v37 = vadd.f32 %v5090_v18, %v5089_v31  ;;  %v5092_v11 = vpop.f32.mrb[114].mxu0  ;;  %v5005_v35 = vpop.f32.mrb[99].mxu1 }
 0x3c2   : > { %v5093_v15 = vpop.f32.mrb[115].mxu0  ;;  %v5006_v0 = vadd.f32 %v5005_v35, %v5004_v39 }
 0x3c3   : > { %v5094_v49 = vadd.f32 %v5093_v15, %v5092_v11  ;;  %v7765_v62 = vadd.f32 %v5091_v37, %v7738_v52 }
 0x3c5   : > { %v7767_v1 = vadd.f32 %v5094_v49, %v4982_v38 }
 0x3c6   : > { %v5007_v28 = vpop.f32.mrb[100].mxu1 }
 0x3c7   : > { %v5095_v57 = vpop.f32.mrb[116].mxu0  ;;  %v5008_v13 = vpop.f32.mrb[101].mxu1 }
 0x3c8   : > { %v5096_v63 = vpop.f32.mrb[117].mxu0  ;;  %v7769_v43 = vadd.f32 %v5008_v13, %v5007_v28  ;;  %v5010_v48 = vpop.f32.mrb[102].mxu1 }
 0x3c9   : > { %v5097_v27 = vadd.f32 %v5096_v63, %v5095_v57  ;;  %v5098_v10 = vpop.f32.mrb[118].mxu0  ;;  %v5011_v56 = vpop.f32.mrb[103].mxu1 }
 0x3ca   : > { %v5099_v32 = vpop.f32.mrb[119].mxu0  ;;  %v5012_v46 = vadd.f32 %v5011_v56, %v5010_v48 }
 0x3cb   : > { %v5100_v25 = vadd.f32 %v5099_v32, %v5098_v10  ;;  %v7772_v7 = vadd.f32 %v5097_v27, %v7744_v21 }
 0x3cd   : > { %v7774_v52 = vadd.f32 %v5100_v25, %v4988_v53 }
 0x3ce   : > { %v5013_v38 = vpop.f32.mrb[104].mxu1 }
 0x3cf   : > { %v5101_v41 = vpop.f32.mrb[120].mxu0  ;;  %v5014_v12 = vpop.f32.mrb[105].mxu1 }
 0x3d0   : > { %v5102_v26 = vpop.f32.mrb[121].mxu0  ;;  %v7776_v40 = vadd.f32 %v5014_v12, %v5013_v38  ;;  %v5016_v2 = vpop.f32.mrb[106].mxu1 }
 0x3d1   : > { %v5103_v59 = vadd.f32 %v5102_v26, %v5101_v41  ;;  %v5104_v58 = vpop.f32.mrb[122].mxu0  ;;  %v5017_v5 = vpop.f32.mrb[107].mxu1 }
 0x3d2   : > { %v5105_v6 = vpop.f32.mrb[123].mxu0  ;;  %v5018_v36 = vadd.f32 %v5017_v5, %v5016_v2 }
 0x3d3   : > { %v5106_v60 = vadd.f32 %v5105_v6, %v5104_v58  ;;  %v7779_v3 = vadd.f32 %v5103_v59, %v7750_v20 }
 0x3d5   : > { %v7781_v21 = vadd.f32 %v5106_v60, %v4994_v30 }
 0x3d6   : > { %v5019_v53 = vpop.f32.mrb[108].mxu1 }
 0x3d7   : > { %v5107_v8 = vpop.f32.mrb[124].mxu0  ;;  %v5020_v19 = vpop.f32.mrb[109].mxu1 }
 0x3d8   : > { %v5108_v50 = vpop.f32.mrb[125].mxu0  ;;  %v7783_v9 = vadd.f32 %v5020_v19, %v5019_v53  ;;  %v5022_v22 = vpop.f32.mrb[110].mxu1 }
 0x3d9   : > { %v5109_v47 = vadd.f32 %v5108_v50, %v5107_v8  ;;  %v5110_v42 = vpop.f32.mrb[126].mxu0  ;;  %v5023_v17 = vpop.f32.mrb[111].mxu1 }
 0x3da   : > { %v5111_v54 = vpop.f32.mrb[127].mxu0  ;;  %v5024_v24 = vadd.f32 %v5023_v17, %v5022_v22 }
 0x3db   : > { %v5112_v31 = vadd.f32 %v5111_v54, %v5110_v42  ;;  %v7786_v55 = vadd.f32 %v5109_v47, %v7756_v29 }
 0x3dd   : > { %v7788_v20 = vadd.f32 %v5112_v31, %v5000_v34 }
 0x3de   : > { %v5025_v30 = vpop.f32.mrb[112].mxu1 }
 0x3df   : > { %v5113_v18 = vpop.f32.mrb[128].mxu0  ;;  %v5026_v37 = vpop.f32.mrb[113].mxu1 }
 0x3e0   : > { %v5114_v39 = vpop.f32.mrb[129].mxu0  ;;  %v7790_v11 = vadd.f32 %v5026_v37, %v5025_v30  ;;  %v5028_v15 = vpop.f32.mrb[114].mxu1 }
 0x3e1   : > { %v5115_v35 = vadd.f32 %v5114_v39, %v5113_v18  ;;  %v5116_v49 = vpop.f32.mrb[130].mxu0  ;;  %v5029_v28 = vpop.f32.mrb[115].mxu1 }
 0x3e2   : > { %v5117_v57 = vpop.f32.mrb[131].mxu0  ;;  %v7792_v13 = vadd.f32 %v5029_v28, %v5028_v15 }
 0x3e3   : > { %v5118_v63 = vadd.f32 %v5117_v57, %v5116_v49  ;;  %v7795_v27 = vadd.f32 %v5115_v35, %v7762_v23 }
 0x3e5   : > { %v7797_v29 = vadd.f32 %v5118_v63, %v5006_v0 }
 0x3e6   : > { %v5031_v34 = vpop.f32.mrb[116].mxu1 }
 0x3e7   : > { %v5119_v48 = vpop.f32.mrb[132].mxu0  ;;  %v5032_v10 = vpop.f32.mrb[117].mxu1 }
 0x3e8   : > { %v5120_v56 = vpop.f32.mrb[133].mxu0  ;;  %v7799_v32 = vadd.f32 %v5032_v10, %v5031_v34  ;;  %v5034_v38 = vpop.f32.mrb[118].mxu1  ;;  %v7829_v10 = vld [vmem:[%s8115_s6] ss:$0 sm:$0xff] }
 0x3e9   : > { %v5121_v25 = vadd.f32 %v5120_v56, %v5119_v48  ;;  %v5122_v41 = vpop.f32.mrb[134].mxu0  ;;  %v5035_v12 = vpop.f32.mrb[119].mxu1 }
 0x3ea   : > { %v5123_v26 = vpop.f32.mrb[135].mxu0  ;;  %v7801_v59 = vadd.f32 %v5035_v12, %v5034_v38 }
 0x3eb   : > { %v5124_v2 = vadd.f32 %v5123_v26, %v5122_v41  ;;  %v7804_v58 = vadd.f32 %v5121_v25, %v7769_v43 }
 0x3ed   : > { %v7806_v23 = vadd.f32 %v5124_v2, %v5012_v46 }
 0x3ee   : > { %v5037_v0 = vpop.f32.mrb[120].mxu1 }
 0x3ef   : > { %v5125_v5 = vpop.f32.mrb[136].mxu0  ;;  %v5038_v6 = vpop.f32.mrb[121].mxu1 }
 0x3f0   : > { %v5126_v60 = vpop.f32.mrb[137].mxu0  ;;  %v7808_v53 = vadd.f32 %v5038_v6, %v5037_v0  ;;  %v5040_v19 = vpop.f32.mrb[122].mxu1 }
 0x3f1   : > { %v5127_v8 = vadd.f32 %v5126_v60, %v5125_v5  ;;  %v5128_v50 = vpop.f32.mrb[138].mxu0  ;;  %v5041_v47 = vpop.f32.mrb[123].mxu1 }
 0x3f2   : > { %v5129_v22 = vpop.f32.mrb[139].mxu0  ;;  %v7810_v42 = vadd.f32 %v5041_v47, %v5040_v19 }
 0x3f3   : > { %v5130_v17 = vadd.f32 %v5129_v22, %v5128_v50  ;;  %v7813_v54 = vadd.f32 %v5127_v8, %v7776_v40 }
 0x3f5   : > { %v7815_v43 = vadd.f32 %v5130_v17, %v5018_v36  ;;  %v5376_v17 = vld [vmem:[%s5599_s17 + $0x10] sm:$0xff] }
 0x3f6   : > { %v5043_v46 = vpop.f32.mrb[124].mxu1 }
 0x3f7   : > { %v5131_v31 = vpop.f32.mrb[140].mxu0  ;;  %v5044_v30 = vpop.f32.mrb[125].mxu1 }
 0x3f8   : > { %v5132_v18 = vpop.f32.mrb[141].mxu0  ;;  %v7817_v37 = vadd.f32 %v5044_v30, %v5043_v46  ;;  %v5046_v35 = vpop.f32.mrb[126].mxu1  ;;  %v5377_v46 = vld [vmem:[%s5599_s17] sm:$0xff] }
 0x3f9   : > { %v5133_v39 = vadd.f32 %v5132_v18, %v5131_v31  ;;  %v5134_v15 = vpop.f32.mrb[142].mxu0  ;;  %v5047_v49 = vpop.f32.mrb[127].mxu1 }
 0x3fa   : > { %v5135_v28 = vpop.f32.mrb[143].mxu0  ;;  %v7819_v57 = vadd.f32 %v5047_v49, %v5046_v35 }
 0x3fb   : > { %v5136_v63 = vadd.f32 %v5135_v28, %v5134_v15  ;;  %v7822_v40 = vadd.f32 %v5133_v39, %v7783_v9  ;;  %v7836_v9 = vld [vmem:[%s8116_s7] ss:$0 sm:$0xff]  ;;  %v5378_v15 = vld [vmem:[%s5599_s17 + $0x18] sm:$0xff] }
 0x3fd   : > { %v7824_v36 = vadd.f32 %v5136_v63, %v5024_v24 }
 0x3fe   : > { %v5231_v48 = vpop.f32.mrb[128].mxu1 }
 0x3ff   : > { %v5137_v34 = vpop.f32.mrb[144].mxu0  ;;  %v4205_v56 = vadd.f32 %v5231_v48, %v7746_v45  ;;  %v4196_v38 = vpop.f32.mrb[129].mxu1  ;;  %v5379_v48 = vld [vmem:[%s5599_s17 + $0x8] sm:$0xff] }
 0x400   : > { %v5138_v25 = vpop.f32.mrb[145].mxu0  ;;  %v4197_v41 = vadd.f32 %v4196_v38, %v7740_v33  ;;  %v5232_v26 = vpop.f32.mrb[130].mxu1 }
 0x401   : > { %v5139_v24 = vadd.f32 %v5138_v25, %v5137_v34  ;;  %v5140_v12 = vpop.f32.mrb[146].mxu0  ;;  %v4332_v2 = vmul.f32 %v7829_v10, %v4205_v56  ;;  %v4208_v0 = vadd.f32 %v5232_v26, %v7748_v51  ;;  %v4199_v5 = vpop.f32.mrb[131].mxu1 }
 0x402   : > { %v5141_v45 = vpop.f32.mrb[147].mxu0  ;;  %v4330_v6 = vmul.f32 %v7829_v10, %v4197_v41  ;;  %v4200_v8 = vadd.f32 %v4199_v5, %v7742_v16 }
 0x403   : > { %v5142_v60 = vadd.f32 %v5141_v45, %v5140_v12  ;;  %v7844_v19 = vadd.f32 %v5139_v24, %v7790_v11  ;;  %v4371_v33 = vadd.f32 %v7836_v9, %v4332_v2  ;;  %v4333_v50 = vmul.f32 %v7829_v10, %v4208_v0 }
 0x404   : > { %v4369_v51 = vadd.f32 %v7836_v9, %v4330_v6  ;;  %v4331_v47 = vmul.f32 %v7829_v10, %v4200_v8 }
 0x405   : > { %v7853_v22 = vadd.f32 %v5142_v60, %v7792_v13  ;;  %v4403_v16 = vadd.f32 %v5376_v17, %v4371_v33  ;;  %v4372_v11 = vadd.f32 %v7836_v9, %v4333_v50 }
 0x406   : > { %v4401_v31 = vadd.f32 %v5377_v46, %v4369_v51  ;;  %v4370_v30 = vadd.f32 %v7836_v9, %v4331_v47  ;;  %v5235_v39 = vpop.f32.mrb[132].mxu1 }
 0x407   : > { %v5143_v18 = vpop.f32.mrb[148].mxu0  ;;  %v4435_v35 = vmax.f32 %v4403_v16, 0.0  ;;  %v4404_v49 = vadd.f32 %v5378_v15, %v4372_v11  ;;  %v4221_v28 = vadd.f32 %v5235_v39, %v7758_v44  ;;  %v4212_v34 = vpop.f32.mrb[133].mxu1  ;;  %v5381_v16 = vld [vmem:[%s5599_s17 + $0x20] sm:$0xff] }
 0x408   : > { %v5144_v63 = vpop.f32.mrb[149].mxu0  ;;  %v4433_v13 = vmax.f32 %v4401_v31, 0.0  ;;  %v4402_v56 = vadd.f32 %v5379_v48, %v4370_v30  ;;  %v4213_v38 = vadd.f32 %v4212_v34, %v7752_v61  ;;  %v5236_v41 = vpop.f32.mrb[134].mxu1 }
 0x409   : > { %v5145_v25 = vadd.f32 %v5144_v63, %v5143_v18  ;;  %v5146_v24 = vpop.f32.mrb[150].mxu0  ;;  %4467 = vst.msk [vmem:[%s7863_s22 + $0x10] sm:$0xff] %vm1342_vm4, %v4435_v35  ;;  %v4436_v12 = vmax.f32 %v4404_v49, 0.0  ;;  %v4336_v44 = vmul.f32 %v7829_v10, %v4221_v28  ;;  %v4224_v26 = vadd.f32 %v5236_v41, %v7760_v4  ;;  %v4215_v0 = vpop.f32.mrb[135].mxu1  ;;  %v5382_v18 = vld [vmem:[%s5599_s17 + $0x38] sm:$0xff]  ;;  %v5383_v28 = vld [vmem:[%s5599_s17 + $0x28] sm:$0xff] }
 0x40a   : > { %v5147_v2 = vpop.f32.mrb[151].mxu0  ;;  %4465 = vst.msk [vmem:[%s7863_s22] sm:$0xff] %vm1342_vm4, %v4433_v13  ;;  %v4434_v61 = vmax.f32 %v4402_v56, 0.0  ;;  %v4334_v45 = vmul.f32 %v7829_v10, %v4213_v38  ;;  %v4216_v6 = vadd.f32 %v4215_v0, %v7754_v14  ;;  %v5380_v14 = vld [vmem:[%s5599_s17 + $0x30] sm:$0xff] }
 0x40b   : > { %v5148_v5 = vadd.f32 %v5147_v2, %v5146_v24  ;;  %4468 = vst.msk [vmem:[%s7863_s22 + $0x18] sm:$0xff] %vm1342_vm4, %v4436_v12  ;;  %v4375_v60 = vadd.f32 %v7836_v9, %v4336_v44  ;;  %v4337_v8 = vmul.f32 %v7829_v10, %v4224_v26  ;;  %v7878_v4 = vadd.f32 %v5145_v25, %v7799_v32 }
 0x40c   : > { %4466 = vst.msk [vmem:[%s7863_s22 + $0x8] sm:$0xff] %vm1342_vm4, %v4434_v61  ;;  %v4373_v33 = vadd.f32 %v7836_v9, %v4334_v45  ;;  %v4335_v50 = vmul.f32 %v7829_v10, %v4216_v6 }
 0x40d   : > { %v7885_v51 = vadd.f32 %v5148_v5, %v7801_v59  ;;  %v4407_v47 = vadd.f32 %v5380_v14, %v4375_v60  ;;  %v4376_v17 = vadd.f32 %v7836_v9, %v4337_v8  ;;  %v5385_v8 = vld [vmem:[%s5599_s17 + $0x40] sm:$0xff] }
 0x40e   : > { %v4405_v11 = vadd.f32 %v5381_v16, %v4373_v33  ;;  %v4374_v46 = vadd.f32 %v7836_v9, %v4335_v50  ;;  %v5239_v31 = vpop.f32.mrb[136].mxu1 }
 0x40f   : > { %v5149_v32 = vpop.f32.mrb[152].mxu0  ;;  %v4439_v30 = vmax.f32 %v4407_v47, 0.0  ;;  %v4408_v39 = vadd.f32 %v5382_v18, %v4376_v17  ;;  %v4237_v35 = vadd.f32 %v5239_v31, %v7772_v7  ;;  %v4228_v15 = vpop.f32.mrb[137].mxu1  ;;  %v5386_v17 = vld [vmem:[%s5599_s17 + $0x58] sm:$0xff]  ;;  %v5387_v31 = vld [vmem:[%s5599_s17 + $0x48] sm:$0xff] }
 0x410   : > { %v5150_v59 = vpop.f32.mrb[153].mxu0  ;;  %v4437_v49 = vmax.f32 %v4405_v11, 0.0  ;;  %v4406_v63 = vadd.f32 %v5383_v28, %v4374_v46  ;;  %v4229_v13 = vadd.f32 %v4228_v15, %v7765_v62  ;;  %v5240_v56 = vpop.f32.mrb[138].mxu1 }
 0x411   : > { %v5151_v34 = vadd.f32 %v5150_v59, %v5149_v32  ;;  %v5152_v48 = vpop.f32.mrb[154].mxu0  ;;  %4471 = vst.msk [vmem:[%s7863_s22 + $0x30] sm:$0xff] %vm1342_vm4, %v4439_v30  ;;  %v4440_v25 = vmax.f32 %v4408_v39, 0.0  ;;  %v4340_v38 = vmul.f32 %v7829_v10, %v4237_v35  ;;  %v4240_v7 = vadd.f32 %v5240_v56, %v7774_v52  ;;  %v4231_v41 = vpop.f32.mrb[139].mxu1 }
 0x412   : > { %v5153_v24 = vpop.f32.mrb[155].mxu0  ;;  %4469 = vst.msk [vmem:[%s7863_s22 + $0x20] sm:$0xff] %vm1342_vm4, %v4437_v49  ;;  %v4438_v12 = vmax.f32 %v4406_v63, 0.0  ;;  %v4338_v44 = vmul.f32 %v7829_v10, %v4229_v13  ;;  %v4232_v26 = vadd.f32 %v4231_v41, %v7767_v1  ;;  %v5384_v1 = vld [vmem:[%s5599_s17 + $0x50] sm:$0xff] }
 0x413   : > { %v5154_v62 = vadd.f32 %v5153_v24, %v5152_v48  ;;  %4472 = vst.msk [vmem:[%s7863_s22 + $0x38] sm:$0xff] %vm1342_vm4, %v4440_v25  ;;  %v4379_v2 = vadd.f32 %v7836_v9, %v4340_v38  ;;  %v4341_v0 = vmul.f32 %v7829_v10, %v4240_v7  ;;  %v7908_v52 = vadd.f32 %v5151_v34, %v7808_v53 }
 0x414   : > { %4470 = vst.msk [vmem:[%s7863_s22 + $0x28] sm:$0xff] %vm1342_vm4, %v4438_v12  ;;  %v4377_v61 = vadd.f32 %v7836_v9, %v4338_v44  ;;  %v4339_v45 = vmul.f32 %v7829_v10, %v4232_v26  ;;  %v5389_v44 = vld [vmem:[%s5599_s17 + $0x60] sm:$0xff] }
 0x415   : > { %v7915_v5 = vadd.f32 %v5154_v62, %v7810_v42  ;;  %v4411_v6 = vadd.f32 %v5384_v1, %v4379_v2  ;;  %v4380_v60 = vadd.f32 %v7836_v9, %v4341_v0  ;;  %v5390_v0 = vld [vmem:[%s5599_s17 + $0x78] sm:$0xff] }
 0x416   : > { %v4409_v33 = vadd.f32 %v5385_v8, %v4377_v61  ;;  %v4378_v50 = vadd.f32 %v7836_v9, %v4339_v45  ;;  %v5243_v14 = vpop.f32.mrb[140].mxu1 }
 0x417   : > { %v5155_v53 = vpop.f32.mrb[156].mxu0  ;;  %v4443_v47 = vmax.f32 %v4411_v6, 0.0  ;;  %v4412_v16 = vadd.f32 %v5386_v17, %v4380_v60  ;;  %v4253_v11 = vadd.f32 %v5243_v14, %v7786_v55  ;;  %v4244_v46 = vpop.f32.mrb[141].mxu1  ;;  %v5391_v6 = vld [vmem:[%s5599_s17 + $0x68] sm:$0xff] }
 0x418   : > { %v5156_v42 = vpop.f32.mrb[157].mxu0  ;;  %v4441_v32 = vmax.f32 %v4409_v33, 0.0  ;;  %v4410_v30 = vadd.f32 %v5387_v31, %v4378_v50  ;;  %v4245_v39 = vadd.f32 %v4244_v46, %v7779_v3  ;;  %v5244_v59 = vpop.f32.mrb[142].mxu1  ;;  %v5392_v46 = vld [vmem:[%s5599_s17 + $0x90] sm:$0xff] }
 0x419   : > { %v5157_v18 = vadd.f32 %v5156_v42, %v5155_v53  ;;  %v5158_v35 = vpop.f32.mrb[158].mxu0  ;;  %4475 = vst.msk [vmem:[%s7863_s22 + $0x50] sm:$0xff] %vm1342_vm4, %v4443_v47  ;;  %v4444_v15 = vmax.f32 %v4412_v16, 0.0  ;;  %v4344_v49 = vmul.f32 %v7829_v10, %v4253_v11  ;;  %v4256_v55 = vadd.f32 %v5244_v59, %v7788_v20  ;;  %v4247_v63 = vpop.f32.mrb[143].mxu1  ;;  %v5394_v59 = vld [vmem:[%s5599_s17 + $0x98] sm:$0xff] }
 0x41a   : > { %v5159_v28 = vpop.f32.mrb[159].mxu0  ;;  %4473 = vst.msk [vmem:[%s7863_s22 + $0x40] sm:$0xff] %vm1342_vm4, %v4441_v32  ;;  %v4442_v34 = vmax.f32 %v4410_v30, 0.0  ;;  %v4342_v13 = vmul.f32 %v7829_v10, %v4245_v39  ;;  %v4248_v48 = vadd.f32 %v4247_v63, %v7781_v21  ;;  %v5388_v21 = vld [vmem:[%s5599_s17 + $0x70] sm:$0xff]  ;;  %v5393_v30 = vld [vmem:[%s5599_s17 + $0x80] sm:$0xff]  ;;  %v5395_v63 = vld [vmem:[%s5599_s17 + $0x88] sm:$0xff] }
 0x41b   : > { %v5160_v3 = vadd.f32 %v5159_v28, %v5158_v35  ;;  %4476 = vst.msk [vmem:[%s7863_s22 + $0x58] sm:$0xff] %vm1342_vm4, %v4444_v15  ;;  %v4383_v56 = vadd.f32 %v7836_v9, %v4344_v49  ;;  %v4345_v25 = vmul.f32 %v7829_v10, %v4256_v55  ;;  %v7938_v20 = vadd.f32 %v5157_v18, %v7817_v37 }
 0x41c   : > { %4474 = vst.msk [vmem:[%s7863_s22 + $0x48] sm:$0xff] %vm1342_vm4, %v4442_v34  ;;  %v4381_v38 = vadd.f32 %v7836_v9, %v4342_v13  ;;  %v4343_v7 = vmul.f32 %v7829_v10, %v4248_v48 }
 0x41d   : > { %v7945_v24 = vadd.f32 %v5160_v3, %v7819_v57  ;;  %v4415_v41 = vadd.f32 %v5388_v21, %v4383_v56  ;;  %v4384_v12 = vadd.f32 %v7836_v9, %v4345_v25 }
 0x41e   : > { %v4413_v62 = vadd.f32 %v5389_v44, %v4381_v38  ;;  %v4382_v37 = vadd.f32 %v7836_v9, %v4343_v7  ;;  %v5247_v26 = vpop.f32.mrb[144].mxu1  ;;  %v5396_v44 = vld [vmem:[%s5599_s17 + $0xb0] sm:$0xff] }
 0x41f   : > { %v4447_v2 = vmax.f32 %v4415_v41, 0.0  ;;  %v4416_v61 = vadd.f32 %v5390_v0, %v4384_v12  ;;  %v4269_v45 = vadd.f32 %v5247_v26, %v7804_v58  ;;  %v4260_v1 = vpop.f32.mrb[145].mxu1  ;;  %v5397_v26 = vld [vmem:[%s5599_s17 + $0xa0] sm:$0xff] }
 0x420   : > { %v4445_v57 = vmax.f32 %v4413_v62, 0.0  ;;  %v4414_v60 = vadd.f32 %v5391_v6, %v4382_v37  ;;  %v4261_v8 = vadd.f32 %v4260_v1, %v7795_v27  ;;  %v5248_v33 = vpop.f32.mrb[146].mxu1 }
 0x421   : > { %4479 = vst.msk [vmem:[%s7863_s22 + $0x70] sm:$0xff] %vm1342_vm4, %v4447_v2  ;;  %v4448_v50 = vmax.f32 %v4416_v61, 0.0  ;;  %v4348_v53 = vmul.f32 %v7829_v10, %v4269_v45  ;;  %v4272_v14 = vadd.f32 %v5248_v33, %v7806_v23  ;;  %v4263_v47 = vpop.f32.mrb[147].mxu1  ;;  %v5398_v45 = vld [vmem:[%s5599_s17 + $0xb8] sm:$0xff] }
 0x422   : > { %4477 = vst.msk [vmem:[%s7863_s22 + $0x60] sm:$0xff] %vm1342_vm4, %v4445_v57  ;;  %v4446_v58 = vmax.f32 %v4414_v60, 0.0  ;;  %v4346_v17 = vmul.f32 %v7829_v10, %v4261_v8  ;;  %v4264_v16 = vadd.f32 %v4263_v47, %v7797_v29  ;;  %v5399_v8 = vld [vmem:[%s5599_s17 + $0xa8] sm:$0xff] }
 0x423   : > { %4480 = vst.msk [vmem:[%s7863_s22 + $0x78] sm:$0xff] %vm1342_vm4, %v4448_v50  ;;  %v4387_v27 = vadd.f32 %v7836_v9, %v4348_v53  ;;  %v4349_v11 = vmul.f32 %v7829_v10, %v4272_v14 }
 0x424   : > { %4478 = vst.msk [vmem:[%s7863_s22 + $0x68] sm:$0xff] %vm1342_vm4, %v4446_v58  ;;  %v4385_v23 = vadd.f32 %v7836_v9, %v4346_v17  ;;  %v4347_v42 = vmul.f32 %v7829_v10, %v4264_v16 }
 0x425   : > { %v4419_v32 = vadd.f32 %v5392_v46, %v4387_v27  ;;  %v4388_v31 = vadd.f32 %v7836_v9, %v4349_v11 }
 0x426   : > { %v4417_v29 = vadd.f32 %v5393_v30, %v4385_v23  ;;  %v4386_v18 = vadd.f32 %v7836_v9, %v4347_v42  ;;  %v5251_v39 = vpop.f32.mrb[148].mxu1  ;;  %v5400_v42 = vld [vmem:[%s5599_s17 + $0xd0] sm:$0xff] }
 0x427   : > { %v4451_v35 = vmax.f32 %v4419_v32, 0.0  ;;  %v4420_v15 = vadd.f32 %v5394_v59, %v4388_v31  ;;  %v4285_v49 = vadd.f32 %v5251_v39, %v7822_v40  ;;  %v4276_v55 = vpop.f32.mrb[149].mxu1  ;;  %v5401_v31 = vld [vmem:[%s5599_s17 + $0xc0] sm:$0xff]  ;;  %v5402_v39 = vld [vmem:[%s5599_s17 + $0xd8] sm:$0xff] }
 0x428   : > { %v4449_v28 = vmax.f32 %v4417_v29, 0.0  ;;  %v4418_v34 = vadd.f32 %v5395_v63, %v4386_v18  ;;  %v4277_v13 = vadd.f32 %v4276_v55, %v7813_v54  ;;  %v5252_v3 = vpop.f32.mrb[150].mxu1  ;;  %v5403_v55 = vld [vmem:[%s5599_s17 + $0xc8] sm:$0xff] }
 0x429   : > { %4483 = vst.msk [vmem:[%s7863_s22 + $0x90] sm:$0xff] %vm1342_vm4, %v4451_v35  ;;  %v4452_v48 = vmax.f32 %v4420_v15, 0.0  ;;  %v4352_v56 = vmul.f32 %v7829_v10, %v4285_v49  ;;  %v4288_v25 = vadd.f32 %v5252_v3, %v7824_v36  ;;  %v4279_v38 = vpop.f32.mrb[151].mxu1 }
 0x42a   : > { %4481 = vst.msk [vmem:[%s7863_s22 + $0x80] sm:$0xff] %vm1342_vm4, %v4449_v28  ;;  %v4450_v40 = vmax.f32 %v4418_v34, 0.0  ;;  %v4350_v7 = vmul.f32 %v7829_v10, %v4277_v13  ;;  %v4280_v21 = vadd.f32 %v4279_v38, %v7815_v43 }
 0x42b   : > { %4484 = vst.msk [vmem:[%s7863_s22 + $0x98] sm:$0xff] %vm1342_vm4, %v4452_v48  ;;  %v4391_v54 = vadd.f32 %v7836_v9, %v4352_v56  ;;  %v4353_v41 = vmul.f32 %v7829_v10, %v4288_v25 }
 0x42c   : > { %4482 = vst.msk [vmem:[%s7863_s22 + $0x88] sm:$0xff] %vm1342_vm4, %v4450_v40  ;;  %v4389_v36 = vadd.f32 %v7836_v9, %v4350_v7  ;;  %v4351_v12 = vmul.f32 %v7829_v10, %v4280_v21  ;;  %v5404_v21 = vld [vmem:[%s5599_s17 + $0xf0] sm:$0xff] }
 0x42d   : > { %v4423_v62 = vadd.f32 %v5396_v44, %v4391_v54  ;;  %v4392_v37 = vadd.f32 %v7836_v9, %v4353_v41 }
 0x42e   : > { %v4421_v43 = vadd.f32 %v5397_v26, %v4389_v36  ;;  %v4390_v2 = vadd.f32 %v7836_v9, %v4351_v12  ;;  %v5255_v0 = vpop.f32.mrb[152].mxu1 }
 0x42f   : > { %v4455_v61 = vmax.f32 %v4423_v62, 0.0  ;;  %v4424_v1 = vadd.f32 %v5398_v45, %v4392_v37  ;;  %v4301_v57 = vadd.f32 %v5255_v0, %v7878_v4  ;;  %v4292_v6 = vpop.f32.mrb[153].mxu1  ;;  %v5406_v62 = vld [vmem:[%s5599_s17 + $0xf8] sm:$0xff] }
 0x430   : > { %v4453_v60 = vmax.f32 %v4421_v43, 0.0  ;;  %v4422_v33 = vadd.f32 %v5399_v8, %v4390_v2  ;;  %v4293_v50 = vadd.f32 %v4292_v6, %v7844_v19  ;;  %v5256_v53 = vpop.f32.mrb[154].mxu1 }
 0x431   : > { %4487 = vst.msk [vmem:[%s7863_s22 + $0xb0] sm:$0xff] %vm1342_vm4, %v4455_v61  ;;  %v4456_v14 = vmax.f32 %v4424_v1, 0.0  ;;  %v4356_v47 = vmul.f32 %v7829_v10, %v4301_v57  ;;  %v4304_v58 = vadd.f32 %v5256_v53, %v7885_v51  ;;  %v4295_v17 = vpop.f32.mrb[155].mxu1 }
 0x432   : > { %4485 = vst.msk [vmem:[%s7863_s22 + $0xa0] sm:$0xff] %vm1342_vm4, %v4453_v60  ;;  %v4454_v4 = vmax.f32 %v4422_v33, 0.0  ;;  %v4354_v16 = vmul.f32 %v7829_v10, %v4293_v50  ;;  %v4296_v27 = vadd.f32 %v4295_v17, %v7853_v22 }
 0x433   : > { %4488 = vst.msk [vmem:[%s7863_s22 + $0xb8] sm:$0xff] %vm1342_vm4, %v4456_v14  ;;  %v4395_v19 = vadd.f32 %v7836_v9, %v4356_v47  ;;  %v4357_v11 = vmul.f32 %v7829_v10, %v4304_v58 }
 0x434   : > { %4486 = vst.msk [vmem:[%s7863_s22 + $0xa8] sm:$0xff] %vm1342_vm4, %v4454_v4  ;;  %v4393_v51 = vadd.f32 %v7836_v9, %v4354_v16  ;;  %v4355_v23 = vmul.f32 %v7829_v10, %v4296_v27 }
 0x435   : > { %v4427_v46 = vadd.f32 %v5400_v42, %v4395_v19  ;;  %v4396_v32 = vadd.f32 %v7836_v9, %v4357_v11 }
 0x436   : > { %v4425_v22 = vadd.f32 %v5401_v31, %v4393_v51  ;;  %v4394_v30 = vadd.f32 %v7836_v9, %v4355_v23  ;;  %v5259_v29 = vpop.f32.mrb[156].mxu1 }
 0x437   : > { %v4459_v18 = vmax.f32 %v4427_v46, 0.0  ;;  %v4428_v35 = vadd.f32 %v5402_v39, %v4396_v32  ;;  %v4317_v59 = vadd.f32 %v5259_v29, %v7938_v20  ;;  %v4308_v15 = vpop.f32.mrb[157].mxu1 }
 0x438   : > { %v4457_v49 = vmax.f32 %v4425_v22, 0.0  ;;  %v4426_v28 = vadd.f32 %v5403_v55, %v4394_v30  ;;  %v4309_v63 = vadd.f32 %v4308_v15, %v7908_v52  ;;  %v5260_v34 = vpop.f32.mrb[158].mxu1 }
 0x439   : > { %4491 = vst.msk [vmem:[%s7863_s22 + $0xd0] sm:$0xff] %vm1342_vm4, %v4459_v18  ;;  %v4460_v13 = vmax.f32 %v4428_v35, 0.0  ;;  %v4360_v3 = vmul.f32 %v7829_v10, %v4317_v59  ;;  %v4320_v48 = vadd.f32 %v5260_v34, %v7945_v24  ;;  %v4311_v56 = vpop.f32.mrb[159].mxu1 }
 0x43a   : > { %4489 = vst.msk [vmem:[%s7863_s22 + $0xc0] sm:$0xff] %vm1342_vm4, %v4457_v49  ;;  %v4458_v20 = vmax.f32 %v4426_v28, 0.0  ;;  %v4358_v25 = vmul.f32 %v7829_v10, %v4309_v63  ;;  %v4312_v52 = vadd.f32 %v4311_v56, %v7915_v5  ;;  %v5405_v5 = vld [vmem:[%s5599_s17 + $0xe0] sm:$0xff] }
 0x43b   : > { %4492 = vst.msk [vmem:[%s7863_s22 + $0xd8] sm:$0xff] %vm1342_vm4, %v4460_v13  ;;  %v4399_v38 = vadd.f32 %v7836_v9, %v4360_v3  ;;  %v4361_v40 = vmul.f32 %v7829_v10, %v4320_v48 }
 0x43c   : > { %4490 = vst.msk [vmem:[%s7863_s22 + $0xc8] sm:$0xff] %vm1342_vm4, %v4458_v20  ;;  %v4397_v24 = vadd.f32 %v7836_v9, %v4358_v25  ;;  %v4359_v7 = vmul.f32 %v7829_v10, %v4312_v52  ;;  %v5407_v10 = vld [vmem:[%s5599_s17 + $0xe8] sm:$0xff]  ;;  %s5408_s17 = scalar_lea.vmem %s8058_s25, 4096 }
 0x43d   : > { %v4431_v54 = vadd.f32 %v5404_v21, %v4399_v38  ;;  %v4400_v41 = vadd.f32 %v7836_v9, %v4361_v40  ;;  %p5409_p11 = scmp.ne.s32.totalorder %s8058_s25, %s5408_s17  ;;  %p5416_p1 = scmp.lt.s32.totalorder %s5414_s30, %s5408_s17 }
 0x43e   : > { %v4429_v36 = vadd.f32 %v5405_v5, %v4397_v24  ;;  %v4398_v12 = vadd.f32 %v7836_v9, %v4359_v7 }
 0x43f   : > { %v4463_v44 = vmax.f32 %v4431_v54, 0.0  ;;  %v4432_v37 = vadd.f32 %v5406_v62, %v4400_v41  ;;  %p5410_p12 = pnand %p5409_p11, %p5570_p5  ;;  %p5417_p2 = por %p5416_p1, %p5415_p0 }
 0x440   : > { %v4461_v26 = vmax.f32 %v4429_v36, 0.0  ;;  %v4430_v43 = vadd.f32 %v5407_v10, %v4398_v12 }
 0x441   : > { %4495 = vst.msk [vmem:[%s7863_s22 + $0xf0] sm:$0xff] %vm1342_vm4, %v4463_v44  ;;  %v4464_v2 = vmax.f32 %v4432_v37, 0.0  ;;  %p5411_p13 = pneg %p5410_p12 }
 0x442   : > { %4493 = vst.msk [vmem:[%s7863_s22 + $0xe0] sm:$0xff] %vm1342_vm4, %v4461_v26  ;;  %v4462_v9 = vmax.f32 %v4430_v43, 0.0 }
 0x443   : > { %4496 = vst.msk [vmem:[%s7863_s22 + $0xf8] sm:$0xff] %vm1342_vm4, %v4464_v2  ;;  %p5418_p3 = pnand %p5417_p2, %p5411_p13 }
 0x444   : > { %4494 = vst.msk [vmem:[%s7863_s22 + $0xe8] sm:$0xff] %vm1342_vm4, %v4462_v9 }
 0x445   : > { %5421 = shalt.err (!%p5418_p3)
}
 0x446   : > { %s5422_s11 = scalar_lea.hbm %s8056_s28, 4096  ;;  %s5426_s18 = scalar_lea.hbm %s8119_s10, 8192 }
 0x447   : > { %p5423_p4 = scmp.ne.s32.totalorder %s8056_s28, %s5422_s11  ;;  %p5427_p9 = scmp.lt.u32.totalorder %s8056_s28, %s8119_s10 }
 0x448   : > { %p5428_p10 = scmp.lt.u32.totalorder %s5426_s18, %s5422_s11  ;;  %p5430_p12 = scmp.lt.u32.totalorder %s5422_s11, %s8056_s28 }
 0x449   : > { %p5424_p7 = pnand %p5423_p4, %p5570_p5 }
 0x44a   : > { %p5429_p11 = por %p5428_p10, %p5427_p9 }
 0x44b   : > { %p5425_p8 = pneg %p5424_p7 }
 0x44c   : > { %p5431_p13 = por %p5430_p12, %p5429_p11 }
 0x44e   : > { %p5432_p0 = pnand %p5431_p13, %p5425_p8 }
 0x450   : > { %5435 = shalt.err (!%p5432_p0)
}
 0x451   : > { %s5475_s26 = smov 128   ;;  %s5476_s27 = smov 8  }
 0x452   : > { %5261 = dma.vmem_to_hbm [thread:$0]  (%p5570_p5), %s8058_s25, 4096, %s8056_s28, %s8068_s8, %s5475_s26, %s5475_s26, %s5476_s27  }
 0x453 PF: > { %p5267_p1 = scmp.ge.s32.totalorder %s5470_s15, 2  ;;  %s4526_s17 = sand.u32 1, %s5458_s12  }
 0x454   : > { %s4527_s29 = scalar_lea.sflag [#allocation3], %s4526_s17 }
 0x455   : > { %p5264_p2 = pnand %p5267_p1, %p5574_p6 }
 0x457   : > { %5453 = dma.done.wait (!%p5264_p2), %s4527_s29, 4096  }
 0x458   : > { %5455 = vsyncadd (!%p5264_p2), %s4527_s29, 4294963200  ;;  %p20_p3 = scmp.ge.s32.totalorder %s5557_s16, 4   ;;  %s8250_s12 = smov %s5462_s13 }
 0x459   : > { %s8251_s13 = smov %s5466_s14  ;;  %s8252_s14 = smov %s5568_s19 }
 0x45a   : > { %s8253_s15 = smov %s5557_s16  ;;  %22 = sbr.rel (!%p20_p3) target bundleno = 3 (0x3), region = 95 }
 0x461   :  { %4532 = vsyncpa [#allocation3], 1 }
 0x462   :  { %4534 = vsyncpa [#allocation3 + $0x1], 1 }

</bundles_post_ra>
